<compile_context>
chip_gen: v5e
topology: v5e:2x2
jax: 0.10.0
libtpu: 0.0.40
codegen_flags: <defaults>
</compile_context>

<pallas_src>
import math

import jax
import jax.numpy as jnp
from jax.experimental import pallas as pl
from jax.experimental.pallas import tpu as pltpu

_NEG_INF = -1e30   # Python float: finite large-negative mask value (no NaN rows,
                   # and never captured as a jnp constant inside a kernel).


# ---------------------------------------------------------------------------
# Generation-dependent sizing (bigger tiles / VMEM on 128-MiB parts, conservative
# on v7x's 64 MiB).  Falls back safely off-TPU / in interpret mode.
# ---------------------------------------------------------------------------
def _tpu_generation():
    try:
        kind = jax.devices()[0].device_kind.lower()
    except Exception:
        kind = ""
    if "v7" in kind or "7x" in kind:
        return "v7x"
    if "v6" in kind:
        return "v6"
    if "v5" in kind:
        return "v5"
    return "other"


_GEN = _tpu_generation()
if _GEN in ("v5", "v6"):
    _VMEM_LIMIT = 96 * 1024 * 1024     # 128 MiB physical VMEM parts
    _ROW_TILE = 512                    # FFN / final-FC row tile target
else:                                  # v7x (64 MiB VMEM) or unknown: conservative
    _VMEM_LIMIT = 48 * 1024 * 1024
    _ROW_TILE = 256
_Q_TILE = 128                          # MHA query-tile target


def _pick_tile(n, preferred, quantum):
    """Largest multiple of `quantum` that divides n and is <= preferred, else full n."""
    if n <= preferred:
        return n
    t = (preferred // quantum) * quantum
    while t >= quantum:
        if n % t == 0:
            return t
        t -= quantum
    return n


def _buffered_kwargs():
    """pipeline_mode=pl.Buffered(1) for operands whose block index never changes
    (halves their VMEM footprint); degrades gracefully if the API is unavailable."""
    try:
        pl.BlockSpec((8, 128), lambda i: (0, 0), pipeline_mode=pl.Buffered(1))
        return {"pipeline_mode": pl.Buffered(1)}
    except Exception:
        return {}


_BUFFERED_KW = _buffered_kwargs()


def _const_spec(shape, index_map):
    return pl.BlockSpec(shape, index_map, **_BUFFERED_KW)


# ---------------------------------------------------------------------------
# Shared in-kernel math
# ---------------------------------------------------------------------------
def _layer_norm(y, gamma, beta):
    mu = jnp.mean(y, axis=-1, keepdims=True)
    var = jnp.mean(jnp.square(y - mu), axis=-1, keepdims=True)
    return (y - mu) * jax.lax.rsqrt(var + 1e-5) * gamma + beta


def _attn_heads(q, kvp, bias, wo, bo, nhead, scale):
    """q: (tq, H) f32; kvp: (S, 2H) f32; bias broadcastable to (tq, S) f32;
    wo: (H, H) bf16; bo: (1, H) f32.  Returns (attn_out (tq,H) f32,
    head-averaged probs (tq,S) f32)."""
    H = q.shape[1]
    hd = H // nhead
    k = kvp[:, :H]
    v = kvp[:, H:]
    out = None
    attn = None
    # Static head loop (nhead=4).  Head slices land at hd-multiples: keep H/nhead a
    # multiple of 128 in production configs for vreg-aligned slices.
    # TODO(synk): for large nhead convert to lax.fori_loop(unroll=True) to bound
    # per-head live ranges (needs 128-aligned head_dim for dynamic lane slicing).
    for h in range(nhead):
        sl = slice(h * hd, (h + 1) * hd)
        qh = (q[:, sl] * scale).astype(jnp.bfloat16)
        kh = k[:, sl].astype(jnp.bfloat16)
        vh = v[:, sl].astype(jnp.bfloat16)
        s = jax.lax.dot_general(qh, kh, (((1,), (1,)), ((), ())),
                                preferred_element_type=jnp.float32) + bias
        m = jnp.max(s, axis=-1, keepdims=True)
        e = jnp.exp(s - m)
        p = e / jnp.sum(e, axis=-1, keepdims=True)   # exact divide (parity of attn maps)
        ctx = jnp.dot(p.astype(jnp.bfloat16), vh, preferred_element_type=jnp.float32)
        # out-projection folded per head: concat_h(ctx_h) @ Wo == sum_h ctx_h @ Wo[h]
        oh = jnp.dot(ctx.astype(jnp.bfloat16), wo[sl, :],
                     preferred_element_type=jnp.float32)
        out = oh if out is None else out + oh
        attn = p if attn is None else attn + p
    return out + bo, attn * (1.0 / nhead)


# ---------------------------------------------------------------------------
# Fused self-attention (+ residual + LayerNorm): grid (B, T // tq)
# x is passed ONCE; the query tile is sliced in-kernel; causal mask built in-kernel.
# ---------------------------------------------------------------------------
def _make_self_attn_kernel(nhead, scale, tq, nq):
    def kernel(x_ref, wq_ref, bq_ref, wkv_ref, bkv_ref, wo_ref, bo_ref,
               g_ref, beta_ref, xo_ref, attn_ref):
        xf = x_ref[0]                                   # (T, H) bf16, full sequence (K/V)
        T = xf.shape[0]
        if nq == 1:
            q0 = 0
            xq = xf
        else:
            q0 = pl.program_id(1) * tq
            xq = jax.lax.dynamic_slice_in_dim(xf, q0, tq, axis=0)

        q = jnp.dot(xq, wq_ref[...], preferred_element_type=jnp.float32) + bq_ref[...]
        kvp = jnp.dot(xf, wkv_ref[...], preferred_element_type=jnp.float32) + bkv_ref[...]

        row = q0 + jax.lax.broadcasted_iota(jnp.int32, (tq, T), 0)
        col = jax.lax.broadcasted_iota(jnp.int32, (tq, T), 1)
        bias = jnp.where(col > row, _NEG_INF, 0.0).astype(jnp.float32)

        out, attn = _attn_heads(q, kvp, bias, wo_ref[...], bo_ref[...], nhead, scale)
        y = xq.astype(jnp.float32) + out
        xo_ref[0] = _layer_norm(y, g_ref[...], beta_ref[...]).astype(xo_ref.dtype)
        attn_ref[0] = attn
    return kernel


def fused_self_attn_add_ln(x, p, gamma, beta, *, nhead):
    """x: (B, T, H) bf16 -> (x_out (B,T,H) bf16, attn (B,T,T) f32)."""
    B, T, H = x.shape
    scale = 1.0 / math.sqrt(H // nhead)
    tq = _pick_tile(T, _Q_TILE, 16)
    nq = T // tq
    kernel = _make_self_attn_kernel(nhead, scale, tq, nq)
    cmap = lambda b, qt: (0, 0)
    x_out, attn = pl.pallas_call(
        kernel,
        grid=(B, nq),
        in_specs=[
            pl.BlockSpec((1, T, H), lambda b, qt: (b, 0, 0)),   # x (Q tile sliced in-kernel)
            _const_spec((H, H), cmap),                          # wq   (resident, single-buffer)
            _const_spec((1, H), cmap),                          # bq
            _const_spec((H, 2 * H), cmap),                      # wkv
            _const_spec((1, 2 * H), cmap),                      # bkv
            _const_spec((H, H), cmap),                          # wo
            _const_spec((1, H), cmap),                          # bo
            _const_spec((1, H), cmap),                          # ln gamma
            _const_spec((1, H), cmap),                          # ln beta
        ],
        out_specs=(pl.BlockSpec((1, tq, H), lambda b, qt: (b, qt, 0)),
                   pl.BlockSpec((1, tq, T), lambda b, qt: (b, qt, 0))),
        out_shape=(jax.ShapeDtypeStruct((B, T, H), x.dtype),
                   jax.ShapeDtypeStruct((B, T, T), jnp.float32)),
        compiler_params=pltpu.CompilerParams(
            dimension_semantics=("parallel", "parallel"),
            vmem_limit_bytes=_VMEM_LIMIT),
    )(x, p['wq'], p['bq'], p['wkv'], p['bkv'], p['wo'], p['bo'], gamma, beta)
    return x_out, attn


# ---------------------------------------------------------------------------
# Fused cross-attention (+ residual + LayerNorm): grid (B, T // tq)
# ---------------------------------------------------------------------------
def _make_cross_attn_kernel(nhead, scale):
    def kernel(x_ref, kv_ref, kb_ref, wq_ref, bq_ref, wkv_ref, bkv_ref,
               wo_ref, bo_ref, g_ref, beta_ref, xo_ref, attn_ref):
        xq = x_ref[0]                                    # (tq, H) bf16
        kv = kv_ref[0]                                   # (S, H) bf16
        q = jnp.dot(xq, wq_ref[...], preferred_element_type=jnp.float32) + bq_ref[...]
        kvp = jnp.dot(kv, wkv_ref[...], preferred_element_type=jnp.float32) + bkv_ref[...]
        bias = kb_ref[0]                                 # (1, S) f32 key-padding bias
        out, attn = _attn_heads(q, kvp, bias, wo_ref[...], bo_ref[...], nhead, scale)
        y = xq.astype(jnp.float32) + out
        xo_ref[0] = _layer_norm(y, g_ref[...], beta_ref[...]).astype(xo_ref.dtype)
        attn_ref[0] = attn
    return kernel


def fused_cross_attn_add_ln(x, kv, kbias, p, gamma, beta, *, nhead):
    """x: (B,T,H) bf16; kv: (B,S,H) bf16; kbias: (B,1,S) f32 additive key bias."""
    B, T, H = x.shape
    S = kv.shape[1]
    scale = 1.0 / math.sqrt(H // nhead)
    tq = _pick_tile(T, _Q_TILE, 16)
    nq = T // tq
    kernel = _make_cross_attn_kernel(nhead, scale)
    cmap = lambda b, qt: (0, 0)
    x_out, attn = pl.pallas_call(
        kernel,
        grid=(B, nq),
        in_specs=[
            pl.BlockSpec((1, tq, H), lambda b, qt: (b, qt, 0)),  # x (query tile)
            pl.BlockSpec((1, S, H), lambda b, qt: (b, 0, 0)),    # memory (full S)
            pl.BlockSpec((1, 1, S), lambda b, qt: (b, 0, 0)),    # key-padding bias
            _const_spec((H, H), cmap),                           # wq
            _const_spec((1, H), cmap),                           # bq
            _const_spec((H, 2 * H), cmap),                       # wkv
            _const_spec((1, 2 * H), cmap),                       # bkv
            _const_spec((H, H), cmap),                           # wo
            _const_spec((1, H), cmap),                           # bo
            _const_spec((1, H), cmap),                           # ln gamma
            _const_spec((1, H), cmap),                           # ln beta
        ],
        out_specs=(pl.BlockSpec((1, tq, H), lambda b, qt: (b, qt, 0)),
                   pl.BlockSpec((1, tq, S), lambda b, qt: (b, qt, 0))),
        out_shape=(jax.ShapeDtypeStruct((B, T, H), x.dtype),
                   jax.ShapeDtypeStruct((B, T, S), jnp.float32)),
        compiler_params=pltpu.CompilerParams(
            dimension_semantics=("parallel", "parallel"),
            vmem_limit_bytes=_VMEM_LIMIT),
    )(x, kv, kbias, p['wq'], p['bq'], p['wkv'], p['bkv'], p['wo'], p['bo'], gamma, beta)
    return x_out, attn


# ---------------------------------------------------------------------------
# Fused FFN (+ residual + LayerNorm), gridded over row tiles
# ---------------------------------------------------------------------------
def _ffn_add_ln_kernel(x_ref, w1_ref, b1_ref, w2_ref, b2_ref, g_ref, beta_ref, o_ref):
    x = x_ref[...]                                                     # (tm, H) bf16
    h = jnp.dot(x, w1_ref[...], preferred_element_type=jnp.float32) + b1_ref[...]
    # tanh-approx GELU (EUP); flip to approximate=False for exact erf parity.
    h = jax.nn.gelu(h, approximate=True)
    y = x.astype(jnp.float32) + jnp.dot(h.astype(jnp.bfloat16), w2_ref[...],
                                        preferred_element_type=jnp.float32) + b2_ref[...]
    o_ref[...] = _layer_norm(y, g_ref[...], beta_ref[...]).astype(o_ref.dtype)


def fused_ffn_add_ln(x, w1, b1, w2, b2, gamma, beta):
    B, T, H = x.shape
    N = B * T
    F = w1.shape[1]
    tm = _pick_tile(N, _ROW_TILE, 16)
    cmap = lambda i: (0, 0)
    out = pl.pallas_call(
        _ffn_add_ln_kernel,
        grid=(N // tm,),
        in_specs=[
            pl.BlockSpec((tm, H), lambda i: (i, 0)),
            _const_spec((H, F), cmap),    # w1 resident, single-buffer
            _const_spec((1, F), cmap),
            _const_spec((F, H), cmap),    # w2 resident, single-buffer
            _const_spec((1, H), cmap),
            _const_spec((1, H), cmap),
            _const_spec((1, H), cmap),
        ],
        out_specs=pl.BlockSpec((tm, H), lambda i: (i, 0)),
        out_shape=jax.ShapeDtypeStruct((N, H), x.dtype),
        compiler_params=pltpu.CompilerParams(
            dimension_semantics=("parallel",),
            vmem_limit_bytes=_VMEM_LIMIT),
    )(x.reshape(N, H), w1, b1, w2, b2, gamma, beta)
    return out.reshape(B, T, H)


# ---------------------------------------------------------------------------
# Tiled final linear (vocab projection): weight-stationary grid (cols outer, rows inner)
# ---------------------------------------------------------------------------
def _linear_kernel(x_ref, w_ref, b_ref, o_ref):
    o_ref[...] = jnp.dot(x_ref[...], w_ref[...],
                         preferred_element_type=jnp.float32) + b_ref[...]


def tiled_linear(x, w, b):
    """x: (N, Din) bf16; w: (Din, Dout) bf16 (Dout padded to 128); b: (1, Dout) f32."""
    N, Din = x.shape
    Dout = w.shape[1]
    tm = _pick_tile(N, _ROW_TILE, 16)
    tn = _pick_tile(Dout, 512, 128)
    return pl.pallas_call(
        _linear_kernel,
        grid=(Dout // tn, N // tm),   # vocab-column axis outermost -> w tile not re-streamed per row tile
        in_specs=[pl.BlockSpec((tm, Din), lambda j, i: (i, 0)),
                  pl.BlockSpec((Din, tn), lambda j, i: (0, j)),
                  pl.BlockSpec((1, tn), lambda j, i: (0, j))],
        out_specs=pl.BlockSpec((tm, tn), lambda j, i: (i, j)),
        out_shape=jax.ShapeDtypeStruct((N, Dout), jnp.float32),
        compiler_params=pltpu.CompilerParams(
            dimension_semantics=("parallel", "parallel"),
            vmem_limit_bytes=_VMEM_LIMIT),
    )(x, w, b)


# ---------------------------------------------------------------------------
# Glue: positional encoding, parameter init, full forward
# ---------------------------------------------------------------------------
def positional_encoding_table(max_len, d_model):
    position = jnp.arange(max_len, dtype=jnp.float32)[:, None]
    div_term = jnp.exp(jnp.arange(0, d_model, 2, dtype=jnp.float32)
                       * (-math.log(10000.0) / d_model))
    pe = jnp.zeros((max_len, d_model), jnp.float32)
    pe = pe.at[:, 0::2].set(jnp.sin(position * div_term))
    pe = pe.at[:, 1::2].set(jnp.cos(position * div_term))
    return pe


def init_params(key, hidden, vocab, num_layers, ffn=1024):
    """Matmul weights stored pre-transposed to (Din, Dout) and pre-cast to bf16;
    biases / LayerNorm params / embedding stay f32.  The K/V projection is stored
    fused as [Wk | Wv]; the vocab dim of the final FC is padded to a 128 multiple
    (a real checkpoint conversion would zero-pad)."""
    keys = iter(jax.random.split(key, 32 * num_layers + 8))

    def nrm(shape, scale=0.02):
        return scale * jax.random.normal(next(keys), shape, jnp.float32)

    def mha_params():
        return {'wq': nrm((hidden, hidden)).astype(jnp.bfloat16),
                'bq': nrm((1, hidden)),
                'wkv': nrm((hidden, 2 * hidden)).astype(jnp.bfloat16),
                'bkv': nrm((1, 2 * hidden)),
                'wo': nrm((hidden, hidden)).astype(jnp.bfloat16),
                'bo': nrm((1, hidden))}

    layers = []
    for _ in range(num_layers):
        layers.append({
            'self_attn': mha_params(),
            'cross_attn': mha_params(),
            'ffn_w1': nrm((hidden, ffn)).astype(jnp.bfloat16), 'ffn_b1': nrm((1, ffn)),
            'ffn_w2': nrm((ffn, hidden)).astype(jnp.bfloat16), 'ffn_b2': nrm((1, hidden)),
            'norm1_g': jnp.ones((1, hidden), jnp.float32),
            'norm1_b': jnp.zeros((1, hidden), jnp.float32),
            'norm2_g': jnp.ones((1, hidden), jnp.float32),
            'norm2_b': jnp.zeros((1, hidden), jnp.float32),
            'norm3_g': jnp.ones((1, hidden), jnp.float32),
            'norm3_b': jnp.zeros((1, hidden), jnp.float32),
        })
    v_pad = ((vocab + 127) // 128) * 128   # lane-dense FC output tiles
    return {
        'layers': layers,
        'embedding': nrm((vocab, hidden), 1.0),
        'fc_w': nrm((hidden, v_pad)).astype(jnp.bfloat16),
        'fc_b': nrm((1, v_pad)),
    }


def htr_transformer_decoder_forward(params, target, memory,
                                    memory_key_padding_mask=None,
                                    sub_mask=None, no_fc=False, *,
                                    hidden_size, nhead=4, max_tar_len):
    T, B = target.shape
    S = memory.shape[0]
    # Causal mask is generated in-kernel from the runtime T; for any valid call
    # (sub_mask == T, or sub_mask is None and T == max_tar_len) this equals slicing
    # the PyTorch module's precomputed (max_tar_len, max_tar_len) -inf mask.
    del sub_mask

    V = params['embedding'].shape[0]

    # embedding lookup * sqrt(H) + sinusoidal PE (dropout is identity at inference)
    emb = params['embedding'][target] * math.sqrt(hidden_size)        # (T, B, H) f32
    pe = positional_encoding_table(max_tar_len, hidden_size)
    emb = emb + pe[:T][:, None, :]

    # bf16 activation stream between kernels (f32 math inside the kernels)
    x = emb.transpose(1, 0, 2).astype(jnp.bfloat16)       # (B, T, H)
    mem = memory.transpose(1, 0, 2).astype(jnp.bfloat16)  # (B, S, H)

    if memory_key_padding_mask is not None:
        kbias_mem = jnp.where(memory_key_padding_mask, _NEG_INF,
                              0.0).astype(jnp.float32).reshape(B, 1, S)
    else:
        kbias_mem = jnp.zeros((B, 1, S), jnp.float32)

    cross_list, self_list = [], []
    for lp in params['layers']:
        x, sa = fused_self_attn_add_ln(x, lp['self_attn'],
                                       lp['norm1_g'], lp['norm1_b'], nhead=nhead)
        x, ca = fused_cross_attn_add_ln(x, mem, kbias_mem, lp['cross_attn'],
                                        lp['norm2_g'], lp['norm2_b'], nhead=nhead)
        x = fused_ffn_add_ln(x, lp['ffn_w1'], lp['ffn_b1'],
                             lp['ffn_w2'], lp['ffn_b2'],
                             lp['norm3_g'], lp['norm3_b'])
        self_list.append(sa)
        cross_list.append(ca)

    # TODO(synk): the custom TransformerDecoderReturnAttn class is not provided;
    # per-layer head-averaged attention maps are stacked along a leading layer axis.
    cross_attn = jnp.stack(cross_list, axis=0)   # (L, B, T, S)
    self_attn = jnp.stack(self_list, axis=0)     # (L, B, T, T)

    logits = tiled_linear(x.reshape(B * T, hidden_size), params['fc_w'], params['fc_b'])
    logits = logits[:, :V].reshape(B, T, V).transpose(1, 0, 2)         # (T, B, V) f32

    if no_fc:
        # PyTorch quirk preserved: fc is still applied; hidden state returned second.
        return logits, x.astype(jnp.float32).transpose(1, 0, 2)
    return logits, cross_attn, self_attn


if __name__ == "__main__":
    B, T, S, H, V, NHEAD, LAYERS = 2, 8, 16, 32, 16, 4, 2

    key = jax.random.PRNGKey(0)
    k_p, k_t, k_m = jax.random.split(key, 3)
    params = init_params(k_p, H, V, LAYERS)
    target = jax.random.randint(k_t, (T, B), 0, V, dtype=jnp.int32)
    memory = jax.random.normal(k_m, (S, B, H), jnp.float32)
    # pad the last 4 memory positions of batch element 1
    mem_kpm = jnp.zeros((B, S), dtype=bool).at[1, S - 4:].set(True)

    fwd = jax.jit(htr_transformer_decoder_forward,
                  static_argnames=('sub_mask', 'no_fc', 'hidden_size',
                                   'nhead', 'max_tar_len'))
    out, cross_attn, self_attn = fwd(params, target, memory, mem_kpm,
                                     hidden_size=H, nhead=NHEAD, max_tar_len=T)
    jax.block_until_ready((out, cross_attn, self_attn))

    assert out.shape == (T, B, V)
    assert cross_attn.shape == (LAYERS, B, T, S)
    assert self_attn.shape == (LAYERS, B, T, T)
    assert bool(jnp.all(jnp.isfinite(out)))
    assert bool(jnp.all(jnp.isfinite(cross_attn)))
    assert bool(jnp.all(jnp.isfinite(self_attn)))
    print("KERNEL_OK")
</pallas_src>

<mosaic_0001>
module attributes {stable_mosaic.version = 11 : i64} {
  func.func @kernel(%arg0: i32, %arg1: i32, %arg2: memref<1x8x32xbf16, #tpu.memory_space<vmem>>, %arg3: memref<32x32xbf16, #tpu.memory_space<vmem>>, %arg4: memref<1x32xf32, #tpu.memory_space<vmem>>, %arg5: memref<32x64xbf16, #tpu.memory_space<vmem>>, %arg6: memref<1x64xf32, #tpu.memory_space<vmem>>, %arg7: memref<32x32xbf16, #tpu.memory_space<vmem>>, %arg8: memref<1x32xf32, #tpu.memory_space<vmem>>, %arg9: memref<1x32xf32, #tpu.memory_space<vmem>>, %arg10: memref<1x32xf32, #tpu.memory_space<vmem>>, %arg11: memref<1x8x32xbf16, #tpu.memory_space<vmem>>, %arg12: memref<1x8x8xf32, #tpu.memory_space<vmem>>) attributes {dimension_semantics = [#tpu.dimension_semantics<parallel>, #tpu.dimension_semantics<parallel>], iteration_bounds = array<i64: 2, 1>, scalar_prefetch = 0 : i64, scratch_operands = 0 : i64, tpu.core_type = #tpu.core_type<tc>, window_params = [{transform_indices = @transform_0, window_bounds = array<i64: 1, 8, 32>}, {pipeline_mode = #tpu.pipeline_mode<synchronous>, transform_indices = @transform_1, window_bounds = array<i64: 32, 32>}, {pipeline_mode = #tpu.pipeline_mode<synchronous>, transform_indices = @transform_2, window_bounds = array<i64: 1, 32>}, {pipeline_mode = #tpu.pipeline_mode<synchronous>, transform_indices = @transform_3, window_bounds = array<i64: 32, 64>}, {pipeline_mode = #tpu.pipeline_mode<synchronous>, transform_indices = @transform_4, window_bounds = array<i64: 1, 64>}, {pipeline_mode = #tpu.pipeline_mode<synchronous>, transform_indices = @transform_5, window_bounds = array<i64: 32, 32>}, {pipeline_mode = #tpu.pipeline_mode<synchronous>, transform_indices = @transform_6, window_bounds = array<i64: 1, 32>}, {pipeline_mode = #tpu.pipeline_mode<synchronous>, transform_indices = @transform_7, window_bounds = array<i64: 1, 32>}, {pipeline_mode = #tpu.pipeline_mode<synchronous>, transform_indices = @transform_8, window_bounds = array<i64: 1, 32>}, {transform_indices = @transform_9, window_bounds = array<i64: 1, 8, 32>}, {transform_indices = @transform_10, window_bounds = array<i64: 1, 8, 8>}]} {
    %c0 = arith.constant 0 : index
    %c0_0 = arith.constant 0 : index
    %c0_1 = arith.constant 0 : index
    %0 = vector.load %arg2[%c0, %c0_0, %c0_1] : memref<1x8x32xbf16, #tpu.memory_space<vmem>>, vector<1x8x32xbf16>
    %1 = vector.shape_cast %0 : vector<1x8x32xbf16> to vector<8x32xbf16>
    %c0_2 = arith.constant 0 : index
    %c0_3 = arith.constant 0 : index
    %2 = vector.load %arg3[%c0_2, %c0_3] : memref<32x32xbf16, #tpu.memory_space<vmem>>, vector<32x32xbf16>
    %cst = arith.constant dense<0.000000e+00> : vector<8x32xf32>
    %3 = tpu.matmul %1, %2, %cst {dimension_numbers = #tpu.dot_dimension_numbers<[1], [0], [0], [1], [0, 0, 1, 1], [], []>} : vector<8x32xbf16>, vector<32x32xbf16>, vector<8x32xf32> -> vector<8x32xf32>
    %c0_4 = arith.constant 0 : index
    %c0_5 = arith.constant 0 : index
    %4 = vector.load %arg4[%c0_4, %c0_5] : memref<1x32xf32, #tpu.memory_space<vmem>>, vector<1x32xf32>
    %5 = vector.broadcast %4 : vector<1x32xf32> to vector<8x32xf32>
    %6 = arith.addf %3, %5 : vector<8x32xf32>
    %c0_6 = arith.constant 0 : index
    %c0_7 = arith.constant 0 : index
    %7 = vector.load %arg5[%c0_6, %c0_7] : memref<32x64xbf16, #tpu.memory_space<vmem>>, vector<32x64xbf16>
    %cst_8 = arith.constant dense<0.000000e+00> : vector<8x64xf32>
    %8 = tpu.matmul %1, %7, %cst_8 {dimension_numbers = #tpu.dot_dimension_numbers<[1], [0], [0], [1], [0, 0, 1, 1], [], []>} : vector<8x32xbf16>, vector<32x64xbf16>, vector<8x64xf32> -> vector<8x64xf32>
    %c0_9 = arith.constant 0 : index
    %c0_10 = arith.constant 0 : index
    %9 = vector.load %arg6[%c0_9, %c0_10] : memref<1x64xf32, #tpu.memory_space<vmem>>, vector<1x64xf32>
    %10 = vector.broadcast %9 : vector<1x64xf32> to vector<8x64xf32>
    %11 = arith.addf %8, %10 : vector<8x64xf32>
    %12 = tpu.iota {dimensions = array<i32: 0>} : vector<8x8xi32>
    %c0_i32 = arith.constant 0 : i32
    %13 = vector.broadcast %c0_i32 : i32 to vector<8x8xi32>
    %14 = arith.addi %13, %12 : vector<8x8xi32>
    %15 = tpu.iota {dimensions = array<i32: 1>} : vector<8x8xi32>
    %16 = arith.cmpi sgt, %15, %14 : vector<8x8xi32>
    %cst_11 = arith.constant -1.000000e+30 : f32
    %cst_12 = arith.constant 0.000000e+00 : f32
    %17 = vector.broadcast %cst_11 : f32 to vector<8x8xf32>
    %18 = vector.broadcast %cst_12 : f32 to vector<8x8xf32>
    %19 = arith.select %16, %17, %18 : vector<8x8xi1>, vector<8x8xf32>
    %c0_13 = arith.constant 0 : index
    %c0_14 = arith.constant 0 : index
    %20 = vector.load %arg7[%c0_13, %c0_14] : memref<32x32xbf16, #tpu.memory_space<vmem>>, vector<32x32xbf16>
    %c0_15 = arith.constant 0 : index
    %c0_16 = arith.constant 0 : index
    %21 = vector.load %arg8[%c0_15, %c0_16] : memref<1x32xf32, #tpu.memory_space<vmem>>, vector<1x32xf32>
    %22 = vector.extract_strided_slice %11 {offsets = [0, 0], sizes = [8, 32], strides = [1, 1]} : vector<8x64xf32> to vector<8x32xf32>
    %23 = vector.extract_strided_slice %11 {offsets = [0, 32], sizes = [8, 32], strides = [1, 1]} : vector<8x64xf32> to vector<8x32xf32>
    %24 = vector.extract_strided_slice %6 {offsets = [0, 0], sizes = [8, 8], strides = [1, 1]} : vector<8x32xf32> to vector<8x8xf32>
    %cst_17 = arith.constant 0.353553385 : f32
    %25 = vector.broadcast %cst_17 : f32 to vector<8x8xf32>
    %26 = arith.mulf %24, %25 : vector<8x8xf32>
    %27 = arith.truncf %26 : vector<8x8xf32> to vector<8x8xbf16>
    %28 = vector.extract_strided_slice %22 {offsets = [0, 0], sizes = [8, 8], strides = [1, 1]} : vector<8x32xf32> to vector<8x8xf32>
    %29 = arith.truncf %28 : vector<8x8xf32> to vector<8x8xbf16>
    %30 = vector.extract_strided_slice %23 {offsets = [0, 0], sizes = [8, 8], strides = [1, 1]} : vector<8x32xf32> to vector<8x8xf32>
    %31 = arith.truncf %30 : vector<8x8xf32> to vector<8x8xbf16>
    %cst_18 = arith.constant dense<0.000000e+00> : vector<8x8xf32>
    %32 = tpu.matmul %27, %29, %cst_18 {dimension_numbers = #tpu.dot_dimension_numbers<[1], [1], [0], [0], [0, 0, 1, 0], [], []>} : vector<8x8xbf16>, vector<8x8xbf16>, vector<8x8xf32> -> vector<8x8xf32>
    %33 = arith.addf %32, %19 : vector<8x8xf32>
    %cst_19 = arith.constant dense<0xFF800000> : vector<8xf32>
    %34 = vector.multi_reduction <maximumf>, %33, %cst_19 [1] : vector<8x8xf32> to vector<8xf32>
    %35 = vector.shape_cast %34 : vector<8xf32> to vector<8x1xf32>
    %36 = vector.broadcast %35 : vector<8x1xf32> to vector<8x8xf32>
    %37 = arith.subf %33, %36 : vector<8x8xf32>
    %38 = math.exp %37 : vector<8x8xf32>
    %cst_20 = arith.constant dense<0.000000e+00> : vector<8xf32>
    %39 = vector.multi_reduction <add>, %38, %cst_20 [1] : vector<8x8xf32> to vector<8xf32>
    %40 = vector.shape_cast %39 : vector<8xf32> to vector<8x1xf32>
    %41 = vector.broadcast %40 : vector<8x1xf32> to vector<8x8xf32>
    %42 = arith.divf %38, %41 : vector<8x8xf32>
    %43 = arith.truncf %42 : vector<8x8xf32> to vector<8x8xbf16>
    %cst_21 = arith.constant dense<0.000000e+00> : vector<8x8xf32>
    %44 = tpu.matmul %43, %31, %cst_21 {dimension_numbers = #tpu.dot_dimension_numbers<[1], [0], [0], [1], [0, 0, 1, 1], [], []>} : vector<8x8xbf16>, vector<8x8xbf16>, vector<8x8xf32> -> vector<8x8xf32>
    %45 = arith.truncf %44 : vector<8x8xf32> to vector<8x8xbf16>
    %46 = vector.extract_strided_slice %20 {offsets = [0, 0], sizes = [8, 32], strides = [1, 1]} : vector<32x32xbf16> to vector<8x32xbf16>
    %cst_22 = arith.constant dense<0.000000e+00> : vector<8x32xf32>
    %47 = tpu.matmul %45, %46, %cst_22 {dimension_numbers = #tpu.dot_dimension_numbers<[1], [0], [0], [1], [0, 0, 1, 1], [], []>} : vector<8x8xbf16>, vector<8x32xbf16>, vector<8x32xf32> -> vector<8x32xf32>
    %48 = vector.extract_strided_slice %6 {offsets = [0, 8], sizes = [8, 8], strides = [1, 1]} : vector<8x32xf32> to vector<8x8xf32>
    %cst_23 = arith.constant 0.353553385 : f32
    %49 = vector.broadcast %cst_23 : f32 to vector<8x8xf32>
    %50 = arith.mulf %48, %49 : vector<8x8xf32>
    %51 = arith.truncf %50 : vector<8x8xf32> to vector<8x8xbf16>
    %52 = vector.extract_strided_slice %22 {offsets = [0, 8], sizes = [8, 8], strides = [1, 1]} : vector<8x32xf32> to vector<8x8xf32>
    %53 = arith.truncf %52 : vector<8x8xf32> to vector<8x8xbf16>
    %54 = vector.extract_strided_slice %23 {offsets = [0, 8], sizes = [8, 8], strides = [1, 1]} : vector<8x32xf32> to vector<8x8xf32>
    %55 = arith.truncf %54 : vector<8x8xf32> to vector<8x8xbf16>
    %cst_24 = arith.constant dense<0.000000e+00> : vector<8x8xf32>
    %56 = tpu.matmul %51, %53, %cst_24 {dimension_numbers = #tpu.dot_dimension_numbers<[1], [1], [0], [0], [0, 0, 1, 0], [], []>} : vector<8x8xbf16>, vector<8x8xbf16>, vector<8x8xf32> -> vector<8x8xf32>
    %57 = arith.addf %56, %19 : vector<8x8xf32>
    %cst_25 = arith.constant dense<0xFF800000> : vector<8xf32>
    %58 = vector.multi_reduction <maximumf>, %57, %cst_25 [1] : vector<8x8xf32> to vector<8xf32>
    %59 = vector.shape_cast %58 : vector<8xf32> to vector<8x1xf32>
    %60 = vector.broadcast %59 : vector<8x1xf32> to vector<8x8xf32>
    %61 = arith.subf %57, %60 : vector<8x8xf32>
    %62 = math.exp %61 : vector<8x8xf32>
    %cst_26 = arith.constant dense<0.000000e+00> : vector<8xf32>
    %63 = vector.multi_reduction <add>, %62, %cst_26 [1] : vector<8x8xf32> to vector<8xf32>
    %64 = vector.shape_cast %63 : vector<8xf32> to vector<8x1xf32>
    %65 = vector.broadcast %64 : vector<8x1xf32> to vector<8x8xf32>
    %66 = arith.divf %62, %65 : vector<8x8xf32>
    %67 = arith.truncf %66 : vector<8x8xf32> to vector<8x8xbf16>
    %cst_27 = arith.constant dense<0.000000e+00> : vector<8x8xf32>
    %68 = tpu.matmul %67, %55, %cst_27 {dimension_numbers = #tpu.dot_dimension_numbers<[1], [0], [0], [1], [0, 0, 1, 1], [], []>} : vector<8x8xbf16>, vector<8x8xbf16>, vector<8x8xf32> -> vector<8x8xf32>
    %69 = arith.truncf %68 : vector<8x8xf32> to vector<8x8xbf16>
    %70 = vector.extract_strided_slice %20 {offsets = [8, 0], sizes = [8, 32], strides = [1, 1]} : vector<32x32xbf16> to vector<8x32xbf16>
    %cst_28 = arith.constant dense<0.000000e+00> : vector<8x32xf32>
    %71 = tpu.matmul %69, %70, %cst_28 {dimension_numbers = #tpu.dot_dimension_numbers<[1], [0], [0], [1], [0, 0, 1, 1], [], []>} : vector<8x8xbf16>, vector<8x32xbf16>, vector<8x32xf32> -> vector<8x32xf32>
    %72 = arith.addf %47, %71 : vector<8x32xf32>
    %73 = arith.addf %42, %66 : vector<8x8xf32>
    %74 = vector.extract_strided_slice %6 {offsets = [0, 16], sizes = [8, 8], strides = [1, 1]} : vector<8x32xf32> to vector<8x8xf32>
    %cst_29 = arith.constant 0.353553385 : f32
    %75 = vector.broadcast %cst_29 : f32 to vector<8x8xf32>
    %76 = arith.mulf %74, %75 : vector<8x8xf32>
    %77 = arith.truncf %76 : vector<8x8xf32> to vector<8x8xbf16>
    %78 = vector.extract_strided_slice %22 {offsets = [0, 16], sizes = [8, 8], strides = [1, 1]} : vector<8x32xf32> to vector<8x8xf32>
    %79 = arith.truncf %78 : vector<8x8xf32> to vector<8x8xbf16>
    %80 = vector.extract_strided_slice %23 {offsets = [0, 16], sizes = [8, 8], strides = [1, 1]} : vector<8x32xf32> to vector<8x8xf32>
    %81 = arith.truncf %80 : vector<8x8xf32> to vector<8x8xbf16>
    %cst_30 = arith.constant dense<0.000000e+00> : vector<8x8xf32>
    %82 = tpu.matmul %77, %79, %cst_30 {dimension_numbers = #tpu.dot_dimension_numbers<[1], [1], [0], [0], [0, 0, 1, 0], [], []>} : vector<8x8xbf16>, vector<8x8xbf16>, vector<8x8xf32> -> vector<8x8xf32>
    %83 = arith.addf %82, %19 : vector<8x8xf32>
    %cst_31 = arith.constant dense<0xFF800000> : vector<8xf32>
    %84 = vector.multi_reduction <maximumf>, %83, %cst_31 [1] : vector<8x8xf32> to vector<8xf32>
    %85 = vector.shape_cast %84 : vector<8xf32> to vector<8x1xf32>
    %86 = vector.broadcast %85 : vector<8x1xf32> to vector<8x8xf32>
    %87 = arith.subf %83, %86 : vector<8x8xf32>
    %88 = math.exp %87 : vector<8x8xf32>
    %cst_32 = arith.constant dense<0.000000e+00> : vector<8xf32>
    %89 = vector.multi_reduction <add>, %88, %cst_32 [1] : vector<8x8xf32> to vector<8xf32>
    %90 = vector.shape_cast %89 : vector<8xf32> to vector<8x1xf32>
    %91 = vector.broadcast %90 : vector<8x1xf32> to vector<8x8xf32>
    %92 = arith.divf %88, %91 : vector<8x8xf32>
    %93 = arith.truncf %92 : vector<8x8xf32> to vector<8x8xbf16>
    %cst_33 = arith.constant dense<0.000000e+00> : vector<8x8xf32>
    %94 = tpu.matmul %93, %81, %cst_33 {dimension_numbers = #tpu.dot_dimension_numbers<[1], [0], [0], [1], [0, 0, 1, 1], [], []>} : vector<8x8xbf16>, vector<8x8xbf16>, vector<8x8xf32> -> vector<8x8xf32>
    %95 = arith.truncf %94 : vector<8x8xf32> to vector<8x8xbf16>
    %96 = vector.extract_strided_slice %20 {offsets = [16, 0], sizes = [8, 32], strides = [1, 1]} : vector<32x32xbf16> to vector<8x32xbf16>
    %cst_34 = arith.constant dense<0.000000e+00> : vector<8x32xf32>
    %97 = tpu.matmul %95, %96, %cst_34 {dimension_numbers = #tpu.dot_dimension_numbers<[1], [0], [0], [1], [0, 0, 1, 1], [], []>} : vector<8x8xbf16>, vector<8x32xbf16>, vector<8x32xf32> -> vector<8x32xf32>
    %98 = arith.addf %72, %97 : vector<8x32xf32>
    %99 = arith.addf %73, %92 : vector<8x8xf32>
    %100 = vector.extract_strided_slice %6 {offsets = [0, 24], sizes = [8, 8], strides = [1, 1]} : vector<8x32xf32> to vector<8x8xf32>
    %cst_35 = arith.constant 0.353553385 : f32
    %101 = vector.broadcast %cst_35 : f32 to vector<8x8xf32>
    %102 = arith.mulf %100, %101 : vector<8x8xf32>
    %103 = arith.truncf %102 : vector<8x8xf32> to vector<8x8xbf16>
    %104 = vector.extract_strided_slice %22 {offsets = [0, 24], sizes = [8, 8], strides = [1, 1]} : vector<8x32xf32> to vector<8x8xf32>
    %105 = arith.truncf %104 : vector<8x8xf32> to vector<8x8xbf16>
    %106 = vector.extract_strided_slice %23 {offsets = [0, 24], sizes = [8, 8], strides = [1, 1]} : vector<8x32xf32> to vector<8x8xf32>
    %107 = arith.truncf %106 : vector<8x8xf32> to vector<8x8xbf16>
    %cst_36 = arith.constant dense<0.000000e+00> : vector<8x8xf32>
    %108 = tpu.matmul %103, %105, %cst_36 {dimension_numbers = #tpu.dot_dimension_numbers<[1], [1], [0], [0], [0, 0, 1, 0], [], []>} : vector<8x8xbf16>, vector<8x8xbf16>, vector<8x8xf32> -> vector<8x8xf32>
    %109 = arith.addf %108, %19 : vector<8x8xf32>
    %cst_37 = arith.constant dense<0xFF800000> : vector<8xf32>
    %110 = vector.multi_reduction <maximumf>, %109, %cst_37 [1] : vector<8x8xf32> to vector<8xf32>
    %111 = vector.shape_cast %110 : vector<8xf32> to vector<8x1xf32>
    %112 = vector.broadcast %111 : vector<8x1xf32> to vector<8x8xf32>
    %113 = arith.subf %109, %112 : vector<8x8xf32>
    %114 = math.exp %113 : vector<8x8xf32>
    %cst_38 = arith.constant dense<0.000000e+00> : vector<8xf32>
    %115 = vector.multi_reduction <add>, %114, %cst_38 [1] : vector<8x8xf32> to vector<8xf32>
    %116 = vector.shape_cast %115 : vector<8xf32> to vector<8x1xf32>
    %117 = vector.broadcast %116 : vector<8x1xf32> to vector<8x8xf32>
    %118 = arith.divf %114, %117 : vector<8x8xf32>
    %119 = arith.truncf %118 : vector<8x8xf32> to vector<8x8xbf16>
    %cst_39 = arith.constant dense<0.000000e+00> : vector<8x8xf32>
    %120 = tpu.matmul %119, %107, %cst_39 {dimension_numbers = #tpu.dot_dimension_numbers<[1], [0], [0], [1], [0, 0, 1, 1], [], []>} : vector<8x8xbf16>, vector<8x8xbf16>, vector<8x8xf32> -> vector<8x8xf32>
    %121 = arith.truncf %120 : vector<8x8xf32> to vector<8x8xbf16>
    %122 = vector.extract_strided_slice %20 {offsets = [24, 0], sizes = [8, 32], strides = [1, 1]} : vector<32x32xbf16> to vector<8x32xbf16>
    %cst_40 = arith.constant dense<0.000000e+00> : vector<8x32xf32>
    %123 = tpu.matmul %121, %122, %cst_40 {dimension_numbers = #tpu.dot_dimension_numbers<[1], [0], [0], [1], [0, 0, 1, 1], [], []>} : vector<8x8xbf16>, vector<8x32xbf16>, vector<8x32xf32> -> vector<8x32xf32>
    %124 = arith.addf %98, %123 : vector<8x32xf32>
    %125 = arith.addf %99, %118 : vector<8x8xf32>
    %126 = vector.broadcast %21 : vector<1x32xf32> to vector<8x32xf32>
    %127 = arith.addf %124, %126 : vector<8x32xf32>
    %cst_41 = arith.constant 2.500000e-01 : f32
    %128 = vector.broadcast %cst_41 : f32 to vector<8x8xf32>
    %129 = arith.mulf %125, %128 : vector<8x8xf32>
    %130 = arith.extf %1 : vector<8x32xbf16> to vector<8x32xf32>
    %131 = arith.addf %130, %127 : vector<8x32xf32>
    %c0_42 = arith.constant 0 : index
    %c0_43 = arith.constant 0 : index
    %132 = vector.load %arg9[%c0_42, %c0_43] : memref<1x32xf32, #tpu.memory_space<vmem>>, vector<1x32xf32>
    %c0_44 = arith.constant 0 : index
    %c0_45 = arith.constant 0 : index
    %133 = vector.load %arg10[%c0_44, %c0_45] : memref<1x32xf32, #tpu.memory_space<vmem>>, vector<1x32xf32>
    %cst_46 = arith.constant dense<0.000000e+00> : vector<8xf32>
    %134 = vector.multi_reduction <add>, %131, %cst_46 [1] : vector<8x32xf32> to vector<8xf32>
    %135 = vector.shape_cast %134 : vector<8xf32> to vector<8x1xf32>
    %cst_47 = arith.constant 3.200000e+01 : f32
    %136 = vector.broadcast %cst_47 : f32 to vector<8x1xf32>
    %137 = arith.divf %135, %136 : vector<8x1xf32>
    %138 = vector.broadcast %137 : vector<8x1xf32> to vector<8x32xf32>
    %139 = arith.subf %131, %138 : vector<8x32xf32>
    %140 = arith.mulf %139, %139 : vector<8x32xf32>
    %cst_48 = arith.constant dense<0.000000e+00> : vector<8xf32>
    %141 = vector.multi_reduction <add>, %140, %cst_48 [1] : vector<8x32xf32> to vector<8xf32>
    %142 = vector.shape_cast %141 : vector<8xf32> to vector<8x1xf32>
    %cst_49 = arith.constant 3.200000e+01 : f32
    %143 = vector.broadcast %cst_49 : f32 to vector<8x1xf32>
    %144 = arith.divf %142, %143 : vector<8x1xf32>
    %145 = vector.broadcast %137 : vector<8x1xf32> to vector<8x32xf32>
    %146 = arith.subf %131, %145 : vector<8x32xf32>
    %cst_50 = arith.constant 9.99999974E-6 : f32
    %147 = vector.broadcast %cst_50 : f32 to vector<8x1xf32>
    %148 = arith.addf %144, %147 : vector<8x1xf32>
    %149 = math.rsqrt %148 : vector<8x1xf32>
    %150 = vector.broadcast %149 : vector<8x1xf32> to vector<8x32xf32>
    %151 = arith.mulf %146, %150 : vector<8x32xf32>
    %152 = vector.broadcast %132 : vector<1x32xf32> to vector<8x32xf32>
    %153 = arith.mulf %151, %152 : vector<8x32xf32>
    %154 = vector.broadcast %133 : vector<1x32xf32> to vector<8x32xf32>
    %155 = arith.addf %153, %154 : vector<8x32xf32>
    %156 = arith.truncf %155 : vector<8x32xf32> to vector<8x32xbf16>
    %c0_51 = arith.constant 0 : index
    %c0_52 = arith.constant 0 : index
    %c0_53 = arith.constant 0 : index
    %157 = vector.load %arg11[%c0_51, %c0_52, %c0_53] : memref<1x8x32xbf16, #tpu.memory_space<vmem>>, vector<1x8x32xbf16>
    %158 = vector.shape_cast %157 : vector<1x8x32xbf16> to vector<8x32xbf16>
    %159 = vector.shape_cast %156 : vector<8x32xbf16> to vector<1x8x32xbf16>
    tpu.vector_store %arg11[%c0_51, %c0_52, %c0_53], %159 {strides = array<i32>} : memref<1x8x32xbf16, #tpu.memory_space<vmem>>, vector<1x8x32xbf16>,
    %c0_54 = arith.constant 0 : index
    %c0_55 = arith.constant 0 : index
    %c0_56 = arith.constant 0 : index
    %160 = vector.load %arg12[%c0_54, %c0_55, %c0_56] : memref<1x8x8xf32, #tpu.memory_space<vmem>>, vector<1x8x8xf32>
    %161 = vector.shape_cast %160 : vector<1x8x8xf32> to vector<8x8xf32>
    %162 = vector.shape_cast %129 : vector<8x8xf32> to vector<1x8x8xf32>
    tpu.vector_store %arg12[%c0_54, %c0_55, %c0_56], %162 {strides = array<i32>} : memref<1x8x8xf32, #tpu.memory_space<vmem>>, vector<1x8x8xf32>,
    return
  }
  func.func @transform_0(%arg0: i32, %arg1: i32) -> (i32, i32, i32) {
    %c0_i32 = arith.constant 0 : i32
    %c0_i32_0 = arith.constant 0 : i32
    %c0_i32_1 = arith.constant 0 : i32
    return %arg0, %c0_i32, %c0_i32_0 : i32, i32, i32
  }
  func.func @transform_1(%arg0: i32, %arg1: i32) -> (i32, i32) {
    %c0_i32 = arith.constant 0 : i32
    %c0_i32_0 = arith.constant 0 : i32
    %c0_i32_1 = arith.constant 0 : i32
    return %c0_i32, %c0_i32_0 : i32, i32
  }
  func.func @transform_2(%arg0: i32, %arg1: i32) -> (i32, i32) {
    %c0_i32 = arith.constant 0 : i32
    %c0_i32_0 = arith.constant 0 : i32
    %c0_i32_1 = arith.constant 0 : i32
    return %c0_i32, %c0_i32_0 : i32, i32
  }
  func.func @transform_3(%arg0: i32, %arg1: i32) -> (i32, i32) {
    %c0_i32 = arith.constant 0 : i32
    %c0_i32_0 = arith.constant 0 : i32
    %c0_i32_1 = arith.constant 0 : i32
    return %c0_i32, %c0_i32_0 : i32, i32
  }
  func.func @transform_4(%arg0: i32, %arg1: i32) -> (i32, i32) {
    %c0_i32 = arith.constant 0 : i32
    %c0_i32_0 = arith.constant 0 : i32
    %c0_i32_1 = arith.constant 0 : i32
    return %c0_i32, %c0_i32_0 : i32, i32
  }
  func.func @transform_5(%arg0: i32, %arg1: i32) -> (i32, i32) {
    %c0_i32 = arith.constant 0 : i32
    %c0_i32_0 = arith.constant 0 : i32
    %c0_i32_1 = arith.constant 0 : i32
    return %c0_i32, %c0_i32_0 : i32, i32
  }
  func.func @transform_6(%arg0: i32, %arg1: i32) -> (i32, i32) {
    %c0_i32 = arith.constant 0 : i32
    %c0_i32_0 = arith.constant 0 : i32
    %c0_i32_1 = arith.constant 0 : i32
    return %c0_i32, %c0_i32_0 : i32, i32
  }
  func.func @transform_7(%arg0: i32, %arg1: i32) -> (i32, i32) {
    %c0_i32 = arith.constant 0 : i32
    %c0_i32_0 = arith.constant 0 : i32
    %c0_i32_1 = arith.constant 0 : i32
    return %c0_i32, %c0_i32_0 : i32, i32
  }
  func.func @transform_8(%arg0: i32, %arg1: i32) -> (i32, i32) {
    %c0_i32 = arith.constant 0 : i32
    %c0_i32_0 = arith.constant 0 : i32
    %c0_i32_1 = arith.constant 0 : i32
    return %c0_i32, %c0_i32_0 : i32, i32
  }
  func.func @transform_9(%arg0: i32, %arg1: i32) -> (i32, i32, i32) {
    %c0_i32 = arith.constant 0 : i32
    %c0_i32_0 = arith.constant 0 : i32
    return %arg0, %arg1, %c0_i32 : i32, i32, i32
  }
  func.func @transform_10(%arg0: i32, %arg1: i32) -> (i32, i32, i32) {
    %c0_i32 = arith.constant 0 : i32
    %c0_i32_0 = arith.constant 0 : i32
    return %arg0, %arg1, %c0_i32 : i32, i32, i32
  }
}

module attributes {stable_mosaic.version = 11 : i64} {
  func.func @kernel(%arg0: i32, %arg1: i32, %arg2: memref<1x8x32xbf16, #tpu.memory_space<vmem>>, %arg3: memref<1x16x32xbf16, #tpu.memory_space<vmem>>, %arg4: memref<1x1x16xf32, #tpu.memory_space<vmem>>, %arg5: memref<32x32xbf16, #tpu.memory_space<vmem>>, %arg6: memref<1x32xf32, #tpu.memory_space<vmem>>, %arg7: memref<32x64xbf16, #tpu.memory_space<vmem>>, %arg8: memref<1x64xf32, #tpu.memory_space<vmem>>, %arg9: memref<32x32xbf16, #tpu.memory_space<vmem>>, %arg10: memref<1x32xf32, #tpu.memory_space<vmem>>, %arg11: memref<1x32xf32, #tpu.memory_space<vmem>>, %arg12: memref<1x32xf32, #tpu.memory_space<vmem>>, %arg13: memref<1x8x32xbf16, #tpu.memory_space<vmem>>, %arg14: memref<1x8x16xf32, #tpu.memory_space<vmem>>) attributes {dimension_semantics = [#tpu.dimension_semantics<parallel>, #tpu.dimension_semantics<parallel>], iteration_bounds = array<i64: 2, 1>, scalar_prefetch = 0 : i64, scratch_operands = 0 : i64, tpu.core_type = #tpu.core_type<tc>, window_params = [{transform_indices = @transform_0, window_bounds = array<i64: 1, 8, 32>}, {transform_indices = @transform_1, window_bounds = array<i64: 1, 16, 32>}, {transform_indices = @transform_2, window_bounds = array<i64: 1, 1, 16>}, {pipeline_mode = #tpu.pipeline_mode<synchronous>, transform_indices = @transform_3, window_bounds = array<i64: 32, 32>}, {pipeline_mode = #tpu.pipeline_mode<synchronous>, transform_indices = @transform_4, window_bounds = array<i64: 1, 32>}, {pipeline_mode = #tpu.pipeline_mode<synchronous>, transform_indices = @transform_5, window_bounds = array<i64: 32, 64>}, {pipeline_mode = #tpu.pipeline_mode<synchronous>, transform_indices = @transform_6, window_bounds = array<i64: 1, 64>}, {pipeline_mode = #tpu.pipeline_mode<synchronous>, transform_indices = @transform_7, window_bounds = array<i64: 32, 32>}, {pipeline_mode = #tpu.pipeline_mode<synchronous>, transform_indices = @transform_8, window_bounds = array<i64: 1, 32>}, {pipeline_mode = #tpu.pipeline_mode<synchronous>, transform_indices = @transform_9, window_bounds = array<i64: 1, 32>}, {pipeline_mode = #tpu.pipeline_mode<synchronous>, transform_indices = @transform_10, window_bounds = array<i64: 1, 32>}, {transform_indices = @transform_11, window_bounds = array<i64: 1, 8, 32>}, {transform_indices = @transform_12, window_bounds = array<i64: 1, 8, 16>}]} {
    %c0 = arith.constant 0 : index
    %c0_0 = arith.constant 0 : index
    %c0_1 = arith.constant 0 : index
    %0 = vector.load %arg2[%c0, %c0_0, %c0_1] : memref<1x8x32xbf16, #tpu.memory_space<vmem>>, vector<1x8x32xbf16>
    %1 = vector.shape_cast %0 : vector<1x8x32xbf16> to vector<8x32xbf16>
    %c0_2 = arith.constant 0 : index
    %c0_3 = arith.constant 0 : index
    %c0_4 = arith.constant 0 : index
    %2 = vector.load %arg3[%c0_2, %c0_3, %c0_4] : memref<1x16x32xbf16, #tpu.memory_space<vmem>>, vector<1x16x32xbf16>
    %3 = vector.shape_cast %2 : vector<1x16x32xbf16> to vector<16x32xbf16>
    %c0_5 = arith.constant 0 : index
    %c0_6 = arith.constant 0 : index
    %4 = vector.load %arg5[%c0_5, %c0_6] : memref<32x32xbf16, #tpu.memory_space<vmem>>, vector<32x32xbf16>
    %cst = arith.constant dense<0.000000e+00> : vector<8x32xf32>
    %5 = tpu.matmul %1, %4, %cst {dimension_numbers = #tpu.dot_dimension_numbers<[1], [0], [0], [1], [0, 0, 1, 1], [], []>} : vector<8x32xbf16>, vector<32x32xbf16>, vector<8x32xf32> -> vector<8x32xf32>
    %c0_7 = arith.constant 0 : index
    %c0_8 = arith.constant 0 : index
    %6 = vector.load %arg6[%c0_7, %c0_8] : memref<1x32xf32, #tpu.memory_space<vmem>>, vector<1x32xf32>
    %7 = vector.broadcast %6 : vector<1x32xf32> to vector<8x32xf32>
    %8 = arith.addf %5, %7 : vector<8x32xf32>
    %c0_9 = arith.constant 0 : index
    %c0_10 = arith.constant 0 : index
    %9 = vector.load %arg7[%c0_9, %c0_10] : memref<32x64xbf16, #tpu.memory_space<vmem>>, vector<32x64xbf16>
    %cst_11 = arith.constant dense<0.000000e+00> : vector<16x64xf32>
    %10 = tpu.matmul %3, %9, %cst_11 {dimension_numbers = #tpu.dot_dimension_numbers<[1], [0], [0], [1], [0, 0, 1, 1], [], []>} : vector<16x32xbf16>, vector<32x64xbf16>, vector<16x64xf32> -> vector<16x64xf32>
    %c0_12 = arith.constant 0 : index
    %c0_13 = arith.constant 0 : index
    %11 = vector.load %arg8[%c0_12, %c0_13] : memref<1x64xf32, #tpu.memory_space<vmem>>, vector<1x64xf32>
    %12 = vector.broadcast %11 : vector<1x64xf32> to vector<16x64xf32>
    %13 = arith.addf %10, %12 : vector<16x64xf32>
    %c0_14 = arith.constant 0 : index
    %c0_15 = arith.constant 0 : index
    %c0_16 = arith.constant 0 : index
    %14 = vector.load %arg4[%c0_14, %c0_15, %c0_16] : memref<1x1x16xf32, #tpu.memory_space<vmem>>, vector<1x1x16xf32>
    %15 = vector.shape_cast %14 : vector<1x1x16xf32> to vector<1x16xf32>
    %c0_17 = arith.constant 0 : index
    %c0_18 = arith.constant 0 : index
    %16 = vector.load %arg9[%c0_17, %c0_18] : memref<32x32xbf16, #tpu.memory_space<vmem>>, vector<32x32xbf16>
    %c0_19 = arith.constant 0 : index
    %c0_20 = arith.constant 0 : index
    %17 = vector.load %arg10[%c0_19, %c0_20] : memref<1x32xf32, #tpu.memory_space<vmem>>, vector<1x32xf32>
    %18 = vector.extract_strided_slice %13 {offsets = [0, 0], sizes = [16, 32], strides = [1, 1]} : vector<16x64xf32> to vector<16x32xf32>
    %19 = vector.extract_strided_slice %13 {offsets = [0, 32], sizes = [16, 32], strides = [1, 1]} : vector<16x64xf32> to vector<16x32xf32>
    %20 = vector.extract_strided_slice %8 {offsets = [0, 0], sizes = [8, 8], strides = [1, 1]} : vector<8x32xf32> to vector<8x8xf32>
    %cst_21 = arith.constant 0.353553385 : f32
    %21 = vector.broadcast %cst_21 : f32 to vector<8x8xf32>
    %22 = arith.mulf %20, %21 : vector<8x8xf32>
    %23 = arith.truncf %22 : vector<8x8xf32> to vector<8x8xbf16>
    %24 = vector.extract_strided_slice %18 {offsets = [0, 0], sizes = [16, 8], strides = [1, 1]} : vector<16x32xf32> to vector<16x8xf32>
    %25 = arith.truncf %24 : vector<16x8xf32> to vector<16x8xbf16>
    %26 = vector.extract_strided_slice %19 {offsets = [0, 0], sizes = [16, 8], strides = [1, 1]} : vector<16x32xf32> to vector<16x8xf32>
    %27 = arith.truncf %26 : vector<16x8xf32> to vector<16x8xbf16>
    %cst_22 = arith.constant dense<0.000000e+00> : vector<8x16xf32>
    %28 = tpu.matmul %23, %25, %cst_22 {dimension_numbers = #tpu.dot_dimension_numbers<[1], [1], [0], [0], [0, 0, 1, 0], [], []>} : vector<8x8xbf16>, vector<16x8xbf16>, vector<8x16xf32> -> vector<8x16xf32>
    %29 = vector.broadcast %15 : vector<1x16xf32> to vector<8x16xf32>
    %30 = arith.addf %28, %29 : vector<8x16xf32>
    %cst_23 = arith.constant dense<0xFF800000> : vector<8xf32>
    %31 = vector.multi_reduction <maximumf>, %30, %cst_23 [1] : vector<8x16xf32> to vector<8xf32>
    %32 = vector.shape_cast %31 : vector<8xf32> to vector<8x1xf32>
    %33 = vector.broadcast %32 : vector<8x1xf32> to vector<8x16xf32>
    %34 = arith.subf %30, %33 : vector<8x16xf32>
    %35 = math.exp %34 : vector<8x16xf32>
    %cst_24 = arith.constant dense<0.000000e+00> : vector<8xf32>
    %36 = vector.multi_reduction <add>, %35, %cst_24 [1] : vector<8x16xf32> to vector<8xf32>
    %37 = vector.shape_cast %36 : vector<8xf32> to vector<8x1xf32>
    %38 = vector.broadcast %37 : vector<8x1xf32> to vector<8x16xf32>
    %39 = arith.divf %35, %38 : vector<8x16xf32>
    %40 = arith.truncf %39 : vector<8x16xf32> to vector<8x16xbf16>
    %cst_25 = arith.constant dense<0.000000e+00> : vector<8x8xf32>
    %41 = tpu.matmul %40, %27, %cst_25 {dimension_numbers = #tpu.dot_dimension_numbers<[1], [0], [0], [1], [0, 0, 1, 1], [], []>} : vector<8x16xbf16>, vector<16x8xbf16>, vector<8x8xf32> -> vector<8x8xf32>
    %42 = arith.truncf %41 : vector<8x8xf32> to vector<8x8xbf16>
    %43 = vector.extract_strided_slice %16 {offsets = [0, 0], sizes = [8, 32], strides = [1, 1]} : vector<32x32xbf16> to vector<8x32xbf16>
    %cst_26 = arith.constant dense<0.000000e+00> : vector<8x32xf32>
    %44 = tpu.matmul %42, %43, %cst_26 {dimension_numbers = #tpu.dot_dimension_numbers<[1], [0], [0], [1], [0, 0, 1, 1], [], []>} : vector<8x8xbf16>, vector<8x32xbf16>, vector<8x32xf32> -> vector<8x32xf32>
    %45 = vector.extract_strided_slice %8 {offsets = [0, 8], sizes = [8, 8], strides = [1, 1]} : vector<8x32xf32> to vector<8x8xf32>
    %cst_27 = arith.constant 0.353553385 : f32
    %46 = vector.broadcast %cst_27 : f32 to vector<8x8xf32>
    %47 = arith.mulf %45, %46 : vector<8x8xf32>
    %48 = arith.truncf %47 : vector<8x8xf32> to vector<8x8xbf16>
    %49 = vector.extract_strided_slice %18 {offsets = [0, 8], sizes = [16, 8], strides = [1, 1]} : vector<16x32xf32> to vector<16x8xf32>
    %50 = arith.truncf %49 : vector<16x8xf32> to vector<16x8xbf16>
    %51 = vector.extract_strided_slice %19 {offsets = [0, 8], sizes = [16, 8], strides = [1, 1]} : vector<16x32xf32> to vector<16x8xf32>
    %52 = arith.truncf %51 : vector<16x8xf32> to vector<16x8xbf16>
    %cst_28 = arith.constant dense<0.000000e+00> : vector<8x16xf32>
    %53 = tpu.matmul %48, %50, %cst_28 {dimension_numbers = #tpu.dot_dimension_numbers<[1], [1], [0], [0], [0, 0, 1, 0], [], []>} : vector<8x8xbf16>, vector<16x8xbf16>, vector<8x16xf32> -> vector<8x16xf32>
    %54 = vector.broadcast %15 : vector<1x16xf32> to vector<8x16xf32>
    %55 = arith.addf %53, %54 : vector<8x16xf32>
    %cst_29 = arith.constant dense<0xFF800000> : vector<8xf32>
    %56 = vector.multi_reduction <maximumf>, %55, %cst_29 [1] : vector<8x16xf32> to vector<8xf32>
    %57 = vector.shape_cast %56 : vector<8xf32> to vector<8x1xf32>
    %58 = vector.broadcast %57 : vector<8x1xf32> to vector<8x16xf32>
    %59 = arith.subf %55, %58 : vector<8x16xf32>
    %60 = math.exp %59 : vector<8x16xf32>
    %cst_30 = arith.constant dense<0.000000e+00> : vector<8xf32>
    %61 = vector.multi_reduction <add>, %60, %cst_30 [1] : vector<8x16xf32> to vector<8xf32>
    %62 = vector.shape_cast %61 : vector<8xf32> to vector<8x1xf32>
    %63 = vector.broadcast %62 : vector<8x1xf32> to vector<8x16xf32>
    %64 = arith.divf %60, %63 : vector<8x16xf32>
    %65 = arith.truncf %64 : vector<8x16xf32> to vector<8x16xbf16>
    %cst_31 = arith.constant dense<0.000000e+00> : vector<8x8xf32>
    %66 = tpu.matmul %65, %52, %cst_31 {dimension_numbers = #tpu.dot_dimension_numbers<[1], [0], [0], [1], [0, 0, 1, 1], [], []>} : vector<8x16xbf16>, vector<16x8xbf16>, vector<8x8xf32> -> vector<8x8xf32>
    %67 = arith.truncf %66 : vector<8x8xf32> to vector<8x8xbf16>
    %68 = vector.extract_strided_slice %16 {offsets = [8, 0], sizes = [8, 32], strides = [1, 1]} : vector<32x32xbf16> to vector<8x32xbf16>
    %cst_32 = arith.constant dense<0.000000e+00> : vector<8x32xf32>
    %69 = tpu.matmul %67, %68, %cst_32 {dimension_numbers = #tpu.dot_dimension_numbers<[1], [0], [0], [1], [0, 0, 1, 1], [], []>} : vector<8x8xbf16>, vector<8x32xbf16>, vector<8x32xf32> -> vector<8x32xf32>
    %70 = arith.addf %44, %69 : vector<8x32xf32>
    %71 = arith.addf %39, %64 : vector<8x16xf32>
    %72 = vector.extract_strided_slice %8 {offsets = [0, 16], sizes = [8, 8], strides = [1, 1]} : vector<8x32xf32> to vector<8x8xf32>
    %cst_33 = arith.constant 0.353553385 : f32
    %73 = vector.broadcast %cst_33 : f32 to vector<8x8xf32>
    %74 = arith.mulf %72, %73 : vector<8x8xf32>
    %75 = arith.truncf %74 : vector<8x8xf32> to vector<8x8xbf16>
    %76 = vector.extract_strided_slice %18 {offsets = [0, 16], sizes = [16, 8], strides = [1, 1]} : vector<16x32xf32> to vector<16x8xf32>
    %77 = arith.truncf %76 : vector<16x8xf32> to vector<16x8xbf16>
    %78 = vector.extract_strided_slice %19 {offsets = [0, 16], sizes = [16, 8], strides = [1, 1]} : vector<16x32xf32> to vector<16x8xf32>
    %79 = arith.truncf %78 : vector<16x8xf32> to vector<16x8xbf16>
    %cst_34 = arith.constant dense<0.000000e+00> : vector<8x16xf32>
    %80 = tpu.matmul %75, %77, %cst_34 {dimension_numbers = #tpu.dot_dimension_numbers<[1], [1], [0], [0], [0, 0, 1, 0], [], []>} : vector<8x8xbf16>, vector<16x8xbf16>, vector<8x16xf32> -> vector<8x16xf32>
    %81 = vector.broadcast %15 : vector<1x16xf32> to vector<8x16xf32>
    %82 = arith.addf %80, %81 : vector<8x16xf32>
    %cst_35 = arith.constant dense<0xFF800000> : vector<8xf32>
    %83 = vector.multi_reduction <maximumf>, %82, %cst_35 [1] : vector<8x16xf32> to vector<8xf32>
    %84 = vector.shape_cast %83 : vector<8xf32> to vector<8x1xf32>
    %85 = vector.broadcast %84 : vector<8x1xf32> to vector<8x16xf32>
    %86 = arith.subf %82, %85 : vector<8x16xf32>
    %87 = math.exp %86 : vector<8x16xf32>
    %cst_36 = arith.constant dense<0.000000e+00> : vector<8xf32>
    %88 = vector.multi_reduction <add>, %87, %cst_36 [1] : vector<8x16xf32> to vector<8xf32>
    %89 = vector.shape_cast %88 : vector<8xf32> to vector<8x1xf32>
    %90 = vector.broadcast %89 : vector<8x1xf32> to vector<8x16xf32>
    %91 = arith.divf %87, %90 : vector<8x16xf32>
    %92 = arith.truncf %91 : vector<8x16xf32> to vector<8x16xbf16>
    %cst_37 = arith.constant dense<0.000000e+00> : vector<8x8xf32>
    %93 = tpu.matmul %92, %79, %cst_37 {dimension_numbers = #tpu.dot_dimension_numbers<[1], [0], [0], [1], [0, 0, 1, 1], [], []>} : vector<8x16xbf16>, vector<16x8xbf16>, vector<8x8xf32> -> vector<8x8xf32>
    %94 = arith.truncf %93 : vector<8x8xf32> to vector<8x8xbf16>
    %95 = vector.extract_strided_slice %16 {offsets = [16, 0], sizes = [8, 32], strides = [1, 1]} : vector<32x32xbf16> to vector<8x32xbf16>
    %cst_38 = arith.constant dense<0.000000e+00> : vector<8x32xf32>
    %96 = tpu.matmul %94, %95, %cst_38 {dimension_numbers = #tpu.dot_dimension_numbers<[1], [0], [0], [1], [0, 0, 1, 1], [], []>} : vector<8x8xbf16>, vector<8x32xbf16>, vector<8x32xf32> -> vector<8x32xf32>
    %97 = arith.addf %70, %96 : vector<8x32xf32>
    %98 = arith.addf %71, %91 : vector<8x16xf32>
    %99 = vector.extract_strided_slice %8 {offsets = [0, 24], sizes = [8, 8], strides = [1, 1]} : vector<8x32xf32> to vector<8x8xf32>
    %cst_39 = arith.constant 0.353553385 : f32
    %100 = vector.broadcast %cst_39 : f32 to vector<8x8xf32>
    %101 = arith.mulf %99, %100 : vector<8x8xf32>
    %102 = arith.truncf %101 : vector<8x8xf32> to vector<8x8xbf16>
    %103 = vector.extract_strided_slice %18 {offsets = [0, 24], sizes = [16, 8], strides = [1, 1]} : vector<16x32xf32> to vector<16x8xf32>
    %104 = arith.truncf %103 : vector<16x8xf32> to vector<16x8xbf16>
    %105 = vector.extract_strided_slice %19 {offsets = [0, 24], sizes = [16, 8], strides = [1, 1]} : vector<16x32xf32> to vector<16x8xf32>
    %106 = arith.truncf %105 : vector<16x8xf32> to vector<16x8xbf16>
    %cst_40 = arith.constant dense<0.000000e+00> : vector<8x16xf32>
    %107 = tpu.matmul %102, %104, %cst_40 {dimension_numbers = #tpu.dot_dimension_numbers<[1], [1], [0], [0], [0, 0, 1, 0], [], []>} : vector<8x8xbf16>, vector<16x8xbf16>, vector<8x16xf32> -> vector<8x16xf32>
    %108 = vector.broadcast %15 : vector<1x16xf32> to vector<8x16xf32>
    %109 = arith.addf %107, %108 : vector<8x16xf32>
    %cst_41 = arith.constant dense<0xFF800000> : vector<8xf32>
    %110 = vector.multi_reduction <maximumf>, %109, %cst_41 [1] : vector<8x16xf32> to vector<8xf32>
    %111 = vector.shape_cast %110 : vector<8xf32> to vector<8x1xf32>
    %112 = vector.broadcast %111 : vector<8x1xf32> to vector<8x16xf32>
    %113 = arith.subf %109, %112 : vector<8x16xf32>
    %114 = math.exp %113 : vector<8x16xf32>
    %cst_42 = arith.constant dense<0.000000e+00> : vector<8xf32>
    %115 = vector.multi_reduction <add>, %114, %cst_42 [1] : vector<8x16xf32> to vector<8xf32>
    %116 = vector.shape_cast %115 : vector<8xf32> to vector<8x1xf32>
    %117 = vector.broadcast %116 : vector<8x1xf32> to vector<8x16xf32>
    %118 = arith.divf %114, %117 : vector<8x16xf32>
    %119 = arith.truncf %118 : vector<8x16xf32> to vector<8x16xbf16>
    %cst_43 = arith.constant dense<0.000000e+00> : vector<8x8xf32>
    %120 = tpu.matmul %119, %106, %cst_43 {dimension_numbers = #tpu.dot_dimension_numbers<[1], [0], [0], [1], [0, 0, 1, 1], [], []>} : vector<8x16xbf16>, vector<16x8xbf16>, vector<8x8xf32> -> vector<8x8xf32>
    %121 = arith.truncf %120 : vector<8x8xf32> to vector<8x8xbf16>
    %122 = vector.extract_strided_slice %16 {offsets = [24, 0], sizes = [8, 32], strides = [1, 1]} : vector<32x32xbf16> to vector<8x32xbf16>
    %cst_44 = arith.constant dense<0.000000e+00> : vector<8x32xf32>
    %123 = tpu.matmul %121, %122, %cst_44 {dimension_numbers = #tpu.dot_dimension_numbers<[1], [0], [0], [1], [0, 0, 1, 1], [], []>} : vector<8x8xbf16>, vector<8x32xbf16>, vector<8x32xf32> -> vector<8x32xf32>
    %124 = arith.addf %97, %123 : vector<8x32xf32>
    %125 = arith.addf %98, %118 : vector<8x16xf32>
    %126 = vector.broadcast %17 : vector<1x32xf32> to vector<8x32xf32>
    %127 = arith.addf %124, %126 : vector<8x32xf32>
    %cst_45 = arith.constant 2.500000e-01 : f32
    %128 = vector.broadcast %cst_45 : f32 to vector<8x16xf32>
    %129 = arith.mulf %125, %128 : vector<8x16xf32>
    %130 = arith.extf %1 : vector<8x32xbf16> to vector<8x32xf32>
    %131 = arith.addf %130, %127 : vector<8x32xf32>
    %c0_46 = arith.constant 0 : index
    %c0_47 = arith.constant 0 : index
    %132 = vector.load %arg11[%c0_46, %c0_47] : memref<1x32xf32, #tpu.memory_space<vmem>>, vector<1x32xf32>
    %c0_48 = arith.constant 0 : index
    %c0_49 = arith.constant 0 : index
    %133 = vector.load %arg12[%c0_48, %c0_49] : memref<1x32xf32, #tpu.memory_space<vmem>>, vector<1x32xf32>
    %cst_50 = arith.constant dense<0.000000e+00> : vector<8xf32>
    %134 = vector.multi_reduction <add>, %131, %cst_50 [1] : vector<8x32xf32> to vector<8xf32>
    %135 = vector.shape_cast %134 : vector<8xf32> to vector<8x1xf32>
    %cst_51 = arith.constant 3.200000e+01 : f32
    %136 = vector.broadcast %cst_51 : f32 to vector<8x1xf32>
    %137 = arith.divf %135, %136 : vector<8x1xf32>
    %138 = vector.broadcast %137 : vector<8x1xf32> to vector<8x32xf32>
    %139 = arith.subf %131, %138 : vector<8x32xf32>
    %140 = arith.mulf %139, %139 : vector<8x32xf32>
    %cst_52 = arith.constant dense<0.000000e+00> : vector<8xf32>
    %141 = vector.multi_reduction <add>, %140, %cst_52 [1] : vector<8x32xf32> to vector<8xf32>
    %142 = vector.shape_cast %141 : vector<8xf32> to vector<8x1xf32>
    %cst_53 = arith.constant 3.200000e+01 : f32
    %143 = vector.broadcast %cst_53 : f32 to vector<8x1xf32>
    %144 = arith.divf %142, %143 : vector<8x1xf32>
    %145 = vector.broadcast %137 : vector<8x1xf32> to vector<8x32xf32>
    %146 = arith.subf %131, %145 : vector<8x32xf32>
    %cst_54 = arith.constant 9.99999974E-6 : f32
    %147 = vector.broadcast %cst_54 : f32 to vector<8x1xf32>
    %148 = arith.addf %144, %147 : vector<8x1xf32>
    %149 = math.rsqrt %148 : vector<8x1xf32>
    %150 = vector.broadcast %149 : vector<8x1xf32> to vector<8x32xf32>
    %151 = arith.mulf %146, %150 : vector<8x32xf32>
    %152 = vector.broadcast %132 : vector<1x32xf32> to vector<8x32xf32>
    %153 = arith.mulf %151, %152 : vector<8x32xf32>
    %154 = vector.broadcast %133 : vector<1x32xf32> to vector<8x32xf32>
    %155 = arith.addf %153, %154 : vector<8x32xf32>
    %156 = arith.truncf %155 : vector<8x32xf32> to vector<8x32xbf16>
    %c0_55 = arith.constant 0 : index
    %c0_56 = arith.constant 0 : index
    %c0_57 = arith.constant 0 : index
    %157 = vector.load %arg13[%c0_55, %c0_56, %c0_57] : memref<1x8x32xbf16, #tpu.memory_space<vmem>>, vector<1x8x32xbf16>
    %158 = vector.shape_cast %157 : vector<1x8x32xbf16> to vector<8x32xbf16>
    %159 = vector.shape_cast %156 : vector<8x32xbf16> to vector<1x8x32xbf16>
    tpu.vector_store %arg13[%c0_55, %c0_56, %c0_57], %159 {strides = array<i32>} : memref<1x8x32xbf16, #tpu.memory_space<vmem>>, vector<1x8x32xbf16>,
    %c0_58 = arith.constant 0 : index
    %c0_59 = arith.constant 0 : index
    %c0_60 = arith.constant 0 : index
    %160 = vector.load %arg14[%c0_58, %c0_59, %c0_60] : memref<1x8x16xf32, #tpu.memory_space<vmem>>, vector<1x8x16xf32>
    %161 = vector.shape_cast %160 : vector<1x8x16xf32> to vector<8x16xf32>
    %162 = vector.shape_cast %129 : vector<8x16xf32> to vector<1x8x16xf32>
    tpu.vector_store %arg14[%c0_58, %c0_59, %c0_60], %162 {strides = array<i32>} : memref<1x8x16xf32, #tpu.memory_space<vmem>>, vector<1x8x16xf32>,
    return
  }
  func.func @transform_0(%arg0: i32, %arg1: i32) -> (i32, i32, i32) {
    %c0_i32 = arith.constant 0 : i32
    %c0_i32_0 = arith.constant 0 : i32
    return %arg0, %arg1, %c0_i32 : i32, i32, i32
  }
  func.func @transform_1(%arg0: i32, %arg1: i32) -> (i32, i32, i32) {
    %c0_i32 = arith.constant 0 : i32
    %c0_i32_0 = arith.constant 0 : i32
    %c0_i32_1 = arith.constant 0 : i32
    return %arg0, %c0_i32, %c0_i32_0 : i32, i32, i32
  }
  func.func @transform_2(%arg0: i32, %arg1: i32) -> (i32, i32, i32) {
    %c0_i32 = arith.constant 0 : i32
    %c0_i32_0 = arith.constant 0 : i32
    %c0_i32_1 = arith.constant 0 : i32
    return %arg0, %c0_i32, %c0_i32_0 : i32, i32, i32
  }
  func.func @transform_3(%arg0: i32, %arg1: i32) -> (i32, i32) {
    %c0_i32 = arith.constant 0 : i32
    %c0_i32_0 = arith.constant 0 : i32
    %c0_i32_1 = arith.constant 0 : i32
    return %c0_i32, %c0_i32_0 : i32, i32
  }
  func.func @transform_4(%arg0: i32, %arg1: i32) -> (i32, i32) {
    %c0_i32 = arith.constant 0 : i32
    %c0_i32_0 = arith.constant 0 : i32
    %c0_i32_1 = arith.constant 0 : i32
    return %c0_i32, %c0_i32_0 : i32, i32
  }
  func.func @transform_5(%arg0: i32, %arg1: i32) -> (i32, i32) {
    %c0_i32 = arith.constant 0 : i32
    %c0_i32_0 = arith.constant 0 : i32
    %c0_i32_1 = arith.constant 0 : i32
    return %c0_i32, %c0_i32_0 : i32, i32
  }
  func.func @transform_6(%arg0: i32, %arg1: i32) -> (i32, i32) {
    %c0_i32 = arith.constant 0 : i32
    %c0_i32_0 = arith.constant 0 : i32
    %c0_i32_1 = arith.constant 0 : i32
    return %c0_i32, %c0_i32_0 : i32, i32
  }
  func.func @transform_7(%arg0: i32, %arg1: i32) -> (i32, i32) {
    %c0_i32 = arith.constant 0 : i32
    %c0_i32_0 = arith.constant 0 : i32
    %c0_i32_1 = arith.constant 0 : i32
    return %c0_i32, %c0_i32_0 : i32, i32
  }
  func.func @transform_8(%arg0: i32, %arg1: i32) -> (i32, i32) {
    %c0_i32 = arith.constant 0 : i32
    %c0_i32_0 = arith.constant 0 : i32
    %c0_i32_1 = arith.constant 0 : i32
    return %c0_i32, %c0_i32_0 : i32, i32
  }
  func.func @transform_9(%arg0: i32, %arg1: i32) -> (i32, i32) {
    %c0_i32 = arith.constant 0 : i32
    %c0_i32_0 = arith.constant 0 : i32
    %c0_i32_1 = arith.constant 0 : i32
    return %c0_i32, %c0_i32_0 : i32, i32
  }
  func.func @transform_10(%arg0: i32, %arg1: i32) -> (i32, i32) {
    %c0_i32 = arith.constant 0 : i32
    %c0_i32_0 = arith.constant 0 : i32
    %c0_i32_1 = arith.constant 0 : i32
    return %c0_i32, %c0_i32_0 : i32, i32
  }
  func.func @transform_11(%arg0: i32, %arg1: i32) -> (i32, i32, i32) {
    %c0_i32 = arith.constant 0 : i32
    %c0_i32_0 = arith.constant 0 : i32
    return %arg0, %arg1, %c0_i32 : i32, i32, i32
  }
  func.func @transform_12(%arg0: i32, %arg1: i32) -> (i32, i32, i32) {
    %c0_i32 = arith.constant 0 : i32
    %c0_i32_0 = arith.constant 0 : i32
    return %arg0, %arg1, %c0_i32 : i32, i32, i32
  }
}

module attributes {stable_mosaic.version = 11 : i64} {
  func.func @_ffn_add_ln_kernel(%arg0: i32, %arg1: memref<16x32xbf16, #tpu.memory_space<vmem>>, %arg2: memref<32x1024xbf16, #tpu.memory_space<vmem>>, %arg3: memref<1x1024xf32, #tpu.memory_space<vmem>>, %arg4: memref<1024x32xbf16, #tpu.memory_space<vmem>>, %arg5: memref<1x32xf32, #tpu.memory_space<vmem>>, %arg6: memref<1x32xf32, #tpu.memory_space<vmem>>, %arg7: memref<1x32xf32, #tpu.memory_space<vmem>>, %arg8: memref<16x32xbf16, #tpu.memory_space<vmem>>) attributes {dimension_semantics = [#tpu.dimension_semantics<parallel>], iteration_bounds = array<i64: 1>, scalar_prefetch = 0 : i64, scratch_operands = 0 : i64, tpu.core_type = #tpu.core_type<tc>, window_params = [{transform_indices = @transform_0, window_bounds = array<i64: 16, 32>}, {pipeline_mode = #tpu.pipeline_mode<synchronous>, transform_indices = @transform_1, window_bounds = array<i64: 32, 1024>}, {pipeline_mode = #tpu.pipeline_mode<synchronous>, transform_indices = @transform_2, window_bounds = array<i64: 1, 1024>}, {pipeline_mode = #tpu.pipeline_mode<synchronous>, transform_indices = @transform_3, window_bounds = array<i64: 1024, 32>}, {pipeline_mode = #tpu.pipeline_mode<synchronous>, transform_indices = @transform_4, window_bounds = array<i64: 1, 32>}, {pipeline_mode = #tpu.pipeline_mode<synchronous>, transform_indices = @transform_5, window_bounds = array<i64: 1, 32>}, {pipeline_mode = #tpu.pipeline_mode<synchronous>, transform_indices = @transform_6, window_bounds = array<i64: 1, 32>}, {transform_indices = @transform_7, window_bounds = array<i64: 16, 32>}]} {
    %c0 = arith.constant 0 : index
    %c0_0 = arith.constant 0 : index
    %0 = vector.load %arg1[%c0, %c0_0] : memref<16x32xbf16, #tpu.memory_space<vmem>>, vector<16x32xbf16>
    %c0_1 = arith.constant 0 : index
    %c0_2 = arith.constant 0 : index
    %1 = vector.load %arg2[%c0_1, %c0_2] : memref<32x1024xbf16, #tpu.memory_space<vmem>>, vector<32x1024xbf16>
    %cst = arith.constant dense<0.000000e+00> : vector<16x1024xf32>
    %2 = tpu.matmul %0, %1, %cst {dimension_numbers = #tpu.dot_dimension_numbers<[1], [0], [0], [1], [0, 0, 1, 1], [], []>} : vector<16x32xbf16>, vector<32x1024xbf16>, vector<16x1024xf32> -> vector<16x1024xf32>
    %c0_3 = arith.constant 0 : index
    %c0_4 = arith.constant 0 : index
    %3 = vector.load %arg3[%c0_3, %c0_4] : memref<1x1024xf32, #tpu.memory_space<vmem>>, vector<1x1024xf32>
    %4 = vector.broadcast %3 : vector<1x1024xf32> to vector<16x1024xf32>
    %5 = arith.addf %2, %4 : vector<16x1024xf32>
    %6 = arith.mulf %5, %5 : vector<16x1024xf32>
    %7 = arith.mulf %5, %6 : vector<16x1024xf32>
    %cst_5 = arith.constant 4.471500e-02 : f32
    %8 = vector.broadcast %cst_5 : f32 to vector<16x1024xf32>
    %9 = arith.mulf %8, %7 : vector<16x1024xf32>
    %10 = arith.addf %5, %9 : vector<16x1024xf32>
    %cst_6 = arith.constant 0.797884583 : f32
    %11 = vector.broadcast %cst_6 : f32 to vector<16x1024xf32>
    %12 = arith.mulf %11, %10 : vector<16x1024xf32>
    %13 = math.tanh %12 : vector<16x1024xf32>
    %cst_7 = arith.constant 1.000000e+00 : f32
    %14 = vector.broadcast %cst_7 : f32 to vector<16x1024xf32>
    %15 = arith.addf %14, %13 : vector<16x1024xf32>
    %cst_8 = arith.constant 5.000000e-01 : f32
    %16 = vector.broadcast %cst_8 : f32 to vector<16x1024xf32>
    %17 = arith.mulf %16, %15 : vector<16x1024xf32>
    %18 = arith.mulf %5, %17 : vector<16x1024xf32>
    %19 = arith.extf %0 : vector<16x32xbf16> to vector<16x32xf32>
    %20 = arith.truncf %18 : vector<16x1024xf32> to vector<16x1024xbf16>
    %c0_9 = arith.constant 0 : index
    %c0_10 = arith.constant 0 : index
    %21 = vector.load %arg4[%c0_9, %c0_10] : memref<1024x32xbf16, #tpu.memory_space<vmem>>, vector<1024x32xbf16>
    %cst_11 = arith.constant dense<0.000000e+00> : vector<16x32xf32>
    %22 = tpu.matmul %20, %21, %cst_11 {dimension_numbers = #tpu.dot_dimension_numbers<[1], [0], [0], [1], [0, 0, 1, 1], [], []>} : vector<16x1024xbf16>, vector<1024x32xbf16>, vector<16x32xf32> -> vector<16x32xf32>
    %23 = arith.addf %19, %22 : vector<16x32xf32>
    %c0_12 = arith.constant 0 : index
    %c0_13 = arith.constant 0 : index
    %24 = vector.load %arg5[%c0_12, %c0_13] : memref<1x32xf32, #tpu.memory_space<vmem>>, vector<1x32xf32>
    %25 = vector.broadcast %24 : vector<1x32xf32> to vector<16x32xf32>
    %26 = arith.addf %23, %25 : vector<16x32xf32>
    %c0_14 = arith.constant 0 : index
    %c0_15 = arith.constant 0 : index
    %27 = vector.load %arg6[%c0_14, %c0_15] : memref<1x32xf32, #tpu.memory_space<vmem>>, vector<1x32xf32>
    %c0_16 = arith.constant 0 : index
    %c0_17 = arith.constant 0 : index
    %28 = vector.load %arg7[%c0_16, %c0_17] : memref<1x32xf32, #tpu.memory_space<vmem>>, vector<1x32xf32>
    %cst_18 = arith.constant dense<0.000000e+00> : vector<16xf32>
    %29 = vector.multi_reduction <add>, %26, %cst_18 [1] : vector<16x32xf32> to vector<16xf32>
    %30 = vector.shape_cast %29 : vector<16xf32> to vector<16x1xf32>
    %cst_19 = arith.constant 3.200000e+01 : f32
    %31 = vector.broadcast %cst_19 : f32 to vector<16x1xf32>
    %32 = arith.divf %30, %31 : vector<16x1xf32>
    %33 = vector.broadcast %32 : vector<16x1xf32> to vector<16x32xf32>
    %34 = arith.subf %26, %33 : vector<16x32xf32>
    %35 = arith.mulf %34, %34 : vector<16x32xf32>
    %cst_20 = arith.constant dense<0.000000e+00> : vector<16xf32>
    %36 = vector.multi_reduction <add>, %35, %cst_20 [1] : vector<16x32xf32> to vector<16xf32>
    %37 = vector.shape_cast %36 : vector<16xf32> to vector<16x1xf32>
    %cst_21 = arith.constant 3.200000e+01 : f32
    %38 = vector.broadcast %cst_21 : f32 to vector<16x1xf32>
    %39 = arith.divf %37, %38 : vector<16x1xf32>
    %40 = vector.broadcast %32 : vector<16x1xf32> to vector<16x32xf32>
    %41 = arith.subf %26, %40 : vector<16x32xf32>
    %cst_22 = arith.constant 9.99999974E-6 : f32
    %42 = vector.broadcast %cst_22 : f32 to vector<16x1xf32>
    %43 = arith.addf %39, %42 : vector<16x1xf32>
    %44 = math.rsqrt %43 : vector<16x1xf32>
    %45 = vector.broadcast %44 : vector<16x1xf32> to vector<16x32xf32>
    %46 = arith.mulf %41, %45 : vector<16x32xf32>
    %47 = vector.broadcast %27 : vector<1x32xf32> to vector<16x32xf32>
    %48 = arith.mulf %46, %47 : vector<16x32xf32>
    %49 = vector.broadcast %28 : vector<1x32xf32> to vector<16x32xf32>
    %50 = arith.addf %48, %49 : vector<16x32xf32>
    %51 = arith.truncf %50 : vector<16x32xf32> to vector<16x32xbf16>
    %c0_23 = arith.constant 0 : index
    %c0_24 = arith.constant 0 : index
    %52 = vector.load %arg8[%c0_23, %c0_24] : memref<16x32xbf16, #tpu.memory_space<vmem>>, vector<16x32xbf16>
    tpu.vector_store %arg8[%c0_23, %c0_24], %51 {strides = array<i32>} : memref<16x32xbf16, #tpu.memory_space<vmem>>, vector<16x32xbf16>,
    return
  }
  func.func @transform_0(%arg0: i32) -> (i32, i32) {
    %c0_i32 = arith.constant 0 : i32
    %c0_i32_0 = arith.constant 0 : i32
    return %arg0, %c0_i32 : i32, i32
  }
  func.func @transform_1(%arg0: i32) -> (i32, i32) {
    %c0_i32 = arith.constant 0 : i32
    %c0_i32_0 = arith.constant 0 : i32
    %c0_i32_1 = arith.constant 0 : i32
    return %c0_i32, %c0_i32_0 : i32, i32
  }
  func.func @transform_2(%arg0: i32) -> (i32, i32) {
    %c0_i32 = arith.constant 0 : i32
    %c0_i32_0 = arith.constant 0 : i32
    %c0_i32_1 = arith.constant 0 : i32
    return %c0_i32, %c0_i32_0 : i32, i32
  }
  func.func @transform_3(%arg0: i32) -> (i32, i32) {
    %c0_i32 = arith.constant 0 : i32
    %c0_i32_0 = arith.constant 0 : i32
    %c0_i32_1 = arith.constant 0 : i32
    return %c0_i32, %c0_i32_0 : i32, i32
  }
  func.func @transform_4(%arg0: i32) -> (i32, i32) {
    %c0_i32 = arith.constant 0 : i32
    %c0_i32_0 = arith.constant 0 : i32
    %c0_i32_1 = arith.constant 0 : i32
    return %c0_i32, %c0_i32_0 : i32, i32
  }
  func.func @transform_5(%arg0: i32) -> (i32, i32) {
    %c0_i32 = arith.constant 0 : i32
    %c0_i32_0 = arith.constant 0 : i32
    %c0_i32_1 = arith.constant 0 : i32
    return %c0_i32, %c0_i32_0 : i32, i32
  }
  func.func @transform_6(%arg0: i32) -> (i32, i32) {
    %c0_i32 = arith.constant 0 : i32
    %c0_i32_0 = arith.constant 0 : i32
    %c0_i32_1 = arith.constant 0 : i32
    return %c0_i32, %c0_i32_0 : i32, i32
  }
  func.func @transform_7(%arg0: i32) -> (i32, i32) {
    %c0_i32 = arith.constant 0 : i32
    %c0_i32_0 = arith.constant 0 : i32
    return %arg0, %c0_i32 : i32, i32
  }
}

module attributes {stable_mosaic.version = 11 : i64} {
  func.func @_linear_kernel(%arg0: i32, %arg1: i32, %arg2: memref<16x32xbf16, #tpu.memory_space<vmem>>, %arg3: memref<32x128xbf16, #tpu.memory_space<vmem>>, %arg4: memref<1x128xf32, #tpu.memory_space<vmem>>, %arg5: memref<16x128xf32, #tpu.memory_space<vmem>>) attributes {dimension_semantics = [#tpu.dimension_semantics<parallel>, #tpu.dimension_semantics<parallel>], iteration_bounds = array<i64: 1, 1>, scalar_prefetch = 0 : i64, scratch_operands = 0 : i64, tpu.core_type = #tpu.core_type<tc>, window_params = [{transform_indices = @transform_0, window_bounds = array<i64: 16, 32>}, {transform_indices = @transform_1, window_bounds = array<i64: 32, 128>}, {transform_indices = @transform_2, window_bounds = array<i64: 1, 128>}, {transform_indices = @transform_3, window_bounds = array<i64: 16, 128>}]} {
    %c0 = arith.constant 0 : index
    %c0_0 = arith.constant 0 : index
    %0 = vector.load %arg2[%c0, %c0_0] : memref<16x32xbf16, #tpu.memory_space<vmem>>, vector<16x32xbf16>
    %c0_1 = arith.constant 0 : index
    %c0_2 = arith.constant 0 : index
    %1 = vector.load %arg3[%c0_1, %c0_2] : memref<32x128xbf16, #tpu.memory_space<vmem>>, vector<32x128xbf16>
    %cst = arith.constant dense<0.000000e+00> : vector<16x128xf32>
    %2 = tpu.matmul %0, %1, %cst {dimension_numbers = #tpu.dot_dimension_numbers<[1], [0], [0], [1], [0, 0, 1, 1], [], []>} : vector<16x32xbf16>, vector<32x128xbf16>, vector<16x128xf32> -> vector<16x128xf32>
    %c0_3 = arith.constant 0 : index
    %c0_4 = arith.constant 0 : index
    %3 = vector.load %arg4[%c0_3, %c0_4] : memref<1x128xf32, #tpu.memory_space<vmem>>, vector<1x128xf32>
    %4 = vector.broadcast %3 : vector<1x128xf32> to vector<16x128xf32>
    %5 = arith.addf %2, %4 : vector<16x128xf32>
    %c0_5 = arith.constant 0 : index
    %c0_6 = arith.constant 0 : index
    %6 = vector.load %arg5[%c0_5, %c0_6] : memref<16x128xf32, #tpu.memory_space<vmem>>, vector<16x128xf32>
    tpu.vector_store %arg5[%c0_5, %c0_6], %5 {strides = array<i32>} : memref<16x128xf32, #tpu.memory_space<vmem>>, vector<16x128xf32>,
    return
  }
  func.func @transform_0(%arg0: i32, %arg1: i32) -> (i32, i32) {
    %c0_i32 = arith.constant 0 : i32
    %c0_i32_0 = arith.constant 0 : i32
    return %arg1, %c0_i32 : i32, i32
  }
  func.func @transform_1(%arg0: i32, %arg1: i32) -> (i32, i32) {
    %c0_i32 = arith.constant 0 : i32
    %c0_i32_0 = arith.constant 0 : i32
    return %c0_i32, %arg0 : i32, i32
  }
  func.func @transform_2(%arg0: i32, %arg1: i32) -> (i32, i32) {
    %c0_i32 = arith.constant 0 : i32
    %c0_i32_0 = arith.constant 0 : i32
    return %c0_i32, %arg0 : i32, i32
  }
  func.func @transform_3(%arg0: i32, %arg1: i32) -> (i32, i32) {
    %c0_i32 = arith.constant 0 : i32
    return %arg1, %arg0 : i32, i32
  }
}

</mosaic_0001>

<bundles_post_ra>
// kernel: htr_transformer_decoder_forward.8
= control target key start
LH: loop header
LB: loop body
LE: loop exit
PB: predicated region body
PF: predicated region fallthrough
CT: control target
= control target key end

     0   :  { %s1335_s21 = smov 0   ;;  %s1337_s22 = smov 0   ;;  %s1490_s0 = inlined_call_operand.vmem [shape: bf16[2,8,32], index: 0, kind: input, shape index: {}]   ;;  %s1491_s1 = inlined_call_operand.vmem [shape: bf16[2,16,32], index: 1, kind: input, shape index: {}]   ;;  %s1492_s2 = inlined_call_operand.vmem [shape: f32[2,1,16], index: 2, kind: input, shape index: {}]   ;;  %s1493_s3 = inlined_call_operand.vmem [shape: bf16[32,32], index: 3, kind: input, shape index: {}]   ;;  %s1494_s4 = inlined_call_operand.vmem [shape: f32[1,32], index: 4, kind: input, shape index: {}]   ;;  %s1495_s5 = inlined_call_operand.vmem [shape: bf16[32,64], index: 5, kind: input, shape index: {}]   ;;  %s1496_s6 = inlined_call_operand.vmem [shape: f32[1,64], index: 6, kind: input, shape index: {}]   ;;  %s1497_s7 = inlined_call_operand.vmem [shape: bf16[32,32], index: 7, kind: input, shape index: {}]   ;;  %s1498_s8 = inlined_call_operand.vmem [shape: f32[1,32], index: 8, kind: input, shape index: {}]   ;;  %s1499_s9 = inlined_call_operand.vmem [shape: f32[1,32], index: 9, kind: input, shape index: {}]   ;;  %s1500_s10 = inlined_call_operand.vmem [shape: f32[1,32], index: 10, kind: input, shape index: {}]   ;;  %s1501_s11 = inlined_call_operand.vmem [shape: bf16[2,8,32], index: 11, kind: output, shape index: {0}]   ;;  %s1502_s12 = inlined_call_operand.vmem [shape: f32[2,8,16], index: 12, kind: output, shape index: {1}]  }
   0x1   :  { %s1339_s23 = smov 0  }
   0x2 LB: > { %s35_s24 = sadd.s32 1, %s1256_s22  ;;  %p1132_p0 = scmp.ge.s32.totalorder %s1260_s23, 1  ;;  %s1260_s23 = sphi %s1339_s23, %s23_s23   ;;  %s1256_s22 = sphi %s1337_s22, %s1504_s22   ;;  %s1252_s21 = sphi %s1335_s21, %s1503_s21  }
   0x3   : > { %p37_p1 = scmp.ge.s32.totalorder %s35_s24, 2  ;;  %p403_p2 = scmp.lt.s32.totalorder %s1260_s23, 3 }
   0x5   : > { %s1506_s24 = smov (%p37_p1, %s35_s24), 0  ;;  %p404_p3 = pnand %p1132_p0, %p403_p2 }
   0x6   : > { %p464_p4 = scmp.lt.s32.totalorder (!%p404_p3), %s1252_s21, 1  ;;  %s1262_s13 = smov (!%p404_p3), 120  }
   0x7   : > { %407 = sbr.rel (%p404_p3) target bundleno = 1672 (0x688), region = 64  ;;  %s1263_s14 = smov (!%p404_p3), 96  }
   0x8   : > { %s1264_s17 = smov (!%p404_p3), 104   ;;  %s1265_s25 = smov (!%p404_p3), 112  }
   0x9   : > { %s1266_s28 = smov (!%p404_p3), 72   ;;  %s1267_s29 = smov (!%p404_p3), 80  }
   0xa   : > { %s1268_s30 = smov (!%p404_p3), 88  }
   0xc   : > { %v1177_v0 = vld [vmem:[%s1493_s3 + $0x8] sm:$0xff]  ;;  %v1176_v2 = vld [vmem:[%s1493_s3] sm:$0xff]  ;;  %s1508_s21 = smov (!%p464_p4, %s1252_s21), 1  ;;  %vm517_vm0 = vcmask 261120   ;;  %vm588_vm1 = vcmask 64512   ;;  %vm727_vm2 = vcmask 1043456  }
   0xd   : > { %v1179_v1 = vld [vmem:[%s1495_s5 + $0x8] sm:$0xff]  ;;  %527 = vmatpush.bf16.msra.mxu0 %v1177_v0  ;;  %v1178_v3 = vld [vmem:[%s1495_s5] sm:$0xff]  ;;  %s1133_s15 = sshll.u32 %s1508_s21, 2  ;;  %s1174_s16 = sshll.u32 %s1508_s21, 3  ;;  %vm608_vm3 = vcmask 130048  }
   0xe   : > { %568 = vmatpush.bf16.msra.mxu1 %v1179_v1  ;;  %s470_s19 = scalar_lea.vmem %s1490_s0, %s1133_s15  ;;  %s475_s26 = scalar_lea.vmem %s1491_s1, %s1174_s16  ;;  %v1212_v6 = vld [vmem:[%s1494_s4] ss:$0 sm:$0xff] }
   0xf   : > { %v1374_v4 = vld [vmem:[%s470_s19] sm:$0xf]  ;;  %s478_s20 = scalar_lea.vmem %s1492_s2, %s1508_s21  ;;  %s485_s19 = scalar_lea.vmem %s1501_s11, %s1133_s15 }
  0x10   : > { %v1175_v5 = vld [vmem:[%s475_s26] sm:$0xff] }
  0x11   : > { %528 = vmatpush.bf16.msra.mxu0 %v1176_v2  ;;  %v1213_v12 = vld [vmem:[%s1496_s6] ss:$0 sm:$0xff] }
  0x12   : > { %569 = vmatpush.bf16.msra.mxu1 %v1178_v3  ;;  %v577_v19 = vld [vmem:[%s1497_s7] sm:$0xf] }
  0x13   : > { %v748_v20 = vsel %vm727_vm2, %v577_v19, 0  ;;  %v1408_v27 = vld [vmem:[%s478_s20] ss:$0 sm:$0xff] }
  0x14   : > { %1146 = vmatmul.msk.bf16.vlgmr.msra.gmra.mxu0 %vm517_vm0, %v1374_v4 }
  0x15   : > { %1159 = vmatmul.msk.bf16.vlgmr.msra.gmra.mxu1 %vm517_vm0, %v1175_v5 }
  0x91   : > { %v530_v7 = vpop.f32.mrf.mxu0 }
  0x92   : > { %v571_v8 = vpop.f32.mrf.mxu1  ;;  %v531_v9 = vadd.f32 %v1212_v6, %v530_v7 }
  0x93   : > { %v572_v15 = vadd.f32 %v1213_v12, %v571_v8 }
  0x94   : > { %v582_v10 = vmul.f32 0.35355338, %v531_v9 }
  0x96   : > { %v583_v11 = vpack.c.bf16 %v582_v10, %v582_v10 }
  0x98   : > { %656 = vrot.lane.b32.xlu2 %v583_v11, %s1262_s13 }
  0x99   : > { %v532_v14 = vpop.f32.mrf.mxu0 }
  0x9a   : > { %v573_v13 = vpop.f32.mrf.mxu1 }
  0x9b   : > { %v574_v16 = vadd.f32 %v1213_v12, %v573_v13 }
  0x9d   : > { %v1390_v17 = vpack.c.bf16 %v574_v16, %v572_v15 }
  0x9f   : > { %635 = vrot.lane.b32.xlu1 %v1390_v17, %s1263_s14  ;;  %v593_v18 = vsel %vm588_vm1, %v1390_v17, 0 }
  0xa0   : > { %602 = vmatpush.bf16.xpose.msra.mxu2 %v593_v18  ;;  %855 = vrot.lane.b32.xlu2 %v1390_v17, %s1264_s17 }
  0xa7   : > { %658 = vrot.lane.b32.xlu1 %v1390_v17, %s1262_s13  ;;  %1160 = vmatmul.msk.bf16.vlgmr.msra.gmra.mxu2 %vm588_vm1, %v583_v11 }
  0xa8   : > { %764 = vrot.lane.b32.xlu2 %v583_v11, %s1265_s25  ;;  %757 = vmatpush.bf16.msrb.mxu2 %v748_v20 }
  0xaf   : > { %853 = vrot.lane.b32.xlu1 %v583_v11, %s1264_s17  ;;  %s492_s17 = scalar_lea.vmem %s1502_s12, %s1174_s16 }
  0xf2   : > { %v657_v21 = vpop.permute.xlu2 %656 }
  0xfa   : > { %v856_v22 = vpop.permute.xlu2 %855 }
  0xfb   : > { %v861_v23 = vsel %vm588_vm1, %v856_v22, 0 }
  0xfc   : > { %870 = vmatpush.bf16.xpose.msra.mxu2 %v861_v23 }
 0x102   : > { %v765_v52 = vpop.permute.xlu2 %764 }
 0x111   : > { %v636_v24 = vpop.permute.xlu1 %635 }
 0x112   : > { %648 = vmatpush.bf16.msra.mxu3 %v636_v24 }
 0x119   : > { %v659_v25 = vpop.permute.xlu1 %658 }
 0x11a   : > { %v664_v26 = vsel %vm588_vm1, %v659_v25, 0 }
 0x11b   : > { %673 = vmatpush.bf16.xpose.msrb.mxu3 %v664_v26 }
 0x121   : > { %v854_v58 = vpop.permute.xlu1 %853 }
 0x12a   : > { %v604_v28 = vpop.f32.mrf.mxu2 }
 0x12b   : > { %v605_v29 = vadd.f32 %v1408_v27, %v604_v28 }
 0x12d   : > { %v609_v30 = vsel %vm608_vm3, %v605_v29, -inf }
 0x12e   : > { %610 = vmax.xlane.f32.xlu0 %v609_v30 }
 0x132   : > { %v606_v31 = vpop.f32.mrf.mxu2 }
 0x1a1   : > { %v611_v32 = vpop.xlane.xlu0 %610 }
 0x1a2   : > { %v612_v33 = vsub.f32 %v605_v29, %v611_v32 }
 0x1a4   : > { %v613_v34 = vmul.f32 1.442695, %v612_v33 }
 0x1a6   : > { %1218 = vpow2.f32 %v613_v34 }
 0x1ac   : > { %v1219_v35 = vpop.eup %1218 }
 0x1ad   : > { %v615_v36 = vsel %vm608_vm3, %v1219_v35, 0.0 }
 0x1ae   : > { %616 = vadd.xlane.f32.xlu0 %v615_v36 }
 0x1c2   : > { %766 = vrot.lane.b32.xlu0 %v1390_v17, %s1265_s25 }
 0x221   : > { %v617_v37 = vpop.xlane.xlu0 %616 }
 0x222   : > { %1220 = vrcp.f32 %v617_v37  ;;  %v629_v41 = vand.u32 2147483648, %v617_v37  ;;  %v627_v43 = vand.u32 2147483647, %v617_v37  ;;  %vm623_vm5 = vweird.f32 %v617_v37 }
 0x224   : > { %v630_v45 = vor.u32 1.1754944e-38, %v629_v41  ;;  %vm628_vm7 = vcmp.eq.f32.partialorder %v627_v43, 8.507059e+37 }
 0x228   : > { %v1221_v38 = vpop.eup %1220 }
 0x229   : > { %v619_v39 = vmul.f32 %v1221_v38, %v617_v37  ;;  %vm624_vm4 = vweird.f32 %v1221_v38 }
 0x22a   : > { %vm625_vm6 = vmor %vm623_vm5, %vm624_vm4 }
 0x22b   : > { %v620_v40 = vsub.f32 1.0, %v619_v39 }
 0x22d   : > { %v621_v42 = vmul.f32 %v1221_v38, %v620_v40 }
 0x22f   : > { %v622_v44 = vadd.f32 %v1221_v38, %v621_v42 }
 0x231   : > { %v626_v46 = vsel %vm625_vm6, %v1221_v38, %v622_v44 }
 0x232   : > { %v631_v47 = vsel %vm628_vm7, %v630_v45, %v626_v46 }
 0x233   : > { %v1414_v48 = vmul.f32 %v1219_v35, %v631_v47 }
 0x234   : > { %v767_v49 = vpop.permute.xlu0 %766 }
 0x235   : > { %v772_v50 = vsel %vm588_vm1, %v767_v49, 0  ;;  %v633_v51 = vpack.c.bf16 %v1414_v48, %v1414_v48 }
 0x237   : > { %1161 = vmatmul.msk.bf16.vlgmr.msra.gmra.mxu3 %vm608_vm3, %v633_v51 }
 0x238   : > { %781 = vmatpush.bf16.xpose.msra.mxu3 %v772_v50 }
 0x247   : > { %1162 = vmatmul.msk.bf16.vlgmr.msrb.gmra.mxu3 %vm588_vm1, %v657_v21 }
 0x257   : > { %1166 = vmatmul.msk.bf16.vlgmr.msra.gmra.mxu3 %vm588_vm1, %v765_v52 }
 0x2ba   : > { %v650_v53 = vpop.f32.mrf.mxu3 }
 0x2bb   : > { %v654_v54 = vpack.c.bf16 %v650_v53, %v650_v53 }
 0x2bd   : > { %1165 = vmatmul.msk.bf16.vlgmr.msrb.gmra.mxu2 %vm588_vm1, %v654_v54 }
 0x2c2   : > { %v652_v55 = vpop.f32.mrf.mxu3 }
 0x2ca   : > { %v675_v56 = vpop.f32.mrf.mxu3 }
 0x2cb   : > { %v676_v57 = vadd.f32 %v1408_v27, %v675_v56 }
 0x2cd   : > { %1169 = vmatmul.msk.bf16.vlgmr.msra.gmra.mxu2 %vm588_vm1, %v854_v58  ;;  %v679_v59 = vsel %vm608_vm3, %v676_v57, -inf }
 0x2ce   : > { %680 = vmax.xlane.f32.xlu1 %v679_v59 }
 0x2d2   : > { %v677_v60 = vpop.f32.mrf.mxu3 }
 0x2da   : > { %v783_v61 = vpop.f32.mrf.mxu3 }
 0x2db   : > { %v784_v62 = vadd.f32 %v1408_v27, %v783_v61 }
 0x2dd   : > { %v787_v63 = vsel %vm608_vm3, %v784_v62, -inf }
 0x2de   : > { %788 = vmax.xlane.f32.xlu0 %v787_v63 }
 0x2e2   : > { %v785_v0 = vpop.f32.mrf.mxu3 }
 0x2f2   : > { %901 = vrot.lane.b32.xlu0 %v1390_v17, %s1266_s28 }
 0x340   : > { %v1429_v1 = vpop.f32.mrf.mxu2 }
 0x341   : > { %v681_v2 = vpop.xlane.xlu1 %680 }
 0x342   : > { %v682_v5 = vsub.f32 %v676_v57, %v681_v2 }
 0x344   : > { %v683_v6 = vmul.f32 1.442695, %v682_v5 }
 0x346   : > { %1222 = vpow2.f32 %v683_v6 }
 0x348   : > { %v761_v3 = vpop.f32.mrf.mxu2 }
 0x34c   : > { %v1223_v13 = vpop.eup %1222 }
 0x34d   : > { %v685_v15 = vsel %vm608_vm3, %v1223_v13, 0.0 }
 0x350   : > { %v872_v7 = vpop.f32.mrf.mxu2 }
 0x351   : > { %v873_v8 = vadd.f32 %v1408_v27, %v872_v7  ;;  %v789_v9 = vpop.xlane.xlu0 %788  ;;  %v578_v7 = vld [vmem:[%s1497_s7 + $0x4] sm:$0xf] }
 0x352   : > { %v790_v10 = vsub.f32 %v784_v62, %v789_v9  ;;  %v729_v9 = vsel %vm727_vm2, %v578_v7, 0 }
 0x353   : > { %v876_v11 = vsel %vm608_vm3, %v873_v8, -inf  ;;  %738 = vmatpush.bf16.msrb.mxu1 %v729_v9 }
 0x354   : > { %877 = vmax.xlane.f32.xlu2 %v876_v11  ;;  %v791_v12 = vmul.f32 1.442695, %v790_v10  ;;  %v579_v11 = vld [vmem:[%s1497_s7 + $0x8] sm:$0xf] }
 0x356   : > { %1224 = vpow2.f32 %v791_v12  ;;  %v836_v12 = vsel %vm727_vm2, %v579_v11, 0 }
 0x357   : > { %845 = vmatpush.bf16.msra.mxu1 %v836_v12 }
 0x358   : > { %v874_v14 = vpop.f32.mrf.mxu2 }
 0x35c   : > { %686 = vadd.xlane.f32.xlu2 %v685_v15  ;;  %v1225_v16 = vpop.eup %1224 }
 0x35d   : > { %v793_v18 = vsel %vm608_vm3, %v1225_v16, 0.0 }
 0x364   : > { %794 = vadd.xlane.f32.xlu2 %v793_v18  ;;  %v902_v19 = vpop.permute.xlu0 %901 }
 0x365   : > { %914 = vmatpush.bf16.msrb.mxu3 %v902_v19 }
 0x37c   : > { %812 = vrot.lane.b32.xlu2 %v1390_v17, %s1267_s29 }
 0x3c7   : > { %v878_v20 = vpop.xlane.xlu2 %877 }
 0x3c8   : > { %v879_v21 = vsub.f32 %v873_v8, %v878_v20  ;;  %v580_v8 = vld [vmem:[%s1497_s7 + $0xc] sm:$0xf] }
 0x3c9   : > { %v925_v10 = vsel %vm727_vm2, %v580_v8, 0 }
 0x3ca   : > { %v880_v22 = vmul.f32 1.442695, %v879_v21 }
 0x3cc   : > { %1226 = vpow2.f32 %v880_v22 }
 0x3cf   : > { %v687_v25 = vpop.xlane.xlu2 %686 }
 0x3d0   : > { %1228 = vrcp.f32 %v687_v25  ;;  %v699_v37 = vand.u32 2147483648, %v687_v25  ;;  %vm693_vm9 = vweird.f32 %v687_v25  ;;  %v697_v38 = vand.u32 2147483647, %v687_v25 }
 0x3d2   : > { %v1227_v23 = vpop.eup %1226  ;;  %v700_v43 = vor.u32 1.1754944e-38, %v699_v37  ;;  %vm698_vm14 = vcmp.eq.f32.partialorder %v697_v38, 8.507059e+37  ;;  %v1269_v37 = vmov 32.0  }
 0x3d3   : > { %v882_v24 = vsel %vm608_vm3, %v1227_v23, 0.0 }
 0x3d4   : > { %883 = vadd.xlane.f32.xlu1 %v882_v24 }
 0x3d6   : > { %v1229_v27 = vpop.eup %1228 }
 0x3d7   : > { %v795_v26 = vpop.xlane.xlu2 %794  ;;  %v689_v29 = vmul.f32 %v1229_v27, %v687_v25  ;;  %vm694_vm8 = vweird.f32 %v1229_v27 }
 0x3d8   : > { %1230 = vrcp.f32 %v795_v26  ;;  %vm695_vm11 = vmor %vm693_vm9, %vm694_vm8  ;;  %v807_v39 = vand.u32 2147483648, %v795_v26  ;;  %vm801_vm12 = vweird.f32 %v795_v26  ;;  %v805_v41 = vand.u32 2147483647, %v795_v26 }
 0x3d9   : > { %v690_v31 = vsub.f32 1.0, %v689_v29 }
 0x3da   : > { %v808_v46 = vor.u32 1.1754944e-38, %v807_v39  ;;  %vm806_vm15 = vcmp.eq.f32.partialorder %v805_v41, 8.507059e+37 }
 0x3db   : > { %v691_v33 = vmul.f32 %v1229_v27, %v690_v31  ;;  %v947_v31 = vunpack.c.l.bf16 %v1374_v4 }
 0x3dd   : > { %v692_v36 = vadd.f32 %v1229_v27, %v691_v33 }
 0x3de   : > { %v1231_v28 = vpop.eup %1230 }
 0x3df   : > { %v797_v30 = vmul.f32 %v1231_v28, %v795_v26  ;;  %vm802_vm10 = vweird.f32 %v1231_v28  ;;  %v696_v40 = vsel %vm695_vm11, %v1229_v27, %v692_v36  ;;  %v813_v5 = vpop.permute.xlu2 %812 }
 0x3e0   : > { %vm803_vm13 = vmor %vm801_vm12, %vm802_vm10  ;;  %v701_v47 = vsel %vm698_vm14, %v700_v43, %v696_v40 }
 0x3e1   : > { %v798_v32 = vsub.f32 1.0, %v797_v30  ;;  %v702_v54 = vmul.f32 %v1223_v13, %v701_v47  ;;  %v1215_v30 = vld [vmem:[%s1498_s8] ss:$0 sm:$0xff] }
 0x3e3   : > { %v799_v34 = vmul.f32 %v1231_v28, %v798_v32  ;;  %v763_v59 = vadd.f32 %v702_v54, %v1414_v48  ;;  %v703_v48 = vpack.c.bf16 %v702_v54, %v702_v54 }
 0x3ed   : > { %704 = vrot.lane.b32.xlu1 %v1390_v17, %s1268_s30  ;;  %v800_v17 = vadd.f32 %v1231_v28, %v799_v34 }
 0x3ef   : > { %v804_v44 = vsel %vm803_vm13, %v1231_v28, %v800_v17 }
 0x3f0   : > { %v809_v50 = vsel %vm806_vm15, %v808_v46, %v804_v44 }
 0x3f1   : > { %v810_v55 = vmul.f32 %v1225_v16, %v809_v50 }
 0x3f3   : > { %v852_v62 = vadd.f32 %v810_v55, %v763_v59  ;;  %v811_v6 = vpack.c.bf16 %v810_v55, %v810_v55 }
 0x447   : > { %v884_v35 = vpop.xlane.xlu1 %883 }
 0x448   : > { %1232 = vrcp.f32 %v884_v35  ;;  %v896_v51 = vand.u32 2147483648, %v884_v35  ;;  %v894_v53 = vand.u32 2147483647, %v884_v35  ;;  %vm890_vm5 = vweird.f32 %v884_v35 }
 0x449   : > { %1234 = vrcp.f32 %v1269_v37 }
 0x44a   : > { %v897_v57 = vor.u32 1.1754944e-38, %v896_v51  ;;  %vm895_vm7 = vcmp.eq.f32.partialorder %v894_v53, 8.507059e+37 }
 0x44e   : > { %v1233_v42 = vpop.eup %1232 }
 0x44f   : > { %v886_v45 = vmul.f32 %v1233_v42, %v884_v35  ;;  %vm891_vm4 = vweird.f32 %v1233_v42  ;;  %v1235_v38 = vpop.eup %1234 }
 0x450   : > { %vm892_vm6 = vmor %vm890_vm5, %vm891_vm4  ;;  %v955_v17 = vmul.f32 32.0, %v1235_v38 }
 0x451   : > { %v887_v49 = vsub.f32 1.0, %v886_v45 }
 0x453   : > { %v888_v52 = vmul.f32 %v1233_v42, %v887_v49 }
 0x455   : > { %v889_v56 = vadd.f32 %v1233_v42, %v888_v52 }
 0x457   : > { %v893_v58 = vsel %vm892_vm6, %v1233_v42, %v889_v56  ;;  %v1216_v56 = vld [vmem:[%s1499_s9] ss:$0 sm:$0xff] }
 0x458   : > { %v898_v60 = vsel %vm895_vm7, %v897_v57, %v893_v58  ;;  %v1217_v58 = vld [vmem:[%s1500_s10] ss:$0 sm:$0xff] }
 0x459   : > { %v899_v61 = vmul.f32 %v1227_v23, %v898_v60 }
 0x45b   : > { %v900_v63 = vpack.c.bf16 %v899_v61, %v899_v61  ;;  %v941_v0 = vadd.f32 %v899_v61, %v852_v62 }
 0x45d   : > { %1170 = vmatmul.msk.bf16.vlgmr.msrb.gmra.mxu3 %vm608_vm3, %v900_v63  ;;  %v946_v2 = vmul.f32 0.25, %v941_v0 }
 0x45f   : > { %v705_v3 = vpop.permute.xlu1 %704  ;;  %991 = vst.msk [vmem:[%s492_s17] sm:$0xff] %vm608_vm3, %v946_v2 }
 0x460   : > { %717 = vmatpush.bf16.msrb.mxu0 %v705_v3 }
 0x463   : > { %1163 = vmatmul.msk.bf16.vlgmr.msrb.gmra.mxu0 %vm608_vm3, %v703_v48 }
 0x464   : > { %825 = vmatpush.bf16.msra.mxu0 %v813_v5 }
 0x468   : > { %934 = vmatpush.bf16.msrb.mxu0 %v925_v10 }
 0x473   : > { %1167 = vmatmul.msk.bf16.vlgmr.msra.gmra.mxu0 %vm608_vm3, %v811_v6 }
 0x4e0   : > { %v719_v13 = vpop.f32.mrf.mxu0  ;;  %v916_v14 = vpop.f32.mrf.mxu3 }
 0x4e1   : > { %v723_v15 = vpack.c.bf16 %v719_v13, %v719_v13  ;;  %v920_v16 = vpack.c.bf16 %v916_v14, %v916_v14 }
 0x4e3   : > { %1164 = vmatmul.msk.bf16.vlgmr.msrb.gmra.mxu1 %vm588_vm1, %v723_v15  ;;  %1171 = vmatmul.msk.bf16.vlgmr.msrb.gmra.mxu0 %vm588_vm1, %v920_v16 }
 0x4e8   : > { %v721_v18 = vpop.f32.mrf.mxu0  ;;  %v918_v19 = vpop.f32.mrf.mxu3 }
 0x4f0   : > { %v827_v20 = vpop.f32.mrf.mxu0 }
 0x4f1   : > { %v831_v21 = vpack.c.bf16 %v827_v20, %v827_v20 }
 0x4f3   : > { %1168 = vmatmul.msk.bf16.vlgmr.msra.gmra.mxu1 %vm588_vm1, %v831_v21  ;;  %vm959_vm1 = vweird.f32 %v1235_v38 }
 0x4f8   : > { %v829_v22 = vpop.f32.mrf.mxu0 }
 0x560   : > { %v740_v23 = vpop.f32.mrf.mxu1  ;;  %v936_v24 = vpop.f32.mrf.mxu0 }
 0x561   : > { %v760_v27 = vadd.f32 %v1429_v1, %v740_v23  ;;  %v956_v1 = vsub.f32 1.0, %v955_v17 }
 0x563   : > { %v957_v39 = vmul.f32 %v1235_v38, %v956_v1 }
 0x565   : > { %v958_v40 = vadd.f32 %v1235_v38, %v957_v39 }
 0x567   : > { %v960_v41 = vsel %vm959_vm1, %v1235_v38, %v958_v40 }
 0x568   : > { %v742_v25 = vpop.f32.mrf.mxu1  ;;  %v938_v26 = vpop.f32.mrf.mxu0 }
 0x570   : > { %v847_v28 = vpop.f32.mrf.mxu1 }
 0x571   : > { %v851_v29 = vadd.f32 %v847_v28, %v760_v27 }
 0x573   : > { %v940_v32 = vadd.f32 %v936_v24, %v851_v29 }
 0x575   : > { %v945_v33 = vadd.f32 %v1215_v30, %v940_v32 }
 0x577   : > { %v948_v34 = vadd.f32 %v947_v31, %v945_v33 }
 0x578   : > { %v849_v35 = vpop.f32.mrf.mxu1 }
 0x579   : > { %v951_v36 = vsel %vm517_vm0, %v948_v34, 0.0 }
 0x57a   : > { %952 = vadd.xlane.f32.xlu0 %v951_v36 }
 0x5ed   : > { %v953_v42 = vpop.xlane.xlu0 %952 }
 0x5ee   : > { %v961_v43 = vmul.f32 %v960_v41, %v953_v42 }
 0x5f0   : > { %v962_v44 = vsub.f32 %v948_v34, %v961_v43 }
 0x5f2   : > { %v963_v4 = vmul.f32 %v962_v44, %v962_v44 }
 0x5f4   : > { %v964_v45 = vsel %vm517_vm0, %v963_v4, 0.0  ;;  %vm989_vm0 = vcmask 257024  }
 0x5f5   : > { %965 = vadd.xlane.f32.xlu1 %v964_v45 }
 0x668   : > { %v966_v46 = vpop.xlane.xlu1 %965 }
 0x669   : > { %v967_v47 = vmul.f32 %v966_v46, %v960_v41 }
 0x66b   : > { %v968_v49 = vadd.f32 1e-05, %v967_v47 }
 0x66d   : > { %1236 = vrsqrt.f32 %v968_v49  ;;  %vm975_vm3 = vweird.f32 %v968_v49 }
 0x673   : > { %v1237_v50 = vpop.eup %1236 }
 0x674   : > { %v970_v51 = vmul.f32 %v1237_v50, %v968_v49  ;;  %vm976_vm2 = vweird.f32 %v1237_v50 }
 0x675   : > { %vm977_vm8 = vmor %vm975_vm3, %vm976_vm2 }
 0x676   : > { %v971_v52 = vmul.f32 %v1237_v50, %v970_v51 }
 0x678   : > { %v972_v53 = vmul.f32 0.5, %v971_v52 }
 0x67a   : > { %v973_v54 = vsub.f32 1.5, %v972_v53 }
 0x67c   : > { %v974_v55 = vmul.f32 %v1237_v50, %v973_v54 }
 0x67e   : > { %v978_v57 = vsel %vm977_vm8, %v1237_v50, %v974_v55 }
 0x67f   : > { %v979_v59 = vmul.f32 %v978_v57, %v962_v44 }
 0x681   : > { %v983_v60 = vmul.f32 %v1216_v56, %v979_v59 }
 0x683   : > { %v987_v61 = vadd.f32 %v1217_v58, %v983_v60 }
 0x685   : > { %v988_v62 = vpack.c.bf16 %v987_v61, %v987_v61 }
 0x687   : > { %990 = vst.msk [vmem:[%s485_s19] sm:$0xf] %vm989_vm0, %v988_v62 }
 0x688 PF: > { %s23_s23 = sadd.s32 1, %s1260_s23   ;;  %s1503_s21 = smov %s1256_s22 }
 0x689   : > { %p20_p5 = scmp.ge.s32.totalorder %s23_s23, 4   ;;  %s1504_s22 = smov %s1506_s24 }
 0x68b   :  { %22 = sbr.rel (!%p20_p5) target bundleno = 2 (0x2), region = 112 }

// kernel: htr_transformer_decoder_forward.7
= control target key start
LH: loop header
LB: loop body
LE: loop exit
PB: predicated region body
PF: predicated region fallthrough
CT: control target
= control target key end

     0   :  { %s1193_s13 = smov 0   ;;  %s1195_s14 = smov 0   ;;  %s1348_s0 = inlined_call_operand.vmem [shape: bf16[2,8,32], index: 0, kind: input, shape index: {}]   ;;  %s1349_s1 = inlined_call_operand.vmem [shape: bf16[32,32], index: 1, kind: input, shape index: {}]   ;;  %s1350_s2 = inlined_call_operand.vmem [shape: f32[1,32], index: 2, kind: input, shape index: {}]   ;;  %s1351_s3 = inlined_call_operand.vmem [shape: bf16[32,64], index: 3, kind: input, shape index: {}]   ;;  %s1352_s4 = inlined_call_operand.vmem [shape: f32[1,64], index: 4, kind: input, shape index: {}]   ;;  %s1353_s5 = inlined_call_operand.vmem [shape: bf16[32,32], index: 5, kind: input, shape index: {}]   ;;  %s1354_s6 = inlined_call_operand.vmem [shape: f32[1,32], index: 6, kind: input, shape index: {}]   ;;  %s1355_s7 = inlined_call_operand.vmem [shape: f32[1,32], index: 7, kind: input, shape index: {}]   ;;  %s1356_s8 = inlined_call_operand.vmem [shape: f32[1,32], index: 8, kind: input, shape index: {}]   ;;  %s1357_s9 = inlined_call_operand.vmem [shape: bf16[2,8,32], index: 9, kind: output, shape index: {0}]   ;;  %s1358_s10 = inlined_call_operand.vmem [shape: f32[2,8,8], index: 10, kind: output, shape index: {1}]  }
   0x1   :  { %s1197_s15 = smov 0  }
   0x2 LB: > { %s33_s16 = sadd.s32 1, %s1123_s14  ;;  %p1007_p0 = scmp.ge.s32.totalorder %s1127_s15, 1  ;;  %s1127_s15 = sphi %s1197_s15, %s21_s15   ;;  %s1123_s14 = sphi %s1195_s14, %s1360_s14   ;;  %s1119_s13 = sphi %s1193_s13, %s1359_s13  }
   0x3   : > { %p35_p1 = scmp.ge.s32.totalorder %s33_s16, 2  ;;  %p330_p2 = scmp.lt.s32.totalorder %s1127_s15, 3 }
   0x5   : > { %s1362_s16 = smov (%p35_p1, %s33_s16), 0  ;;  %p331_p3 = pnand %p1007_p0, %p330_p2 }
   0x6   : > { %p376_p4 = scmp.lt.s32.totalorder (!%p331_p3), %s1119_s13, 1  ;;  %s1129_s17 = smov (!%p331_p3), 96  }
   0x7   : > { %334 = sbr.rel (%p331_p3) target bundleno = 1665 (0x681), region = 56  ;;  %s1130_s18 = smov (!%p331_p3), 120  }
   0x8   : > { %s1131_s19 = smov (!%p331_p3), 104   ;;  %s1132_s20 = smov (!%p331_p3), 112  }
   0x9   : > { %s1134_s23 = smov (!%p331_p3), 72   ;;  %s1135_s24 = smov (!%p331_p3), 80  }
   0xa   : > { %s1136_s26 = smov (!%p331_p3), 88  }
   0xc   : > { %v1044_v0 = vld [vmem:[%s1349_s1 + $0x8] sm:$0xff]  ;;  %v1043_v2 = vld [vmem:[%s1349_s1] sm:$0xff]  ;;  %s1364_s13 = smov (!%p376_p4, %s1119_s13), 1  ;;  %vm416_vm0 = vcmask 261120   ;;  %vm480_vm1 = vcmask 64512   ;;  %vm531_vm2 = vcmask 1043456   ;;  %v466_v26 = vlaneseq }
   0xd   : > { %v1046_v1 = vld [vmem:[%s1351_s3 + $0x8] sm:$0xff]  ;;  %426 = vmatpush.bf16.msra.mxu0 %v1044_v0  ;;  %v1045_v3 = vld [vmem:[%s1351_s3] sm:$0xff]  ;;  %s1008_s25 = sshll.u32 %s1364_s13, 2  ;;  %v1133_v29 = vmov 0.0   ;;  %s1010_s27 = sshll.u32 %s1364_s13, 3 }
   0xe   : > { %459 = vmatpush.bf16.msra.mxu1 %v1046_v1  ;;  %s379_s28 = scalar_lea.vmem %s1348_s0, %s1008_s25  ;;  %v1080_v5 = vld [vmem:[%s1350_s2] ss:$0 sm:$0xff]  ;;  %v467_v27 = vshrl.u32 %v466_v26, 7  ;;  %v469_v28 = vand.u32 127, %v466_v26  ;;  %s393_s30 = scalar_lea.vmem %s1358_s10, %s1010_s27 }
   0xf   : > { %v1231_v4 = vld [vmem:[%s379_s28] sm:$0xf] }
  0x10   : > { %v1081_v6 = vld [vmem:[%s1352_s4] ss:$0 sm:$0xff]  ;;  %vm470_vm3 = vcmp.gt.s32.totalorder %v469_v28, %v467_v27 }
  0x11   : > { %427 = vmatpush.bf16.msra.mxu0 %v1043_v2  ;;  %v472_v17 = vld [vmem:[%s1353_s5] sm:$0xf]  ;;  %v1259_v30 = vsel %vm470_vm3, -1e+30, %v1133_v29 }
  0x12   : > { %460 = vmatpush.bf16.msra.mxu1 %v1045_v3  ;;  %v643_v18 = vsel %vm531_vm2, %v472_v17, 0 }
  0x14   : > { %1019 = vmatmul.msk.bf16.vlgmr.msra.gmra.mxu0 %vm416_vm0, %v1231_v4 }
  0x15   : > { %1028 = vmatmul.msk.bf16.vlgmr.msra.gmra.mxu1 %vm416_vm0, %v1231_v4 }
  0x91   : > { %v429_v7 = vpop.f32.mrf.mxu0 }
  0x92   : > { %v462_v8 = vpop.f32.mrf.mxu1  ;;  %v430_v9 = vadd.f32 %v1080_v5, %v429_v7 }
  0x93   : > { %v463_v10 = vadd.f32 %v1081_v6, %v462_v8 }
  0x94   : > { %v477_v11 = vmul.f32 0.35355338, %v430_v9 }
  0x95   : > { %v1243_v12 = vpack.c.bf16 %v463_v10, %v463_v10 }
  0x96   : > { %v478_v13 = vpack.c.bf16 %v477_v11, %v477_v11 }
  0x97   : > { %526 = vrot.lane.b32.xlu1 %v1243_v12, %s1129_s17  ;;  %v485_v14 = vsel %vm480_vm1, %v1243_v12, 0 }
  0x98   : > { %494 = vmatpush.bf16.xpose.msra.mxu2 %v485_v14  ;;  %550 = vrot.lane.b32.xlu2 %v478_v13, %s1130_s18 }
  0x99   : > { %v431_v15 = vpop.f32.mrf.mxu0 }
  0x9a   : > { %v464_v16 = vpop.f32.mrf.mxu1 }
  0x9f   : > { %552 = vrot.lane.b32.xlu1 %v1243_v12, %s1130_s18  ;;  %1029 = vmatmul.msk.bf16.vlgmr.msra.gmra.mxu2 %vm480_vm1, %v478_v13 }
  0xa0   : > { %752 = vrot.lane.b32.xlu2 %v1243_v12, %s1131_s19  ;;  %652 = vmatpush.bf16.msrb.mxu2 %v643_v18 }
  0xa7   : > { %750 = vrot.lane.b32.xlu1 %v478_v13, %s1131_s19 }
  0xa8   : > { %659 = vrot.lane.b32.xlu2 %v478_v13, %s1132_s20 }
  0xf2   : > { %v551_v19 = vpop.permute.xlu2 %550 }
  0xfa   : > { %v753_v20 = vpop.permute.xlu2 %752 }
  0xfb   : > { %v758_v21 = vsel %vm480_vm1, %v753_v20, 0 }
  0xfc   : > { %767 = vmatpush.bf16.xpose.msra.mxu2 %v758_v21 }
 0x102   : > { %v660_v55 = vpop.permute.xlu2 %659 }
 0x109   : > { %v527_v22 = vpop.permute.xlu1 %526 }
 0x10a   : > { %v533_v23 = vsel %vm531_vm2, %v527_v22, 0 }
 0x10b   : > { %542 = vmatpush.bf16.msra.mxu3 %v533_v23 }
 0x111   : > { %v553_v24 = vpop.permute.xlu1 %552 }
 0x112   : > { %v558_v25 = vsel %vm480_vm1, %v553_v24, 0 }
 0x113   : > { %567 = vmatpush.bf16.xpose.msrb.mxu3 %v558_v25 }
 0x119   : > { %v751_v61 = vpop.permute.xlu1 %750 }
 0x122   : > { %v496_v31 = vpop.f32.mrf.mxu2 }
 0x123   : > { %v497_v32 = vadd.f32 %v496_v31, %v1259_v30 }
 0x125   : > { %v500_v33 = vsel %vm480_vm1, %v497_v32, -inf }
 0x126   : > { %501 = vmax.xlane.f32.xlu0 %v500_v33 }
 0x12a   : > { %v498_v34 = vpop.f32.mrf.mxu2 }
 0x199   : > { %v502_v35 = vpop.xlane.xlu0 %501 }
 0x19a   : > { %v503_v36 = vsub.f32 %v497_v32, %v502_v35 }
 0x19c   : > { %v504_v37 = vmul.f32 1.442695, %v503_v36 }
 0x19e   : > { %1085 = vpow2.f32 %v504_v37 }
 0x1a4   : > { %v1086_v38 = vpop.eup %1085 }
 0x1a5   : > { %v506_v39 = vsel %vm480_vm1, %v1086_v38, 0.0 }
 0x1a6   : > { %507 = vadd.xlane.f32.xlu0 %v506_v39 }
 0x1ba   : > { %661 = vrot.lane.b32.xlu0 %v1243_v12, %s1132_s20 }
 0x219   : > { %v508_v40 = vpop.xlane.xlu0 %507 }
 0x21a   : > { %1087 = vrcp.f32 %v508_v40  ;;  %v520_v44 = vand.u32 2147483648, %v508_v40  ;;  %v518_v46 = vand.u32 2147483647, %v508_v40  ;;  %vm514_vm5 = vweird.f32 %v508_v40 }
 0x21c   : > { %v521_v48 = vor.u32 1.1754944e-38, %v520_v44  ;;  %vm519_vm7 = vcmp.eq.f32.partialorder %v518_v46, 8.507059e+37 }
 0x220   : > { %v1088_v41 = vpop.eup %1087 }
 0x221   : > { %v510_v42 = vmul.f32 %v1088_v41, %v508_v40  ;;  %vm515_vm4 = vweird.f32 %v1088_v41 }
 0x222   : > { %vm516_vm6 = vmor %vm514_vm5, %vm515_vm4 }
 0x223   : > { %v511_v43 = vsub.f32 1.0, %v510_v42 }
 0x225   : > { %v512_v45 = vmul.f32 %v1088_v41, %v511_v43 }
 0x227   : > { %v513_v47 = vadd.f32 %v1088_v41, %v512_v45 }
 0x229   : > { %v517_v49 = vsel %vm516_vm6, %v1088_v41, %v513_v47 }
 0x22a   : > { %v522_v50 = vsel %vm519_vm7, %v521_v48, %v517_v49 }
 0x22b   : > { %v1266_v51 = vmul.f32 %v1086_v38, %v522_v50 }
 0x22c   : > { %v662_v52 = vpop.permute.xlu0 %661 }
 0x22d   : > { %v667_v53 = vsel %vm480_vm1, %v662_v52, 0  ;;  %v524_v54 = vpack.c.bf16 %v1266_v51, %v1266_v51 }
 0x22f   : > { %1030 = vmatmul.msk.bf16.vlgmr.msra.gmra.mxu3 %vm480_vm1, %v524_v54 }
 0x230   : > { %676 = vmatpush.bf16.xpose.msra.mxu3 %v667_v53 }
 0x23f   : > { %1031 = vmatmul.msk.bf16.vlgmr.msrb.gmra.mxu3 %vm480_vm1, %v551_v19 }
 0x24f   : > { %1035 = vmatmul.msk.bf16.vlgmr.msra.gmra.mxu3 %vm480_vm1, %v660_v55 }
 0x2b2   : > { %v544_v56 = vpop.f32.mrf.mxu3 }
 0x2b3   : > { %v548_v57 = vpack.c.bf16 %v544_v56, %v544_v56 }
 0x2b5   : > { %1034 = vmatmul.msk.bf16.vlgmr.msrb.gmra.mxu2 %vm480_vm1, %v548_v57 }
 0x2ba   : > { %v546_v58 = vpop.f32.mrf.mxu3 }
 0x2c2   : > { %v569_v59 = vpop.f32.mrf.mxu3 }
 0x2c3   : > { %v570_v60 = vadd.f32 %v569_v59, %v1259_v30 }
 0x2c5   : > { %1038 = vmatmul.msk.bf16.vlgmr.msra.gmra.mxu2 %vm480_vm1, %v751_v61  ;;  %v573_v62 = vsel %vm480_vm1, %v570_v60, -inf }
 0x2c6   : > { %574 = vmax.xlane.f32.xlu1 %v573_v62 }
 0x2ca   : > { %v571_v63 = vpop.f32.mrf.mxu3 }
 0x2d2   : > { %v678_v0 = vpop.f32.mrf.mxu3 }
 0x2d3   : > { %v679_v1 = vadd.f32 %v678_v0, %v1259_v30 }
 0x2d5   : > { %v682_v2 = vsel %vm480_vm1, %v679_v1, -inf }
 0x2d6   : > { %683 = vmax.xlane.f32.xlu0 %v682_v2 }
 0x2da   : > { %v680_v3 = vpop.f32.mrf.mxu3 }
 0x2ea   : > { %798 = vrot.lane.b32.xlu0 %v1243_v12, %s1134_s23 }
 0x338   : > { %v1281_v5 = vpop.f32.mrf.mxu2 }
 0x339   : > { %v575_v6 = vpop.xlane.xlu1 %574 }
 0x33a   : > { %v576_v8 = vsub.f32 %v570_v60, %v575_v6 }
 0x33c   : > { %v577_v9 = vmul.f32 1.442695, %v576_v8 }
 0x33e   : > { %1089 = vpow2.f32 %v577_v9 }
 0x340   : > { %v656_v7 = vpop.f32.mrf.mxu2 }
 0x344   : > { %v1285_v17 = vpop.eup %1089 }
 0x345   : > { %v579_v19 = vsel %vm480_vm1, %v1285_v17, 0.0 }
 0x348   : > { %v769_v10 = vpop.f32.mrf.mxu2 }
 0x349   : > { %v770_v11 = vadd.f32 %v769_v10, %v1259_v30  ;;  %v684_v13 = vpop.xlane.xlu0 %683 }
 0x34a   : > { %v685_v14 = vsub.f32 %v679_v1, %v684_v13 }
 0x34b   : > { %v773_v15 = vsel %vm480_vm1, %v770_v11, -inf }
 0x34c   : > { %774 = vmax.xlane.f32.xlu2 %v773_v15  ;;  %v686_v16 = vmul.f32 1.442695, %v685_v14  ;;  %v475_v14 = vld [vmem:[%s1353_s5 + $0xc] sm:$0xf] }
 0x34d   : > { %v824_v15 = vsel %vm531_vm2, %v475_v14, 0 }
 0x34e   : > { %1091 = vpow2.f32 %v686_v16  ;;  %v473_v16 = vld [vmem:[%s1353_s5 + $0x4] sm:$0xf] }
 0x350   : > { %v771_v18 = vpop.f32.mrf.mxu2 }
 0x351   : > { %v474_v18 = vld [vmem:[%s1353_s5 + $0x8] sm:$0xf] }
 0x354   : > { %580 = vadd.xlane.f32.xlu2 %v579_v19  ;;  %v1092_v20 = vpop.eup %1091  ;;  %v733_v19 = vsel %vm531_vm2, %v474_v18, 0 }
 0x355   : > { %v688_v21 = vsel %vm480_vm1, %v1092_v20, 0.0 }
 0x35c   : > { %689 = vadd.xlane.f32.xlu2 %v688_v21  ;;  %v799_v22 = vpop.permute.xlu0 %798 }
 0x35d   : > { %v804_v23 = vsel %vm531_vm2, %v799_v22, 0 }
 0x35e   : > { %813 = vmatpush.bf16.msrb.mxu3 %v804_v23 }
 0x374   : > { %707 = vrot.lane.b32.xlu2 %v1243_v12, %s1135_s24 }
 0x3bf   : > { %v775_v24 = vpop.xlane.xlu2 %774 }
 0x3c0   : > { %v776_v25 = vsub.f32 %v770_v11, %v775_v24 }
 0x3c2   : > { %v777_v26 = vmul.f32 1.442695, %v776_v25 }
 0x3c4   : > { %1093 = vpow2.f32 %v777_v26 }
 0x3c7   : > { %v581_v29 = vpop.xlane.xlu2 %580 }
 0x3c8   : > { %1095 = vrcp.f32 %v581_v29  ;;  %v593_v41 = vand.u32 2147483648, %v581_v29  ;;  %vm587_vm9 = vweird.f32 %v581_v29  ;;  %v591_v42 = vand.u32 2147483647, %v581_v29 }
 0x3ca   : > { %v1094_v27 = vpop.eup %1093  ;;  %v594_v47 = vor.u32 1.1754944e-38, %v593_v41  ;;  %vm592_vm14 = vcmp.eq.f32.partialorder %v591_v42, 8.507059e+37 }
 0x3cb   : > { %v779_v28 = vsel %vm480_vm1, %v1094_v27, 0.0 }
 0x3cc   : > { %780 = vadd.xlane.f32.xlu1 %v779_v28 }
 0x3ce   : > { %v1096_v31 = vpop.eup %1095 }
 0x3cf   : > { %v690_v30 = vpop.xlane.xlu2 %689  ;;  %v583_v33 = vmul.f32 %v1096_v31, %v581_v29  ;;  %vm588_vm8 = vweird.f32 %v1096_v31 }
 0x3d0   : > { %1097 = vrcp.f32 %v690_v30  ;;  %vm589_vm11 = vmor %vm587_vm9, %vm588_vm8  ;;  %v702_v43 = vand.u32 2147483648, %v690_v30  ;;  %vm696_vm12 = vweird.f32 %v690_v30  ;;  %v700_v45 = vand.u32 2147483647, %v690_v30 }
 0x3d1   : > { %v584_v35 = vsub.f32 1.0, %v583_v33 }
 0x3d2   : > { %v703_v50 = vor.u32 1.1754944e-38, %v702_v43  ;;  %vm701_vm15 = vcmp.eq.f32.partialorder %v700_v45, 8.507059e+37 }
 0x3d3   : > { %v585_v37 = vmul.f32 %v1096_v31, %v584_v35 }
 0x3d5   : > { %v586_v40 = vadd.f32 %v1096_v31, %v585_v37  ;;  %v846_v37 = vunpack.c.l.bf16 %v1231_v4 }
 0x3d6   : > { %v1098_v32 = vpop.eup %1097 }
 0x3d7   : > { %v692_v34 = vmul.f32 %v1098_v32, %v690_v30  ;;  %vm697_vm10 = vweird.f32 %v1098_v32  ;;  %v590_v44 = vsel %vm589_vm11, %v1096_v31, %v586_v40  ;;  %v708_v8 = vpop.permute.xlu2 %707 }
 0x3d8   : > { %vm698_vm13 = vmor %vm696_vm12, %vm697_vm10  ;;  %v595_v52 = vsel %vm592_vm14, %v594_v47, %v590_v44 }
 0x3d9   : > { %v693_v36 = vsub.f32 1.0, %v692_v34  ;;  %v596_v58 = vmul.f32 %v1285_v17, %v595_v52  ;;  %v624_v17 = vsel %vm531_vm2, %v473_v16, 0 }
 0x3da   : > { %633 = vmatpush.bf16.msrb.mxu1 %v624_v17 }
 0x3db   : > { %v694_v38 = vmul.f32 %v1098_v32, %v693_v36  ;;  %v658_v63 = vadd.f32 %v596_v58, %v1266_v51  ;;  %v713_v51 = vsel %vm531_vm2, %v708_v8, 0  ;;  %v597_v11 = vpack.c.bf16 %v596_v58, %v596_v58  ;;  %v1082_v36 = vld [vmem:[%s1354_s6] ss:$0 sm:$0xff] }
 0x3de   : > { %742 = vmatpush.bf16.msra.mxu1 %v733_v19 }
 0x3e5   : > { %598 = vrot.lane.b32.xlu1 %v1243_v12, %s1136_s26  ;;  %v695_v12 = vadd.f32 %v1098_v32, %v694_v38 }
 0x3e7   : > { %v699_v48 = vsel %vm698_vm13, %v1098_v32, %v695_v12  ;;  %v1137_v12 = vmov 32.0  }
 0x3e8   : > { %v704_v54 = vsel %vm701_vm15, %v703_v50, %v699_v48 }
 0x3e9   : > { %v705_v59 = vmul.f32 %v1092_v20, %v704_v54 }
 0x3eb   : > { %v749_v2 = vadd.f32 %v705_v59, %v658_v63  ;;  %v706_v13 = vpack.c.bf16 %v705_v59, %v705_v59 }
 0x43f   : > { %v781_v39 = vpop.xlane.xlu1 %780 }
 0x440   : > { %1099 = vrcp.f32 %v781_v39  ;;  %v793_v55 = vand.u32 2147483648, %v781_v39  ;;  %v791_v57 = vand.u32 2147483647, %v781_v39  ;;  %vm787_vm4 = vweird.f32 %v781_v39 }
 0x441   : > { %1101 = vrcp.f32 %v1137_v12 }
 0x442   : > { %v794_v61 = vor.u32 1.1754944e-38, %v793_v55  ;;  %vm792_vm6 = vcmp.eq.f32.partialorder %v791_v57, 8.507059e+37 }
 0x446   : > { %v1100_v46 = vpop.eup %1099 }
 0x447   : > { %v783_v49 = vmul.f32 %v1100_v46, %v781_v39  ;;  %vm788_vm3 = vweird.f32 %v1100_v46  ;;  %v1102_v43 = vpop.eup %1101 }
 0x448   : > { %vm789_vm5 = vmor %vm787_vm4, %vm788_vm3  ;;  %v854_v44 = vmul.f32 32.0, %v1102_v43 }
 0x449   : > { %v784_v53 = vsub.f32 1.0, %v783_v49 }
 0x44b   : > { %v785_v56 = vmul.f32 %v1100_v46, %v784_v53 }
 0x44d   : > { %v786_v60 = vadd.f32 %v1100_v46, %v785_v56 }
 0x44f   : > { %v790_v62 = vsel %vm789_vm5, %v1100_v46, %v786_v60 }
 0x450   : > { %v795_v0 = vsel %vm792_vm6, %v794_v61, %v790_v62  ;;  %v1083_v62 = vld [vmem:[%s1355_s7] ss:$0 sm:$0xff] }
 0x451   : > { %v796_v1 = vmul.f32 %v1094_v27, %v795_v0  ;;  %v1084_v0 = vld [vmem:[%s1356_s8] ss:$0 sm:$0xff] }
 0x453   : > { %v797_v3 = vpack.c.bf16 %v796_v1, %v796_v1  ;;  %v840_v6 = vadd.f32 %v796_v1, %v749_v2 }
 0x455   : > { %1039 = vmatmul.msk.bf16.vlgmr.msrb.gmra.mxu3 %vm480_vm1, %v797_v3  ;;  %v845_v7 = vmul.f32 0.25, %v840_v6 }
 0x457   : > { %v599_v9 = vpop.permute.xlu1 %598  ;;  %890 = vst.msk [vmem:[%s393_s30] sm:$0xff] %vm480_vm1, %v845_v7  ;;  %s386_s30 = scalar_lea.vmem %s1357_s9, %s1008_s25 }
 0x458   : > { %v604_v10 = vsel %vm531_vm2, %v599_v9, 0 }
 0x459   : > { %613 = vmatpush.bf16.msrb.mxu0 %v604_v10 }
 0x45c   : > { %1032 = vmatmul.msk.bf16.vlgmr.msrb.gmra.mxu0 %vm480_vm1, %v597_v11 }
 0x45d   : > { %722 = vmatpush.bf16.msra.mxu0 %v713_v51 }
 0x461   : > { %833 = vmatpush.bf16.msrb.mxu0 %v824_v15 }
 0x46c   : > { %1036 = vmatmul.msk.bf16.vlgmr.msra.gmra.mxu0 %vm480_vm1, %v706_v13 }
 0x4d8   : > { %v815_v20 = vpop.f32.mrf.mxu3 }
 0x4d9   : > { %v819_v21 = vpack.c.bf16 %v815_v20, %v815_v20  ;;  %v615_v22 = vpop.f32.mrf.mxu0 }
 0x4da   : > { %v619_v23 = vpack.c.bf16 %v615_v22, %v615_v22 }
 0x4db   : > { %1040 = vmatmul.msk.bf16.vlgmr.msrb.gmra.mxu0 %vm480_vm1, %v819_v21 }
 0x4dc   : > { %1033 = vmatmul.msk.bf16.vlgmr.msrb.gmra.mxu1 %vm480_vm1, %v619_v23 }
 0x4e0   : > { %v817_v24 = vpop.f32.mrf.mxu3 }
 0x4e1   : > { %v617_v25 = vpop.f32.mrf.mxu0 }
 0x4e9   : > { %v724_v26 = vpop.f32.mrf.mxu0 }
 0x4ea   : > { %v728_v27 = vpack.c.bf16 %v724_v26, %v724_v26 }
 0x4ec   : > { %1037 = vmatmul.msk.bf16.vlgmr.msra.gmra.mxu1 %vm480_vm1, %v728_v27  ;;  %vm858_vm1 = vweird.f32 %v1102_v43 }
 0x4f1   : > { %v726_v28 = vpop.f32.mrf.mxu0 }
 0x558   : > { %v835_v29 = vpop.f32.mrf.mxu0 }
 0x559   : > { %v635_v30 = vpop.f32.mrf.mxu1 }
 0x55a   : > { %v655_v33 = vadd.f32 %v1281_v5, %v635_v30  ;;  %v855_v5 = vsub.f32 1.0, %v854_v44 }
 0x55c   : > { %v856_v45 = vmul.f32 %v1102_v43, %v855_v5 }
 0x55e   : > { %v857_v46 = vadd.f32 %v1102_v43, %v856_v45 }
 0x560   : > { %v837_v31 = vpop.f32.mrf.mxu0  ;;  %v859_v47 = vsel %vm858_vm1, %v1102_v43, %v857_v46 }
 0x561   : > { %v637_v32 = vpop.f32.mrf.mxu1 }
 0x569   : > { %v744_v34 = vpop.f32.mrf.mxu1 }
 0x56a   : > { %v748_v35 = vadd.f32 %v744_v34, %v655_v33 }
 0x56c   : > { %v839_v38 = vadd.f32 %v835_v29, %v748_v35 }
 0x56e   : > { %v844_v39 = vadd.f32 %v1082_v36, %v839_v38 }
 0x570   : > { %v847_v40 = vadd.f32 %v846_v37, %v844_v39 }
 0x571   : > { %v746_v41 = vpop.f32.mrf.mxu1 }
 0x572   : > { %v850_v42 = vsel %vm416_vm0, %v847_v40, 0.0 }
 0x573   : > { %851 = vadd.xlane.f32.xlu0 %v850_v42 }
 0x5e6   : > { %v852_v48 = vpop.xlane.xlu0 %851 }
 0x5e7   : > { %v860_v49 = vmul.f32 %v859_v47, %v852_v48 }
 0x5e9   : > { %v861_v50 = vsub.f32 %v847_v40, %v860_v49 }
 0x5eb   : > { %v862_v4 = vmul.f32 %v861_v50, %v861_v50 }
 0x5ed   : > { %v863_v52 = vsel %vm416_vm0, %v862_v4, 0.0  ;;  %vm888_vm0 = vcmask 257024  }
 0x5ee   : > { %864 = vadd.xlane.f32.xlu1 %v863_v52 }
 0x661   : > { %v865_v53 = vpop.xlane.xlu1 %864 }
 0x662   : > { %v866_v54 = vmul.f32 %v865_v53, %v859_v47 }
 0x664   : > { %v867_v55 = vadd.f32 1e-05, %v866_v54 }
 0x666   : > { %1103 = vrsqrt.f32 %v867_v55  ;;  %vm874_vm7 = vweird.f32 %v867_v55 }
 0x66c   : > { %v1104_v56 = vpop.eup %1103 }
 0x66d   : > { %v869_v57 = vmul.f32 %v1104_v56, %v867_v55  ;;  %vm875_vm2 = vweird.f32 %v1104_v56 }
 0x66e   : > { %vm876_vm8 = vmor %vm874_vm7, %vm875_vm2 }
 0x66f   : > { %v870_v58 = vmul.f32 %v1104_v56, %v869_v57 }
 0x671   : > { %v871_v59 = vmul.f32 0.5, %v870_v58 }
 0x673   : > { %v872_v60 = vsub.f32 1.5, %v871_v59 }
 0x675   : > { %v873_v61 = vmul.f32 %v1104_v56, %v872_v60 }
 0x677   : > { %v877_v63 = vsel %vm876_vm8, %v1104_v56, %v873_v61 }
 0x678   : > { %v878_v1 = vmul.f32 %v877_v63, %v861_v50 }
 0x67a   : > { %v882_v2 = vmul.f32 %v1083_v62, %v878_v1 }
 0x67c   : > { %v886_v3 = vadd.f32 %v1084_v0, %v882_v2 }
 0x67e   : > { %v887_v6 = vpack.c.bf16 %v886_v3, %v886_v3 }
 0x680   : > { %889 = vst.msk [vmem:[%s386_s30] sm:$0xf] %vm888_vm0, %v887_v6 }
 0x681 PF: > { %s21_s15 = sadd.s32 1, %s1127_s15   ;;  %s1359_s13 = smov %s1123_s14 }
 0x682   : > { %p18_p5 = scmp.ge.s32.totalorder %s21_s15, 4   ;;  %s1360_s14 = smov %s1362_s16 }
 0x684   :  { %20 = sbr.rel (!%p18_p5) target bundleno = 2 (0x2), region = 98 }

// kernel: htr_transformer_decoder_forward.9
= control target key start
LH: loop header
LB: loop body
LE: loop exit
PB: predicated region body
PF: predicated region fallthrough
CT: control target
= control target key end

     0   :  { %vm148_vm0 = vcmask 261120   ;;  %vm1115_vm6 = vcmask 257024   ;;  %s2084_s1 = inlined_call_operand.vmem [shape: bf16[32,1024], index: 1, kind: input, shape index: {}]   ;;  %s2085_s0 = inlined_call_operand.vmem [shape: bf16[16,32], index: 0, kind: input, shape index: {}]   ;;  %s2086_s3 = inlined_call_operand.vmem [shape: bf16[1024,32], index: 3, kind: input, shape index: {}]   ;;  %s2087_s2 = inlined_call_operand.vmem [shape: f32[1,1024], index: 2, kind: input, shape index: {}]   ;;  %s2088_s4 = inlined_call_operand.vmem [shape: f32[1,32], index: 4, kind: input, shape index: {}]   ;;  %s2089_s5 = inlined_call_operand.vmem [shape: f32[1,32], index: 5, kind: input, shape index: {}]   ;;  %s2090_s6 = inlined_call_operand.vmem [shape: f32[1,32], index: 6, kind: input, shape index: {}]   ;;  %s2091_s7 = inlined_call_operand.vmem [shape: bf16[16,32], index: 7, kind: output, shape index: {}]  }
   0x1   :  { %v1160_v0 = vld [vmem:[%s2084_s1 + $0x40] sm:$0xf]  ;;  %v1463_v2 = vld [vmem:[%s2084_s1 + $0x44] sm:$0xf]  ;;  %v1168_v5 = vld [vmem:[%s2084_s1 + $0x48] sm:$0xf] }
   0x2   :  { %v1467_v1 = vld [vmem:[%s2084_s1 + $0x5c] sm:$0xf0]  ;;  %v1162_v4 = vld [vmem:[%s2084_s1 + $0x60] sm:$0xf0]  ;;  %v1468_v6 = vld [vmem:[%s2084_s1 + $0x64] sm:$0xf0] }
   0x3   :  { %v1161_v3 = vor.u32 %v1467_v1, %v1160_v0  ;;  %v1165_v7 = vor.u32 %v1463_v2, %v1162_v4  ;;  %v1169_v8 = vor.u32 %v1468_v6, %v1168_v5  ;;  %v1464_v9 = vld [vmem:[%s2084_s1 + $0x4c] sm:$0xf]  ;;  %v1128_v11 = vld [vmem:[%s2084_s1] sm:$0xf]  ;;  %v1455_v14 = vld [vmem:[%s2084_s1 + $0x4] sm:$0xf] }
   0x4   :  { %v1170_v10 = vld [vmem:[%s2084_s1 + $0x68] sm:$0xf0]  ;;  %v1459_v13 = vld [vmem:[%s2084_s1 + $0x1c] sm:$0xf0]  ;;  %v1130_v15 = vld [vmem:[%s2084_s1 + $0x20] sm:$0xf0] }
   0x5   :  { %158 = vmatpush.bf16.msra.mxu0 %v1161_v3  ;;  %v1173_v12 = vor.u32 %v1464_v9, %v1170_v10  ;;  %172 = vmatpush.bf16.msra.mxu1 %v1165_v7  ;;  %v1129_v16 = vor.u32 %v1459_v13, %v1128_v11  ;;  %v1133_v17 = vor.u32 %v1455_v14, %v1130_v15  ;;  %v1136_v18 = vld [vmem:[%s2084_s1 + $0x8] sm:$0xf]  ;;  %v1456_v20 = vld [vmem:[%s2084_s1 + $0xc] sm:$0xf]  ;;  %v1454_v23 = vld [vmem:[%s2085_s0] sm:$0xff] }
   0x6   :  { %186 = vmatpush.bf16.msra.mxu2 %v1169_v8  ;;  %v1460_v19 = vld [vmem:[%s2084_s1 + $0x24] sm:$0xf0]  ;;  %v1138_v22 = vld [vmem:[%s2084_s1 + $0x28] sm:$0xf0]  ;;  %v1184_v24 = vld [vmem:[%s2084_s1 + $0x58] sm:$0xf] }
   0x7   :  { %200 = vmatpush.bf16.msra.mxu3 %v1173_v12  ;;  %v1137_v21 = vor.u32 %v1460_v19, %v1136_v18  ;;  %v1141_v25 = vor.u32 %v1456_v20, %v1138_v22  ;;  %v1470_v26 = vld [vmem:[%s2084_s1 + $0x74] sm:$0xf0]  ;;  %v1466_v27 = vld [vmem:[%s2084_s1 + $0x5c] sm:$0xf]  ;;  %v1176_v31 = vld [vmem:[%s2084_s1 + $0x50] sm:$0xf] }
   0x8   :  { %v1186_v28 = vld [vmem:[%s2084_s1 + $0x78] sm:$0xf0]  ;;  %v1185_v29 = vor.u32 %v1470_v26, %v1184_v24  ;;  %v1469_v32 = vld [vmem:[%s2084_s1 + $0x6c] sm:$0xf0]  ;;  %v1152_v33 = vld [vmem:[%s2084_s1 + $0x18] sm:$0xf] }
   0x9   :  { %159 = vmatpush.bf16.msra.mxu0 %v1129_v16  ;;  %v1189_v30 = vor.u32 %v1466_v27, %v1186_v28  ;;  %173 = vmatpush.bf16.msra.mxu1 %v1133_v17  ;;  %v1177_v34 = vor.u32 %v1469_v32, %v1176_v31  ;;  %v1462_v35 = vld [vmem:[%s2084_s1 + $0x34] sm:$0xf0]  ;;  %v1465_v36 = vld [vmem:[%s2084_s1 + $0x54] sm:$0xf]  ;;  %v1458_v40 = vld [vmem:[%s2084_s1 + $0x1c] sm:$0xf] }
   0xa   :  { %187 = vmatpush.bf16.msra.mxu2 %v1137_v21  ;;  %v1178_v37 = vld [vmem:[%s2084_s1 + $0x70] sm:$0xf0]  ;;  %v1153_v38 = vor.u32 %v1462_v35, %v1152_v33  ;;  %v1154_v41 = vld [vmem:[%s2084_s1 + $0x38] sm:$0xf0]  ;;  %v1144_v42 = vld [vmem:[%s2084_s1 + $0x10] sm:$0xf] }
   0xb   :  { %201 = vmatpush.bf16.msra.mxu3 %v1141_v25  ;;  %v1181_v39 = vor.u32 %v1465_v36, %v1178_v37  ;;  %v1157_v43 = vor.u32 %v1458_v40, %v1154_v41  ;;  %v1461_v44 = vld [vmem:[%s2084_s1 + $0x2c] sm:$0xf0]  ;;  %v1457_v45 = vld [vmem:[%s2084_s1 + $0x14] sm:$0xf]  ;;  %v1494_v48 = vld [vmem:[%s2086_s3 + $0xb8] sm:$0xff] }
   0xc   :  { %1190 = vmatmul.msk.bf16.vlgmr.msra.gmra.mxu0 %vm148_vm0, %v1454_v23  ;;  %v1146_v46 = vld [vmem:[%s2084_s1 + $0x30] sm:$0xf0]  ;;  %1191 = vmatmul.msk.bf16.vlgmr.msra.gmra.mxu1 %vm148_vm0, %v1454_v23  ;;  %v1145_v47 = vor.u32 %v1461_v44, %v1144_v42  ;;  %v1502_v49 = vld [vmem:[%s2086_s3 + $0xf8] sm:$0xff]  ;;  %v1476_v55 = vld [vmem:[%s2086_s3 + $0x28] sm:$0xff] }
   0xd   :  { %1192 = vmatmul.msk.bf16.vlgmr.msra.gmra.mxu2 %vm148_vm0, %v1454_v23  ;;  %214 = vmatpush.bf16.msrb.mxu0 %v1177_v34  ;;  %v1149_v50 = vor.u32 %v1457_v45, %v1146_v46  ;;  %v1478_v51 = vld [vmem:[%s2086_s3 + $0x38] sm:$0xff]  ;;  %v1477_v53 = vld [vmem:[%s2086_s3 + $0x30] sm:$0xff]  ;;  %v1484_v56 = vld [vmem:[%s2086_s3 + $0x68] sm:$0xff] }
   0xe   :  { %242 = vmatpush.bf16.msrb.mxu2 %v1185_v29  ;;  %1193 = vmatmul.msk.bf16.vlgmr.msra.gmra.mxu3 %vm148_vm0, %v1454_v23  ;;  %v1486_v52 = vld [vmem:[%s2086_s3 + $0x78] sm:$0xff]  ;;  %v1485_v54 = vld [vmem:[%s2086_s3 + $0x70] sm:$0xff]  ;;  %v1475_v59 = vld [vmem:[%s2086_s3 + $0x20] sm:$0xff] }
   0xf   :  { %256 = vmatpush.bf16.msrb.mxu3 %v1189_v30  ;;  %228 = vmatpush.bf16.msrb.mxu1 %v1181_v39  ;;  %v1493_v57 = vld [vmem:[%s2086_s3 + $0xb0] sm:$0xff]  ;;  %v1483_v60 = vld [vmem:[%s2086_s3 + $0x60] sm:$0xff]  ;;  %v1492_v61 = vld [vmem:[%s2086_s3 + $0xa8] sm:$0xff] }
  0x10   :  { %v1501_v58 = vld [vmem:[%s2086_s3 + $0xf0] sm:$0xff]  ;;  %v1500_v62 = vld [vmem:[%s2086_s3 + $0xe8] sm:$0xff]  ;;  %v1474_v63 = vld [vmem:[%s2086_s3 + $0x18] sm:$0xff] }
  0x11   :  { %215 = vmatpush.bf16.msrb.mxu0 %v1145_v47  ;;  %v1482_v0 = vld [vmem:[%s2086_s3 + $0x58] sm:$0xff]  ;;  %v1491_v1 = vld [vmem:[%s2086_s3 + $0xa0] sm:$0xff]  ;;  %v1473_v3 = vld [vmem:[%s2086_s3 + $0x10] sm:$0xff] }
  0x12   :  { %243 = vmatpush.bf16.msrb.mxu2 %v1153_v38  ;;  %v1499_v2 = vld [vmem:[%s2086_s3 + $0xe0] sm:$0xff]  ;;  %v1481_v4 = vld [vmem:[%s2086_s3 + $0x50] sm:$0xff]  ;;  %v1490_v5 = vld [vmem:[%s2086_s3 + $0x98] sm:$0xff] }
  0x13   :  { %257 = vmatpush.bf16.msrb.mxu3 %v1157_v43  ;;  %229 = vmatpush.bf16.msrb.mxu1 %v1149_v50  ;;  %v1498_v6 = vld [vmem:[%s2086_s3 + $0xd8] sm:$0xff]  ;;  %v1472_v7 = vld [vmem:[%s2086_s3 + $0x8] sm:$0xff]  ;;  %v1489_v9 = vld [vmem:[%s2086_s3 + $0x90] sm:$0xff] }
  0x14   :  { %v1480_v8 = vld [vmem:[%s2086_s3 + $0x48] sm:$0xff]  ;;  %v1497_v10 = vld [vmem:[%s2086_s3 + $0xd0] sm:$0xff]  ;;  %v1471_v11 = vld [vmem:[%s2086_s3] sm:$0xff] }
  0x15   :  { %930 = vmatpush.bf16.msra.mxu0 %v1478_v51  ;;  %v1479_v12 = vld [vmem:[%s2086_s3 + $0x40] sm:$0xff]  ;;  %v1510_v13 = vld [vmem:[%s2086_s3 + $0x138] sm:$0xff]  ;;  %v1488_v15 = vld [vmem:[%s2086_s3 + $0x88] sm:$0xff] }
  0x16   :  { %958 = vmatpush.bf16.msra.mxu2 %v1494_v48  ;;  %v1518_v14 = vld [vmem:[%s2086_s3 + $0x178] sm:$0xff]  ;;  %v1496_v16 = vld [vmem:[%s2086_s3 + $0xc8] sm:$0xff]  ;;  %v1824_v17 = vld [vmem:[%s2087_s2] sm:$0xff] }
  0x17   :  { %972 = vmatpush.bf16.msra.mxu3 %v1502_v49  ;;  %944 = vmatpush.bf16.msra.mxu1 %v1486_v52  ;;  %v47_v18 = vperm.slane %v1824_v17, 0  ;;  %v48_v19 = vperm.slane %v1824_v17, 1  ;;  %v1509_v20 = vld [vmem:[%s2086_s3 + $0x130] sm:$0xff]  ;;  %v1495_v24 = vld [vmem:[%s2086_s3 + $0xc0] sm:$0xff]  ;;  %v1526_v27 = vld [vmem:[%s2086_s3 + $0x1b8] sm:$0xff]  ;;  %v49_v34 = vperm.slane %v1824_v17, 2 }
  0x18   :  { %v1517_v21 = vld [vmem:[%s2086_s3 + $0x170] sm:$0xff]  ;;  %v1534_v28 = vld [vmem:[%s2086_s3 + $0x1f8] sm:$0xff]  ;;  %v1508_v31 = vld [vmem:[%s2086_s3 + $0x128] sm:$0xff]  ;;  %v50_v36 = vperm.slane %v1824_v17, 3 }
  0x19   :  { %931 = vmatpush.bf16.msra.mxu0 %v1477_v53  ;;  %v1516_v32 = vld [vmem:[%s2086_s3 + $0x168] sm:$0xff]  ;;  %v1525_v37 = vld [vmem:[%s2086_s3 + $0x1b0] sm:$0xff]  ;;  %v1507_v42 = vld [vmem:[%s2086_s3 + $0x120] sm:$0xff] }
  0x1a   :  { %959 = vmatpush.bf16.msra.mxu2 %v1493_v57  ;;  %v1533_v38 = vld [vmem:[%s2086_s3 + $0x1f0] sm:$0xff]  ;;  %v1515_v43 = vld [vmem:[%s2086_s3 + $0x160] sm:$0xff]  ;;  %v1524_v52 = vld [vmem:[%s2086_s3 + $0x1a8] sm:$0xff] }
  0x1b   :  { %945 = vmatpush.bf16.msra.mxu1 %v1485_v54  ;;  %973 = vmatpush.bf16.msra.mxu3 %v1501_v58  ;;  %v1532_v53 = vld [vmem:[%s2086_s3 + $0x1e8] sm:$0xff] }
  0x1c   :  { %1194 = vmatmul.msk.bf16.vlgmr.msrb.gmra.mxu0 %vm148_vm0, %v1454_v23  ;;  %1195 = vmatmul.msk.bf16.vlgmr.msrb.gmra.mxu1 %vm148_vm0, %v1454_v23 }
  0x1d   :  { %1196 = vmatmul.msk.bf16.vlgmr.msrb.gmra.mxu2 %vm148_vm0, %v1454_v23  ;;  %932 = vmatpush.bf16.msra.mxu0 %v1476_v55 }
  0x1e   :  { %1197 = vmatmul.msk.bf16.vlgmr.msrb.gmra.mxu3 %vm148_vm0, %v1454_v23  ;;  %960 = vmatpush.bf16.msra.mxu2 %v1492_v61  ;;  %v1487_v23 = vld [vmem:[%s2086_s3 + $0x80] sm:$0xff]  ;;  %v1514_v61 = vld [vmem:[%s2086_s3 + $0x158] sm:$0xff] }
  0x1f   :  { %946 = vmatpush.bf16.msra.mxu1 %v1484_v56  ;;  %974 = vmatpush.bf16.msra.mxu3 %v1500_v62 }
  0x21   :  { %933 = vmatpush.bf16.msra.mxu0 %v1475_v59 }
  0x22   :  { %961 = vmatpush.bf16.msra.mxu2 %v1491_v1  ;;  %v51_v1 = vperm.slane %v1824_v17, 4 }
  0x23   :  { %947 = vmatpush.bf16.msra.mxu1 %v1483_v60  ;;  %975 = vmatpush.bf16.msra.mxu3 %v1499_v2  ;;  %v1506_v60 = vld [vmem:[%s2086_s3 + $0x118] sm:$0xff] }
  0x25   :  { %934 = vmatpush.bf16.msra.mxu0 %v1474_v63 }
  0x26   :  { %962 = vmatpush.bf16.msra.mxu2 %v1490_v5  ;;  %v1523_v5 = vld [vmem:[%s2086_s3 + $0x1a0] sm:$0xff] }
  0x27   :  { %948 = vmatpush.bf16.msra.mxu1 %v1482_v0  ;;  %976 = vmatpush.bf16.msra.mxu3 %v1498_v6  ;;  %v1531_v6 = vld [vmem:[%s2086_s3 + $0x1e0] sm:$0xff] }
  0x29   :  { %935 = vmatpush.bf16.msra.mxu0 %v1473_v3 }
  0x2a   :  { %963 = vmatpush.bf16.msra.mxu2 %v1489_v9  ;;  %v53_v9 = vperm.slane %v1824_v17, 6 }
  0x2b   :  { %949 = vmatpush.bf16.msra.mxu1 %v1481_v4  ;;  %977 = vmatpush.bf16.msra.mxu3 %v1497_v10  ;;  %v52_v4 = vperm.slane %v1824_v17, 5 }
  0x2d   :  { %936 = vmatpush.bf16.msra.mxu0 %v1472_v7 }
  0x2e   :  { %964 = vmatpush.bf16.msra.mxu2 %v1488_v15 }
  0x2f   :  { %950 = vmatpush.bf16.msra.mxu1 %v1480_v8  ;;  %978 = vmatpush.bf16.msra.mxu3 %v1496_v16 }
  0x31   :  { %937 = vmatpush.bf16.msra.mxu0 %v1471_v11 }
  0x32   :  { %965 = vmatpush.bf16.msra.mxu2 %v1487_v23 }
  0x33   :  { %951 = vmatpush.bf16.msra.mxu1 %v1479_v12  ;;  %979 = vmatpush.bf16.msra.mxu3 %v1495_v24 }
  0x35   :  { %986 = vmatpush.bf16.msrb.mxu0 %v1510_v13  ;;  %v1505_v13 = vld [vmem:[%s2086_s3 + $0x110] sm:$0xff] }
  0x36   :  { %1014 = vmatpush.bf16.msrb.mxu2 %v1526_v27 }
  0x37   :  { %1000 = vmatpush.bf16.msrb.mxu1 %v1518_v14  ;;  %1028 = vmatpush.bf16.msrb.mxu3 %v1534_v28  ;;  %v1513_v14 = vld [vmem:[%s2086_s3 + $0x150] sm:$0xff]  ;;  %v1522_v28 = vld [vmem:[%s2086_s3 + $0x198] sm:$0xff] }
  0x39   :  { %987 = vmatpush.bf16.msrb.mxu0 %v1509_v20 }
  0x3a   :  { %1015 = vmatpush.bf16.msrb.mxu2 %v1525_v37 }
  0x3b   :  { %1001 = vmatpush.bf16.msrb.mxu1 %v1517_v21  ;;  %1029 = vmatpush.bf16.msrb.mxu3 %v1533_v38  ;;  %v54_v21 = vperm.slane %v1824_v17, 7 }
  0x3d   :  { %988 = vmatpush.bf16.msrb.mxu0 %v1508_v31 }
  0x3e   :  { %1016 = vmatpush.bf16.msrb.mxu2 %v1524_v52  ;;  %v1521_v52 = vld [vmem:[%s2086_s3 + $0x190] sm:$0xff] }
  0x3f   :  { %1002 = vmatpush.bf16.msrb.mxu1 %v1516_v32  ;;  %1030 = vmatpush.bf16.msrb.mxu3 %v1532_v53  ;;  %v1529_v53 = vld [vmem:[%s2086_s3 + $0x1d0] sm:$0xff] }
  0x41   :  { %989 = vmatpush.bf16.msrb.mxu0 %v1507_v42 }
  0x42   :  { %1017 = vmatpush.bf16.msrb.mxu2 %v1523_v5  ;;  %v1511_v5 = vld [vmem:[%s2086_s3 + $0x140] sm:$0xff] }
  0x43   :  { %1003 = vmatpush.bf16.msrb.mxu1 %v1515_v43  ;;  %1031 = vmatpush.bf16.msrb.mxu3 %v1531_v6 }
  0x45   :  { %990 = vmatpush.bf16.msrb.mxu0 %v1506_v60  ;;  %v1503_v60 = vld [vmem:[%s2086_s3 + $0x100] sm:$0xff] }
  0x46   :  { %1018 = vmatpush.bf16.msrb.mxu2 %v1522_v28 }
  0x47   :  { %1004 = vmatpush.bf16.msrb.mxu1 %v1514_v61 }
  0x49   :  { %991 = vmatpush.bf16.msrb.mxu0 %v1505_v13 }
  0x4a   :  { %1019 = vmatpush.bf16.msrb.mxu2 %v1521_v52 }
  0x4b   :  { %1005 = vmatpush.bf16.msrb.mxu1 %v1513_v14 }
  0x89   :  { %v161_v22 = vpop.f32.mrf.mxu0  ;;  %v175_v26 = vpop.f32.mrf.mxu1 }
  0x8a   :  { %v1840_v25 = vadd.f32 %v161_v22, %v47_v18  ;;  %v1848_v29 = vadd.f32 %v175_v26, %v48_v19 }
  0x8c   :  { %v264_v30 = vmul.f32 %v1840_v25, %v1840_v25  ;;  %v265_v33 = vmul.f32 %v1848_v29, %v1848_v29 }
  0x8e   :  { %v280_v35 = vmul.f32 %v264_v30, %v1840_v25  ;;  %v281_v39 = vmul.f32 %v265_v33, %v1848_v29  ;;  %v1530_v30 = vld [vmem:[%s2086_s3 + $0x1d8] sm:$0xff] }
  0x8f   :  { %1032 = vmatpush.bf16.msrb.mxu3 %v1530_v30 }
  0x90   :  { %v296_v40 = vmul.f32 0.044715, %v280_v35  ;;  %v189_v41 = vpop.f32.mrf.mxu2  ;;  %v297_v44 = vmul.f32 0.044715, %v281_v39 }
  0x91   :  { %v1876_v45 = vadd.f32 %v189_v41, %v49_v34  ;;  %v203_v46 = vpop.f32.mrf.mxu3  ;;  %v163_v47 = vpop.f32.mrf.mxu0  ;;  %v1512_v41 = vld [vmem:[%s2086_s3 + $0x148] sm:$0xff] }
  0x92   :  { %v312_v48 = vadd.f32 %v296_v40, %v1840_v25  ;;  %v1881_v49 = vadd.f32 %v203_v46, %v50_v36  ;;  %v1883_v50 = vadd.f32 %v163_v47, %v47_v18  ;;  %v177_v51 = vpop.f32.mrf.mxu1  ;;  %v313_v54 = vadd.f32 %v297_v44, %v1848_v29  ;;  %v1504_v40 = vld [vmem:[%s2086_s3 + $0x108] sm:$0xff]  ;;  %1006 = vmatpush.bf16.msrb.mxu1 %v1512_v41 }
  0x93   :  { %v266_v55 = vmul.f32 %v1876_v45, %v1876_v45  ;;  %v1894_v56 = vadd.f32 %v177_v51, %v48_v19  ;;  %992 = vmatpush.bf16.msrb.mxu0 %v1504_v40  ;;  %1033 = vmatpush.bf16.msrb.mxu3 %v1529_v53 }
  0x94   :  { %v328_v57 = vmul.f32 0.7978846, %v312_v48  ;;  %v267_v58 = vmul.f32 %v1881_v49, %v1881_v49  ;;  %v272_v59 = vmul.f32 %v1883_v50, %v1883_v50  ;;  %v329_v62 = vmul.f32 0.7978846, %v313_v54 }
  0x95   :  { %v282_v63 = vmul.f32 %v266_v55, %v1876_v45  ;;  %v273_v0 = vmul.f32 %v1894_v56, %v1894_v56 }
  0x96   :  { %1539 = vtanh.f32 %v328_v57  ;;  %v283_v2 = vmul.f32 %v267_v58, %v1881_v49  ;;  %v288_v3 = vmul.f32 %v272_v59, %v1883_v50  ;;  %1007 = vmatpush.bf16.msrb.mxu1 %v1511_v5 }
  0x97   :  { %1541 = vtanh.f32 %v329_v62  ;;  %v298_v7 = vmul.f32 0.044715, %v282_v63  ;;  %v289_v8 = vmul.f32 %v273_v0, %v1894_v56  ;;  %993 = vmatpush.bf16.msrb.mxu0 %v1503_v60 }
  0x98   :  { %v299_v10 = vmul.f32 0.044715, %v283_v2  ;;  %v304_v11 = vmul.f32 0.044715, %v288_v3  ;;  %v191_v12 = vpop.f32.mrf.mxu2 }
  0x99   :  { %v314_v15 = vadd.f32 %v298_v7, %v1876_v45  ;;  %v305_v16 = vmul.f32 0.044715, %v289_v8  ;;  %v1928_v18 = vadd.f32 %v191_v12, %v49_v34  ;;  %v205_v19 = vpop.f32.mrf.mxu3  ;;  %v217_v20 = vpop.f32.mrf.mxu0  ;;  %v1528_v12 = vld [vmem:[%s2086_s3 + $0x1c8] sm:$0xff] }
  0x9a   :  { %v315_v22 = vadd.f32 %v299_v10, %v1881_v49  ;;  %v320_v23 = vadd.f32 %v304_v11, %v1883_v50  ;;  %v1935_v24 = vadd.f32 %v205_v19, %v50_v36  ;;  %v1939_v26 = vadd.f32 %v217_v20, %v51_v1  ;;  %v231_v27 = vpop.f32.mrf.mxu1  ;;  %v1520_v11 = vld [vmem:[%s2086_s3 + $0x188] sm:$0xff]  ;;  %1034 = vmatpush.bf16.msrb.mxu3 %v1528_v12 }
  0x9b   :  { %v330_v31 = vmul.f32 0.7978846, %v314_v15  ;;  %v321_v32 = vadd.f32 %v305_v16, %v1894_v56  ;;  %v274_v33 = vmul.f32 %v1928_v18, %v1928_v18  ;;  %v1952_v34 = vadd.f32 %v231_v27, %v52_v4  ;;  %1020 = vmatpush.bf16.msrb.mxu2 %v1520_v11 }
  0x9c   :  { %v1540_v35 = vpop.eup %1539  ;;  %v331_v36 = vmul.f32 0.7978846, %v315_v22  ;;  %v336_v37 = vmul.f32 0.7978846, %v320_v23  ;;  %v275_v38 = vmul.f32 %v1935_v24, %v1935_v24  ;;  %v268_v39 = vmul.f32 %v1939_v26, %v1939_v26 }
  0x9d   :  { %v1542_v42 = vpop.eup %1541  ;;  %v360_v43 = vadd.f32 1.0, %v1540_v35  ;;  %1543 = vtanh.f32 %v330_v31  ;;  %v337_v44 = vmul.f32 0.7978846, %v321_v32  ;;  %v290_v46 = vmul.f32 %v274_v33, %v1928_v18  ;;  %v1527_v35 = vld [vmem:[%s2086_s3 + $0x1c0] sm:$0xff] }
  0x9e   :  { %v361_v47 = vadd.f32 1.0, %v1542_v42  ;;  %1545 = vtanh.f32 %v331_v36  ;;  %v291_v48 = vmul.f32 %v275_v38, %v1935_v24  ;;  %v284_v51 = vmul.f32 %v268_v39, %v1939_v26  ;;  %1035 = vmatpush.bf16.msrb.mxu3 %v1527_v35 }
  0x9f   :  { %1547 = vtanh.f32 %v336_v37  ;;  %v306_v54 = vmul.f32 0.044715, %v290_v46  ;;  %v269_v55 = vmul.f32 %v1952_v34, %v1952_v34  ;;  %v376_v61 = vmul.f32 0.5, %v360_v43 }
  0xa0   :  { %1549 = vtanh.f32 %v337_v44  ;;  %v307_v57 = vmul.f32 0.044715, %v291_v48  ;;  %v300_v58 = vmul.f32 0.044715, %v284_v51  ;;  %v245_v59 = vpop.f32.mrf.mxu2  ;;  %v377_v6 = vmul.f32 0.5, %v361_v47 }
  0xa1   :  { %v322_v62 = vadd.f32 %v306_v54, %v1928_v18  ;;  %v285_v63 = vmul.f32 %v269_v55, %v1952_v34  ;;  %v1982_v0 = vadd.f32 %v245_v59, %v53_v9  ;;  %v259_v2 = vpop.f32.mrf.mxu3  ;;  %v219_v3 = vpop.f32.mrf.mxu0  ;;  %v392_v39 = vmul.f32 %v376_v61, %v1840_v25 }
  0xa2   :  { %v323_v7 = vadd.f32 %v307_v57, %v1935_v24  ;;  %v316_v8 = vadd.f32 %v300_v58, %v1939_v26  ;;  %v1991_v10 = vadd.f32 %v259_v2, %v54_v21  ;;  %v2003_v19 = vadd.f32 %v219_v3, %v51_v1  ;;  %v1519_v1 = vld [vmem:[%s2086_s3 + $0x180] sm:$0xff]  ;;  %v233_v41 = vpop.f32.mrf.mxu1 }
  0xa3   :  { %v1544_v13 = vpop.eup %1543  ;;  %v338_v14 = vmul.f32 0.7978846, %v322_v62  ;;  %v301_v15 = vmul.f32 0.044715, %v285_v63  ;;  %v270_v16 = vmul.f32 %v1982_v0, %v1982_v0  ;;  %v393_v42 = vmul.f32 %v377_v6, %v1848_v29  ;;  %1021 = vmatpush.bf16.msrb.mxu2 %v1519_v1 }
  0xa4   :  { %v1546_v20 = vpop.eup %1545  ;;  %v362_v22 = vadd.f32 1.0, %v1544_v13  ;;  %v339_v23 = vmul.f32 0.7978846, %v323_v7  ;;  %v332_v27 = vmul.f32 0.7978846, %v316_v8  ;;  %v271_v28 = vmul.f32 %v1991_v10, %v1991_v10 }
  0xa5   :  { %v1548_v30 = vpop.eup %1547  ;;  %v363_v31 = vadd.f32 1.0, %v1546_v20  ;;  %1551 = vtanh.f32 %v338_v14  ;;  %v317_v32 = vadd.f32 %v301_v15, %v1952_v34  ;;  %v286_v33 = vmul.f32 %v270_v16, %v1982_v0 }
  0xa6   :  { %v1550_v36 = vpop.eup %1549  ;;  %v368_v37 = vadd.f32 1.0, %v1548_v30  ;;  %1553 = vtanh.f32 %v339_v23  ;;  %v287_v38 = vmul.f32 %v271_v28, %v1991_v10  ;;  %v378_v48 = vmul.f32 0.5, %v362_v22 }
  0xa7   :  { %v369_v40 = vadd.f32 1.0, %v1550_v36  ;;  %v333_v43 = vmul.f32 0.7978846, %v317_v32  ;;  %v302_v44 = vmul.f32 0.044715, %v286_v33  ;;  %v379_v51 = vmul.f32 0.5, %v363_v31 }
  0xa8   :  { %v303_v46 = vmul.f32 0.044715, %v287_v38  ;;  %v247_v47 = vpop.f32.mrf.mxu2  ;;  %1555 = vtanh.f32 %v332_v27  ;;  %v276_v52 = vmul.f32 %v2003_v19, %v2003_v19  ;;  %v384_v54 = vmul.f32 0.5, %v368_v37 }
  0xa9   :  { %v261_v53 = vpop.f32.mrf.mxu3  ;;  %v318_v25 = vadd.f32 %v302_v44, %v1982_v0  ;;  %v2024_v29 = vadd.f32 %v233_v41, %v52_v4  ;;  %v385_v58 = vmul.f32 0.5, %v369_v40  ;;  %v2029_v60 = vadd.f32 %v247_v47, %v53_v9 }
  0xaa   :  { %v319_v55 = vadd.f32 %v303_v46, %v1991_v10  ;;  %v292_v59 = vmul.f32 %v276_v52, %v2003_v19  ;;  %v2033_v61 = vadd.f32 %v261_v53, %v54_v21  ;;  %1557 = vtanh.f32 %v333_v43 }
  0xab   :  { %v1552_v57 = vpop.eup %1551  ;;  %v334_v2 = vmul.f32 0.7978846, %v318_v25  ;;  %v277_v4 = vmul.f32 %v2024_v29, %v2024_v29  ;;  %v278_v6 = vmul.f32 %v2029_v60, %v2029_v60  ;;  %v400_v7 = vmul.f32 %v384_v54, %v1883_v50 }
  0xac   :  { %v1554_v62 = vpop.eup %1553  ;;  %v370_v63 = vadd.f32 1.0, %v1552_v57  ;;  %v308_v5 = vmul.f32 0.044715, %v292_v59  ;;  %v279_v9 = vmul.f32 %v2033_v61, %v2033_v61  ;;  %v335_v21 = vmul.f32 0.7978846, %v319_v55 }
  0xad   :  { %v371_v3 = vadd.f32 1.0, %v1554_v62  ;;  %v293_v8 = vmul.f32 %v277_v4, %v2024_v29  ;;  %v401_v12 = vmul.f32 %v385_v58, %v1894_v56  ;;  %v294_v15 = vmul.f32 %v278_v6, %v2029_v60 }
  0xae   :  { %v386_v17 = vmul.f32 0.5, %v370_v63  ;;  %v1556_v11 = vpop.eup %1555  ;;  %v324_v14 = vadd.f32 %v308_v5, %v2003_v19  ;;  %v394_v16 = vmul.f32 %v378_v48, %v1876_v45  ;;  %1559 = vtanh.f32 %v334_v2 }
  0xaf   :  { %v387_v13 = vmul.f32 0.5, %v371_v3  ;;  %v309_v22 = vmul.f32 0.044715, %v293_v8  ;;  %v310_v27 = vmul.f32 0.044715, %v294_v15  ;;  %v295_v28 = vmul.f32 %v279_v9, %v2033_v61 }
  0xb0   :  { %v402_v20 = vmul.f32 %v386_v17, %v1928_v18  ;;  %v340_v23 = vmul.f32 0.7978846, %v324_v14  ;;  %v1558_v30 = vpop.eup %1557  ;;  %v395_v56 = vmul.f32 %v379_v51, %v1881_v49  ;;  %1561 = vtanh.f32 %v335_v21 }
  0xb1   :  { %v403_v50 = vmul.f32 %v387_v13, %v1935_v24  ;;  %v325_v31 = vadd.f32 %v309_v22, %v2024_v29  ;;  %v410_v32 = vpack.c.bf16 %v400_v7, %v392_v39  ;;  %v326_v45 = vadd.f32 %v310_v27, %v2029_v60 }
  0xb2   :  { %1563 = vtanh.f32 %v340_v23  ;;  %v311_v33 = vmul.f32 0.044715, %v295_v28  ;;  %v411_v18 = vpack.c.bf16 %v401_v12, %v393_v42  ;;  %v412_v35 = vpack.c.bf16 %v402_v20, %v394_v16  ;;  %v27_v28 = vld [vmem:[%s2085_s0] sm:$0xff]  }
  0xb3   :  { %v341_v1 = vmul.f32 0.7978846, %v325_v31  ;;  %938 = vmatmul.bf16.vlgmr.msra.gmra.mxu0 %v410_v32  ;;  %v413_v24 = vpack.c.bf16 %v403_v50, %v395_v56  ;;  %v342_v36 = vmul.f32 0.7978846, %v326_v45  ;;  %v364_v40 = vadd.f32 1.0, %v1556_v11 }
  0xb4   :  { %v327_v37 = vadd.f32 %v311_v33, %v2033_v61  ;;  %952 = vmatmul.bf16.vlgmr.msra.gmra.mxu1 %v411_v18  ;;  %v1560_v38 = vpop.eup %1559  ;;  %966 = vmatmul.bf16.vlgmr.msra.gmra.mxu2 %v412_v35  ;;  %v365_v43 = vadd.f32 1.0, %v1558_v30  ;;  %v408_v33 = vunpack.c.l.bf16 %v27_v28 }
  0xb5   :  { %1565 = vtanh.f32 %v341_v1  ;;  %980 = vmatmul.bf16.vlgmr.msra.gmra.mxu3 %v413_v24  ;;  %v380_v42 = vmul.f32 0.5, %v364_v40  ;;  %v366_v44 = vadd.f32 1.0, %v1560_v38  ;;  %v1536_v24 = vld [vmem:[%s2088_s4] ss:$0 sm:$0xff] }
  0xb6   :  { %1567 = vtanh.f32 %v342_v36  ;;  %v343_v49 = vmul.f32 0.7978846, %v327_v37  ;;  %v1562_v39 = vpop.eup %1561  ;;  %v381_v53 = vmul.f32 0.5, %v365_v43 }
  0xb7   :  { %v367_v48 = vadd.f32 1.0, %v1562_v39  ;;  %v396_v25 = vmul.f32 %v380_v42, %v1939_v26  ;;  %v382_v55 = vmul.f32 0.5, %v366_v44 }
  0xb8   :  { %v1564_v41 = vpop.eup %1563  ;;  %1569 = vtanh.f32 %v343_v49  ;;  %v397_v5 = vmul.f32 %v381_v53, %v1952_v34 }
  0xb9   :  { %v372_v46 = vadd.f32 1.0, %v1564_v41  ;;  %v383_v63 = vmul.f32 0.5, %v367_v48  ;;  %v398_v9 = vmul.f32 %v382_v55, %v1982_v0  ;;  %v409_v41 = vunpack.c.h.bf16 %v27_v28 }
  0xbb   :  { %v1566_v47 = vpop.eup %1565  ;;  %v388_v51 = vmul.f32 0.5, %v372_v46  ;;  %v399_v21 = vmul.f32 %v383_v63, %v1991_v10 }
  0xbc   :  { %v1568_v52 = vpop.eup %1567  ;;  %v373_v54 = vadd.f32 1.0, %v1566_v47 }
  0xbd   :  { %v404_v57 = vmul.f32 %v388_v51, %v2003_v19  ;;  %v374_v58 = vadd.f32 1.0, %v1568_v52  ;;  %v1577_v51 = vmov 32.0  }
  0xbe   :  { %v1570_v59 = vpop.eup %1569  ;;  %v389_v62 = vmul.f32 0.5, %v373_v54  ;;  %1571 = vrcp.f32 %v1577_v51 }
  0xbf   :  { %v390_v2 = vmul.f32 0.5, %v374_v58  ;;  %v375_v4 = vadd.f32 1.0, %v1570_v59  ;;  %v414_v3 = vpack.c.bf16 %v404_v57, %v396_v25 }
  0xc0   :  { %v405_v6 = vmul.f32 %v389_v62, %v2024_v29 }
  0xc1   :  { %v406_v7 = vmul.f32 %v390_v2, %v2029_v60  ;;  %v391_v17 = vmul.f32 0.5, %v375_v4 }
  0xc2   :  { %v415_v26 = vpack.c.bf16 %v405_v6, %v397_v5 }
  0xc3   :  { %v407_v19 = vmul.f32 %v391_v17, %v2033_v61  ;;  %994 = vmatmul.bf16.vlgmr.msrb.gmra.mxu0 %v414_v3  ;;  %v416_v8 = vpack.c.bf16 %v406_v7, %v398_v9 }
  0xc4   :  { %1008 = vmatmul.bf16.vlgmr.msrb.gmra.mxu1 %v415_v26  ;;  %v1572_v52 = vpop.eup %1571 }
  0xc5   :  { %1022 = vmatmul.bf16.vlgmr.msrb.gmra.mxu2 %v416_v8  ;;  %v417_v11 = vpack.c.bf16 %v407_v19, %v399_v21  ;;  %v1059_v53 = vmul.f32 32.0, %v1572_v52  ;;  %vm1063_vm1 = vweird.f32 %v1572_v52 }
  0xc7   :  { %1036 = vmatmul.bf16.vlgmr.msrb.gmra.mxu3 %v417_v11  ;;  %v1060_v54 = vsub.f32 1.0, %v1059_v53 }
  0xc9   :  { %v1061_v25 = vmul.f32 %v1572_v52, %v1060_v54 }
  0xcb   :  { %v1062_v55 = vadd.f32 %v1572_v52, %v1061_v25 }
  0xcd   :  { %v1064_v57 = vsel %vm1063_vm1, %v1572_v52, %v1062_v55 }
 0x130   :  { %v939_v12 = vpop.f32.mrf.mxu0 }
 0x131   :  { %v953_v34 = vpop.f32.mrf.mxu1 }
 0x132   :  { %v954_v14 = vadd.f32 %v953_v34, %v939_v12 }
 0x137   :  { %v967_v29 = vpop.f32.mrf.mxu2 }
 0x138   :  { %v941_v13 = vpop.f32.mrf.mxu0  ;;  %v981_v0 = vpop.f32.mrf.mxu3  ;;  %v968_v60 = vadd.f32 %v967_v29, %v954_v14 }
 0x139   :  { %v955_v15 = vpop.f32.mrf.mxu1 }
 0x13a   :  { %v982_v16 = vadd.f32 %v981_v0, %v968_v60  ;;  %v956_v10 = vadd.f32 %v955_v15, %v941_v13  ;;  %v1537_v60 = vld [vmem:[%s2089_s5] ss:$0 sm:$0xff] }
 0x13f   :  { %v969_v22 = vpop.f32.mrf.mxu2 }
 0x140   :  { %v995_v20 = vpop.f32.mrf.mxu0  ;;  %v983_v50 = vpop.f32.mrf.mxu3  ;;  %v970_v23 = vadd.f32 %v969_v22, %v956_v10  ;;  %v1538_v22 = vld [vmem:[%s2090_s6] ss:$0 sm:$0xff] }
 0x141   :  { %v996_v61 = vadd.f32 %v995_v20, %v982_v16  ;;  %v1009_v27 = vpop.f32.mrf.mxu1 }
 0x142   :  { %v984_v56 = vadd.f32 %v983_v50, %v970_v23 }
 0x143   :  { %v1010_v30 = vadd.f32 %v1009_v27, %v996_v61 }
 0x148   :  { %v997_v31 = vpop.f32.mrf.mxu0  ;;  %v1023_v32 = vpop.f32.mrf.mxu2 }
 0x149   :  { %v1024_v45 = vadd.f32 %v1023_v32, %v1010_v30  ;;  %v998_v1 = vadd.f32 %v997_v31, %v984_v56  ;;  %v1011_v37 = vpop.f32.mrf.mxu1 }
 0x14a   :  { %v1037_v18 = vpop.f32.mrf.mxu3 }
 0x14b   :  { %v1038_v35 = vadd.f32 %v1037_v18, %v1024_v45  ;;  %v1012_v38 = vadd.f32 %v1011_v37, %v998_v1 }
 0x14d   :  { %v1042_v36 = vadd.f32 %v1038_v35, %v408_v33 }
 0x14f   :  { %v1048_v40 = vadd.f32 %v1536_v24, %v1042_v36 }
 0x150   :  { %v1025_v49 = vpop.f32.mrf.mxu2 }
 0x151   :  { %v1026_v39 = vadd.f32 %v1025_v49, %v1012_v38  ;;  %v1052_v43 = vsel %vm148_vm0, %v1048_v40, 0.0 }
 0x152   :  { %v1039_v42 = vpop.f32.mrf.mxu3  ;;  %1053 = vadd.xlane.f32.xlu0 %v1052_v43 }
 0x153   :  { %v1040_v44 = vadd.f32 %v1039_v42, %v1026_v39 }
 0x155   :  { %v1043_v46 = vadd.f32 %v1040_v44, %v409_v41 }
 0x157   :  { %v1049_v47 = vadd.f32 %v1536_v24, %v1043_v46 }
 0x159   :  { %v1055_v48 = vsel %vm148_vm0, %v1049_v47, 0.0 }
 0x15a   :  { %1056 = vadd.xlane.f32.xlu0 %v1055_v48 }
 0x1c5   :  { %v1054_v58 = vpop.xlane.xlu0 %1053 }
 0x1c6   :  { %v1065_v59 = vmul.f32 %v1064_v57, %v1054_v58 }
 0x1c8   :  { %v1067_v62 = vsub.f32 %v1048_v40, %v1065_v59 }
 0x1ca   :  { %v1069_v63 = vmul.f32 %v1067_v62, %v1067_v62 }
 0x1cc   :  { %v1071_v2 = vsel %vm148_vm0, %v1069_v63, 0.0 }
 0x1cd   :  { %1072 = vadd.xlane.f32.xlu1 %v1071_v2  ;;  %v1057_v4 = vpop.xlane.xlu0 %1056 }
 0x1ce   :  { %v1066_v3 = vmul.f32 %v1064_v57, %v1057_v4 }
 0x1d0   :  { %v1068_v5 = vsub.f32 %v1049_v47, %v1066_v3 }
 0x1d2   :  { %v1070_v6 = vmul.f32 %v1068_v5, %v1068_v5 }
 0x1d4   :  { %v1074_v9 = vsel %vm148_vm0, %v1070_v6, 0.0 }
 0x1d5   :  { %1075 = vadd.xlane.f32.xlu1 %v1074_v9 }
 0x240   :  { %v1073_v7 = vpop.xlane.xlu1 %1072 }
 0x241   :  { %v1077_v17 = vmul.f32 %v1073_v7, %v1064_v57 }
 0x243   :  { %v1079_v26 = vadd.f32 1e-05, %v1077_v17 }
 0x245   :  { %1573 = vrsqrt.f32 %v1079_v26  ;;  %vm1087_vm3 = vweird.f32 %v1079_v26 }
 0x248   :  { %v1076_v21 = vpop.xlane.xlu1 %1075 }
 0x249   :  { %v1078_v19 = vmul.f32 %v1076_v21, %v1064_v57 }
 0x24b   :  { %v1574_v8 = vpop.eup %1573  ;;  %v1080_v11 = vadd.f32 1e-05, %v1078_v19 }
 0x24c   :  { %v1082_v12 = vmul.f32 %v1574_v8, %v1079_v26  ;;  %vm1088_vm2 = vweird.f32 %v1574_v8 }
 0x24d   :  { %1575 = vrsqrt.f32 %v1080_v11  ;;  %vm1089_vm4 = vmor %vm1087_vm3, %vm1088_vm2  ;;  %vm1097_vm7 = vweird.f32 %v1080_v11 }
 0x24e   :  { %v1083_v34 = vmul.f32 %v1574_v8, %v1082_v12 }
 0x250   :  { %v1084_v13 = vmul.f32 0.5, %v1083_v34 }
 0x252   :  { %v1085_v29 = vsub.f32 1.5, %v1084_v13 }
 0x253   :  { %v1576_v14 = vpop.eup %1575 }
 0x254   :  { %v1086_v0 = vmul.f32 %v1574_v8, %v1085_v29  ;;  %v1092_v15 = vmul.f32 %v1576_v14, %v1080_v11  ;;  %vm1098_vm5 = vweird.f32 %v1576_v14 }
 0x255   :  { %vm1099_vm8 = vmor %vm1097_vm7, %vm1098_vm5 }
 0x256   :  { %v1090_v16 = vsel %vm1089_vm4, %v1574_v8, %v1086_v0  ;;  %v1093_v20 = vmul.f32 %v1576_v14, %v1092_v15 }
 0x257   :  { %v1101_v10 = vmul.f32 %v1090_v16, %v1067_v62 }
 0x258   :  { %v1094_v50 = vmul.f32 0.5, %v1093_v20 }
 0x259   :  { %v1106_v61 = vmul.f32 %v1537_v60, %v1101_v10 }
 0x25a   :  { %v1095_v23 = vsub.f32 1.5, %v1094_v50 }
 0x25b   :  { %v1111_v27 = vadd.f32 %v1538_v22, %v1106_v61 }
 0x25c   :  { %v1096_v28 = vmul.f32 %v1576_v14, %v1095_v23 }
 0x25d   :  { %v1113_v30 = vpack.c.bf16 %v1111_v27, %v1111_v27 }
 0x25e   :  { %v1100_v56 = vsel %vm1099_vm8, %v1576_v14, %v1096_v28 }
 0x25f   :  { %1116 = vst.msk [vmem:[%s2091_s7] sm:$0xf] %vm1115_vm6, %v1113_v30  ;;  %v1102_v31 = vmul.f32 %v1100_v56, %v1068_v5 }
 0x261   :  { %v1107_v32 = vmul.f32 %v1537_v60, %v1102_v31 }
 0x263   :  { %v1112_v45 = vadd.f32 %v1538_v22, %v1107_v32 }
 0x265   :  { %v1114_v33 = vpack.c.bf16 %v1112_v45, %v1112_v45 }
 0x267   :  { %1117 = vst.msk [vmem:[%s2091_s7 + $0x4] sm:$0xf] %vm1115_vm6, %v1114_v33 }

// kernel: htr_transformer_decoder_forward.13
= control target key start
LH: loop header
LB: loop body
LE: loop exit
PB: predicated region body
PF: predicated region fallthrough
CT: control target
= control target key end

     0   :  { %vm42_vm0 = vcmask 261120   ;;  %s121_s1 = inlined_call_operand.vmem [shape: bf16[32,128], index: 1, kind: input, shape index: {}]   ;;  %s122_s2 = inlined_call_operand.vmem [shape: f32[1,128], index: 2, kind: input, shape index: {}]   ;;  %s123_s0 = inlined_call_operand.vmem [shape: bf16[16,32], index: 0, kind: input, shape index: {}]   ;;  %s124_s3 = inlined_call_operand.vmem [shape: f32[16,128], index: 3, kind: output, shape index: {}]  }
   0x1   :  { %v81_v0 = vld [vmem:[%s121_s1 + $0x8] sm:$0xff]  ;;  %v80_v1 = vld [vmem:[%s121_s1] sm:$0xff] }
   0x2   :  { %52 = vmatpush.bf16.msra.mxu0 %v81_v0  ;;  %v79_v2 = vld [vmem:[%s123_s0] sm:$0xff] }
   0x3   :  { %v82_v3 = vld [vmem:[%s122_s2] ss:$0 sm:$0xff] }
   0x6   :  { %53 = vmatpush.bf16.msra.mxu0 %v80_v1 }
   0x9   :  { %78 = vmatmul.msk.bf16.vlgmr.msra.gmra.mxu0 %vm42_vm0, %v79_v2 }
  0x86   :  { %v55_v4 = vpop.f32.mrf.mxu0 }
  0x87   :  { %v56_v5 = vadd.f32 %v82_v3, %v55_v4 }
  0x89   :  { %60 = vst [vmem:[%s124_s3] sm:$0xff] %v56_v5 }
  0x8e   :  { %v57_v6 = vpop.f32.mrf.mxu0 }
  0x8f   :  { %v58_v7 = vadd.f32 %v82_v3, %v57_v6 }
  0x91   :  { %61 = vst [vmem:[%s124_s3 + $0x8] sm:$0xff] %v58_v7 }

</bundles_post_ra>
